<compile_context>
chip_gen: v6e
topology: v6e:2x2x1
jax: 0.10.0
libtpu: 0.0.40
codegen_flags: <defaults>
</compile_context>

<pallas_src>
import functools
import math

import jax
import jax.numpy as jnp
from jax.experimental import pallas as pl
from jax.experimental.pallas import tpu as pltpu

# 2 MiB blocks for f32 (smaller for narrower dtypes).  2 input + 2 output
# pipeline buffers stay well under every generation's scoped VMEM default.
_BLOCK_ELEMS = 512 * 1024
# Below this, pallas_call fixed overhead dominates and fused XLA clip wins.
_SMALL_THRESHOLD = 1 << 20


def _clip_kernel(x_ref, o_ref, *, min_val, max_val):
    # Whole-tile elementwise clip on the VPU.  Bounds are compile-time
    # immediates cast to the element dtype (int-safe, no bf16->f32 upcast).
    x = x_ref[...]
    lo = jnp.asarray(min_val, dtype=x.dtype)
    hi = jnp.asarray(max_val, dtype=x.dtype)
    o_ref[...] = jnp.minimum(jnp.maximum(x, lo), hi)


def _pick_lanes(total):
    """Largest lane-dense last dim (multiple of 128) that divides `total`."""
    for lanes in (1024, 512, 256, 128):
        if total % lanes == 0:
            return lanes
    return None


def clip_pallas(img, min_val=0.0, max_val=1.0, *, inplace=False,
                force_pallas=False):
    """Equivalent of torch.clip(img, min_val, max_val) for any-shaped tensor.

    min_val / max_val must be concrete Python numbers (as in the module's
    constructor).
    # TODO(synk): if traced clip bounds are ever needed, pass them as (1,1)
    # SMEM scalars instead of compile-time immediates.
    """
    total = math.prod(img.shape) if img.shape else 1
    lanes = _pick_lanes(total) if total > 0 else None

    use_pallas = force_pallas or total >= _SMALL_THRESHOLD
    if total == 0 or lanes is None or not use_pallas:
        # Fast path: tiny tensors (CoTTA's real call site) or awkward sizes.
        # XLA's fused clip is a single roofline HBM pass; avoids pallas_call
        # dispatch overhead and any pad/slice round trips.
        lo = jnp.asarray(min_val, dtype=img.dtype)
        hi = jnp.asarray(max_val, dtype=img.dtype)
        return jnp.clip(img, lo, hi)

    rows = total // lanes
    x2d = img.reshape(rows, lanes)  # free re-view, no HBM pass

    # Row tile: ~_BLOCK_ELEMS elements per block.  If the whole array fits in
    # one block, use the exact row count (block dim == full dim is allowed);
    # otherwise use a multiple-of-8 tile and let Pallas mask the ragged tail.
    target_rows = max(8, _BLOCK_ELEMS // lanes)   # always a multiple of 8
    tile_m = rows if rows <= target_rows else target_rows
    grid = (pl.cdiv(rows, tile_m),)

    kernel = functools.partial(_clip_kernel, min_val=min_val, max_val=max_val)

    call_kwargs = {}
    if inplace:
        # Writes the result back into the (donated) input buffer.
        call_kwargs["input_output_aliases"] = {0: 0}

    out2d = pl.pallas_call(
        kernel,
        out_shape=jax.ShapeDtypeStruct((rows, lanes), img.dtype),
        grid=grid,
        in_specs=[pl.BlockSpec((tile_m, lanes), lambda i: (i, 0))],
        out_specs=pl.BlockSpec((tile_m, lanes), lambda i: (i, 0)),
        compiler_params=pltpu.CompilerParams(
            dimension_semantics=("parallel",),
        ),
        **call_kwargs,
    )(x2d)

    return out2d.reshape(img.shape)


if __name__ == "__main__":
    key = jax.random.PRNGKey(0)
    k1, k2 = jax.random.split(key)
    min_val, max_val = 0.0, 1.0

    # 1) Tiny CoTTA-style image batch -> fused-XLA fast path of the wrapper.
    x_small = jax.random.normal(k1, (2, 4, 16, 16), dtype=jnp.float32) * 2.0
    out_small = jax.block_until_ready(clip_pallas(x_small, min_val, max_val))
    ref_small = jnp.clip(x_small, min_val, max_val)
    assert out_small.shape == x_small.shape and out_small.dtype == x_small.dtype
    assert bool(jnp.allclose(out_small, ref_small)), "fast-path mismatch"

    # 2) Force the Pallas path on a modest image batch whose row count (660)
    #    gives a 2-step grid with a ragged, masked last block.
    x_big = jax.random.normal(k2, (8, 3, 160, 176), dtype=jnp.float32) * 2.0
    out_big = jax.block_until_ready(
        clip_pallas(x_big, min_val, max_val, force_pallas=True))
    ref_big = jnp.clip(x_big, min_val, max_val)
    assert out_big.shape == x_big.shape and out_big.dtype == x_big.dtype
    assert bool(jnp.allclose(out_big, ref_big)), "pallas-path mismatch"

    print("KERNEL_OK")
</pallas_src>

<mosaic_0001>
module attributes {stable_mosaic.version = 11 : i64} {
  func.func @_clip_kernel(%arg0: i32, %arg1: memref<512x1024xf32, #tpu.memory_space<vmem>>, %arg2: memref<512x1024xf32, #tpu.memory_space<vmem>>) attributes {dimension_semantics = [#tpu.dimension_semantics<parallel>], iteration_bounds = array<i64: 2>, scalar_prefetch = 0 : i64, scratch_operands = 0 : i64, tpu.core_type = #tpu.core_type<tc>, window_params = [{transform_indices = @transform_0, window_bounds = array<i64: 512, 1024>}, {transform_indices = @transform_1, window_bounds = array<i64: 512, 1024>}]} {
    %c0 = arith.constant 0 : index
    %c0_0 = arith.constant 0 : index
    %0 = vector.load %arg1[%c0, %c0_0] : memref<512x1024xf32, #tpu.memory_space<vmem>>, vector<512x1024xf32>
    %cst = arith.constant 0.000000e+00 : f32
    %1 = vector.broadcast %cst : f32 to vector<512x1024xf32>
    %2 = arith.maximumf %0, %1 : vector<512x1024xf32>
    %cst_1 = arith.constant 1.000000e+00 : f32
    %3 = vector.broadcast %cst_1 : f32 to vector<512x1024xf32>
    %4 = arith.minimumf %2, %3 : vector<512x1024xf32>
    %c0_2 = arith.constant 0 : index
    %c0_3 = arith.constant 0 : index
    %5 = vector.load %arg2[%c0_2, %c0_3] : memref<512x1024xf32, #tpu.memory_space<vmem>>, vector<512x1024xf32>
    tpu.vector_store %arg2[%c0_2, %c0_3], %4 {strides = array<i32>} : memref<512x1024xf32, #tpu.memory_space<vmem>>, vector<512x1024xf32>,
    return
  }
  func.func @transform_0(%arg0: i32) -> (i32, i32) {
    %c0_i32 = arith.constant 0 : i32
    %c0_i32_0 = arith.constant 0 : i32
    return %arg0, %c0_i32 : i32, i32
  }
  func.func @transform_1(%arg0: i32) -> (i32, i32) {
    %c0_i32 = arith.constant 0 : i32
    %c0_i32_0 = arith.constant 0 : i32
    return %arg0, %c0_i32 : i32, i32
  }
}

</mosaic_0001>

<bundles_post_ra>
// kernel: tpu_custom_call.1
= control target key start
LH: loop header
LB: loop body
LE: loop exit
PB: predicated region body
PF: predicated region fallthrough
CT: control target
= control target key end

     0   :  { %6 = vsyncpa [#allocation3], 0  ;;  %s3682_s0 = inlined_call_operand.hbm [shape: f32[660,1024], index: 0, kind: input, shape index: {}]   ;;  %s3683_s1 = inlined_call_operand.hbm [shape: f32[660,1024], index: 1, kind: output, shape index: {}]  }
   0x1   :  { %8 = vsyncpa [#allocation3 + $0x1], 0 }
   0x2   :  { %9 = vsyncpa [#allocation4], 0 }
   0x3   :  { %11 = vsyncpa [#allocation4 + $0x1], 0  ;;  %s2481_s6 = smov 0   ;;  %s2483_s7 = smov 0  }
   0x4   :  { %s2485_s8 = smov 0   ;;  %s2487_s9 = smov 0  }
   0x5 LB: > { %s2502_s10 = sadd.s32 4294967295, %s2463_s9   ;;  %s2298_s11 = sadd.s32 4294967294, %s2463_s9   ;;  %s2463_s9 = sphi %s2487_s9, %s3693_s9   ;;  %s2459_s8 = sphi %s2485_s8, %s3692_s8   ;;  %s2455_s7 = sphi %s2483_s7, %s3691_s7   ;;  %s2451_s6 = sphi %s2481_s6, %s3690_s6  }
   0x6   : > { %s2506_s12 = sadd.s32 1, %s2463_s9   ;;  %s24_s13 = sadd.s32 1, %s2459_s8 }
   0x7   : > { %s21_s14 = ssub.s32 %s2463_s9, %s2506_s12  ;;  %p31_p0 = scmp.ne.s32.totalorder %s2459_s8, %s2455_s7 }
   0x8   : > { %p22_p1 = scmp.eq.s32.totalorder %s21_s14, 0  ;;  %p32_p2 = scmp.eq.s32.totalorder %s2463_s9, 0 }
   0x9   : > { %p37_p3 = scmp.ne.s32.totalorder %s2455_s7, %s2451_s6  ;;  %p38_p4 = scmp.eq.s32.totalorder %s2502_s10, 0 }
   0xa   : > { %s2518_s15 = scalar_select %p22_p1, %s2459_s8, %s24_s13  }
   0xb   : > { %p33_p5 = por %p32_p2, %p31_p0  ;;  %p2520_p6 = por %p38_p4, %p37_p3 }
   0xc   : > { %p61_p7 = scmp.eq.s32.totalorder %s2502_s10, 1  ;;  %p67_p8 = scmp.eq.s32.totalorder %s2298_s11, 1 }
   0xd   : > { %p3684_p11 = scmp.ge.s32.totalorder %s2463_s9, 2 }
   0xe   : > { %p2525_p9 = por %p61_p7, %p31_p0  ;;  %p2529_p10 = por %p67_p8, %p37_p3 }
   0xf   : > { %83 = sbr.rel (%p3684_p11) target bundleno = 52 (0x34), region = 16 }
  0x10   : > { %s3687_s18 = scalar_select %p2529_p10, 1, 0 }
  0x14   : > { %86 = sbr.rel (!%p33_p5) target bundleno = 52 (0x34), region = 20  ;;  %s87_s19 = sand.u32 (%p33_p5), 1, %s2459_s8  }
  0x15   : > { %s2302_s20 = sshll.u32 (%p33_p5), %s2463_s9, 6  ;;  %s2301_s21 = sshll.u32 (%p33_p5), %s87_s19, 12 }
  0x16   : > { %s93_s22 = ssub.s32 (%p33_p5), 83, %s2302_s20  ;;  %s2541_s25 = scalar_lea.sflag (%p33_p5), [#allocation3], %s87_s19 }
  0x17   : > { %p94_p12 = scmp.lt.s32.totalorder (%p33_p5), %s93_s22, 64  ;;  %s91_s26 = scalar_lea.vmem (%p33_p5), [#allocation2], %s2301_s21 }
  0x19   : > { %s3695_s22 = smov (!%p94_p12, %s93_s22), 64 }
  0x1a   : > { %s2538_s23 = sshll.u32 %s3695_s22, 10 }
  0x1b   : > { %s99_s24 = ssub.s32 65536, %s2538_s23 }
  0x1c   : > { %100 = vsyncadd %s2541_s25, %s99_s24  ;;  %p2305_p13 = scmp.ne.s32.totalorder %s2538_s23, 0  ;;  %s2326_s27 = sshll.u32 %s2463_s9, 16 }
  0x1d   : > { %s2549_s30 = scalar_lea.hbm %s3682_s0, %s2326_s27  ;;  %s106_s2 = sshll.u32 %s91_s26, 4  ;;  %s2551_s2 = int_to_ptr.vmem [resolvable:$true] %s106_s2 }
  0x1e   : > { %s2373_s3 = scalar_lea.hbm %s2549_s30, %s2538_s23  ;;  %s2377_s11 = scalar_lea.hbm %s3682_s0, 84992 }
  0x1f   : > { %p2374_p0 = scmp.ne.s32.totalorder %s2549_s30, %s2373_s3  ;;  %p2378_p3 = scmp.lt.s32.totalorder %s2549_s30, %s3682_s0 }
  0x20   : > { %p2379_p4 = scmp.lt.s32.totalorder %s2377_s11, %s2373_s3 }
  0x21   : > { %p2375_p1 = pnand %p2374_p0, %p2305_p13 }
  0x22   : > { %p2380_p5 = por %p2379_p4, %p2378_p3 }
  0x23   : > { %p2376_p2 = pneg %p2375_p1 }
  0x25   : > { %p2381_p7 = pnand %p2380_p5, %p2376_p2 }
  0x27   : > { %2384 = shalt.err (!%p2381_p7)
}
  0x28   : > { %s2385_s19 = scalar_lea.vmem %s2551_s2, %s2538_s23  ;;  %s2465_s20 = smov [#allocation2]  }
  0x29   : > { %p2386_p8 = scmp.ne.s32.totalorder %s2551_s2, %s2385_s19  ;;  %s2389_s21 = sshll.u32 %s2465_s20, 4  ;;  %s2390_s21 = int_to_ptr.vmem [resolvable:$false] %s2389_s21 }
  0x2a   : > { %s2391_s22 = scalar_lea.vmem %s2390_s21, 131072  ;;  %p2392_p1 = scmp.lt.s32.totalorder %s2551_s2, %s2390_s21 }
  0x2b   : > { %p2387_p12 = pnand %p2386_p8, %p2305_p13  ;;  %p2393_p11 = scmp.lt.s32.totalorder %s2391_s22, %s2385_s19 }
  0x2d   : > { %p2388_p0 = pneg %p2387_p12  ;;  %p2394_p10 = por %p2393_p11, %p2392_p1 }
  0x2f   : > { %p2395_p3 = pnand %p2394_p10, %p2388_p0 }
  0x31   : > { %2398 = shalt.err (!%p2395_p3)
}
  0x32   : > { %s2466_s24 = smov 1024   ;;  %s2467_s26 = smov 64  }
  0x33   : > { %112 = dma.hbm_to_vmem [thread:$0]  (%p2305_p13), %s2549_s30, %s2538_s23, %s2551_s2, %s2541_s25, %s2466_s24, %s2466_s24, %s2467_s26  }
  0x34 PF: > { %p2310_p2 = scmp.ge.s32.totalorder %s2463_s9, 1  ;;  %p114_p4 = scmp.lt.s32.totalorder %s2463_s9, 3 }
  0x36   : > { %p115_p5 = pnand %p2310_p2, %p114_p4 }
  0x37   : > { %s2580_s27 = sand.u32 (!%p115_p5), 1, %s2455_s7  }
  0x38   : > { %118 = sbr.rel (%p115_p5) target bundleno = 434 (0x1b2), region = 24  ;;  %s2311_s28 = sshll.u32 (!%p115_p5), %s2580_s27, 12 }
  0x39   : > { %s121_s29 = scalar_lea.sflag (!%p115_p5), [#allocation3], %s2580_s27  ;;  %s2586_s3 = scalar_lea.vmem (!%p115_p5), [#allocation2], %s2311_s28 }
  0x3d   : > { %2442 = dma.done.wait (%p2520_p6), %s121_s29, 65536  }
  0x3e   : > { %2444 = vsyncadd (%p2520_p6), %s121_s29, 4294901760  ;;  %v155_v0 = vld [vmem:[%s2586_s3] sm:$0xff]  ;;  %v156_v1 = vld [vmem:[%s2586_s3 + $0x8] sm:$0xff]  ;;  %s2607_s16 = scalar_lea.vmem [#allocation5], %s2311_s28  ;;  %s2204_s23 = scalar_lea.sflag [#allocation4], %s2580_s27 }
  0x3f   : > { %v157_v2 = vld [vmem:[%s2586_s3 + $0x10] sm:$0xff]  ;;  %v667_v3 = vmax.f32 %v155_v0, 0.0  ;;  %v668_v4 = vmax.f32 %v156_v1, 0.0  ;;  %v158_v6 = vld [vmem:[%s2586_s3 + $0x18] sm:$0xff]  ;;  %v159_v7 = vld [vmem:[%s2586_s3 + $0x20] sm:$0xff]  ;;  %s2314_s25 = sshll.u32 (%p2525_p9), %s2502_s10, 6 }
  0x40   : > { %v669_v5 = vmax.f32 %v157_v2, 0.0  ;;  %v160_v8 = vld [vmem:[%s2586_s3 + $0x28] sm:$0xff]  ;;  %v670_v9 = vmax.f32 %v158_v6, 0.0  ;;  %v671_v10 = vmax.f32 %v159_v7, 0.0  ;;  %v161_v12 = vld [vmem:[%s2586_s3 + $0x30] sm:$0xff]  ;;  %v162_v13 = vld [vmem:[%s2586_s3 + $0x38] sm:$0xff] }
  0x41   : > { %v672_v11 = vmax.f32 %v160_v8, 0.0  ;;  %v163_v14 = vld [vmem:[%s2586_s3 + $0x40] sm:$0xff]  ;;  %v1179_v15 = vmin.f32 %v667_v3, 1.0  ;;  %v1180_v16 = vmin.f32 %v668_v4, 1.0  ;;  %v673_v18 = vmax.f32 %v161_v12, 0.0  ;;  %v164_v19 = vld [vmem:[%s2586_s3 + $0x48] sm:$0xff] }
  0x42   : > { %v1181_v17 = vmin.f32 %v669_v5, 1.0  ;;  %v165_v20 = vld [vmem:[%s2586_s3 + $0x50] sm:$0xff]  ;;  %v1182_v21 = vmin.f32 %v670_v9, 1.0  ;;  %v1183_v22 = vmin.f32 %v671_v10, 1.0  ;;  %v674_v24 = vmax.f32 %v162_v13, 0.0  ;;  %v166_v25 = vld [vmem:[%s2586_s3 + $0x58] sm:$0xff] }
  0x43   : > { %v1184_v23 = vmin.f32 %v672_v11, 1.0  ;;  %v167_v26 = vld [vmem:[%s2586_s3 + $0x60] sm:$0xff]  ;;  %1691 = vst [vmem:[%s2607_s16] sm:$0xff] %v1179_v15  ;;  %1692 = vst [vmem:[%s2607_s16 + $0x8] sm:$0xff] %v1180_v16  ;;  %v1185_v27 = vmin.f32 %v673_v18, 1.0  ;;  %v675_v28 = vmax.f32 %v163_v14, 0.0  ;;  %v676_v29 = vmax.f32 %v164_v19, 0.0 }
  0x44   : > { %1693 = vst [vmem:[%s2607_s16 + $0x10] sm:$0xff] %v1181_v17  ;;  %v677_v30 = vmax.f32 %v165_v20, 0.0  ;;  %v168_v31 = vld [vmem:[%s2586_s3 + $0x68] sm:$0xff]  ;;  %v169_v32 = vld [vmem:[%s2586_s3 + $0x70] sm:$0xff]  ;;  %1694 = vst [vmem:[%s2607_s16 + $0x18] sm:$0xff] %v1182_v21  ;;  %v1186_v33 = vmin.f32 %v674_v24, 1.0 }
  0x45   : > { %1695 = vst [vmem:[%s2607_s16 + $0x20] sm:$0xff] %v1183_v22  ;;  %1696 = vst [vmem:[%s2607_s16 + $0x28] sm:$0xff] %v1184_v23  ;;  %v678_v34 = vmax.f32 %v166_v25, 0.0  ;;  %v679_v35 = vmax.f32 %v167_v26, 0.0  ;;  %v680_v36 = vmax.f32 %v168_v31, 0.0  ;;  %v170_v37 = vld [vmem:[%s2586_s3 + $0x78] sm:$0xff] }
  0x46   : > { %v171_v38 = vld [vmem:[%s2586_s3 + $0x80] sm:$0xff]  ;;  %1697 = vst [vmem:[%s2607_s16 + $0x30] sm:$0xff] %v1185_v27  ;;  %v1187_v39 = vmin.f32 %v675_v28, 1.0  ;;  %v1188_v40 = vmin.f32 %v676_v29, 1.0  ;;  %v1189_v41 = vmin.f32 %v677_v30, 1.0  ;;  %v681_v42 = vmax.f32 %v169_v32, 0.0 }
  0x47   : > { %v172_v43 = vld [vmem:[%s2586_s3 + $0x88] sm:$0xff]  ;;  %v173_v44 = vld [vmem:[%s2586_s3 + $0x90] sm:$0xff]  ;;  %1698 = vst [vmem:[%s2607_s16 + $0x38] sm:$0xff] %v1186_v33  ;;  %v1190_v45 = vmin.f32 %v678_v34, 1.0  ;;  %v1191_v46 = vmin.f32 %v679_v35, 1.0  ;;  %v1192_v47 = vmin.f32 %v680_v36, 1.0 }
  0x48   : > { %v682_v48 = vmax.f32 %v170_v37, 0.0  ;;  %v174_v49 = vld [vmem:[%s2586_s3 + $0x98] sm:$0xff]  ;;  %v175_v50 = vld [vmem:[%s2586_s3 + $0xa0] sm:$0xff]  ;;  %1699 = vst [vmem:[%s2607_s16 + $0x40] sm:$0xff] %v1187_v39  ;;  %1700 = vst [vmem:[%s2607_s16 + $0x48] sm:$0xff] %v1188_v40  ;;  %v1193_v51 = vmin.f32 %v681_v42, 1.0 }
  0x49   : > { %1701 = vst [vmem:[%s2607_s16 + $0x50] sm:$0xff] %v1189_v41  ;;  %v683_v52 = vmax.f32 %v171_v38, 0.0  ;;  %v684_v53 = vmax.f32 %v172_v43, 0.0  ;;  %v685_v54 = vmax.f32 %v173_v44, 0.0  ;;  %v176_v55 = vld [vmem:[%s2586_s3 + $0xa8] sm:$0xff]  ;;  %v177_v56 = vld [vmem:[%s2586_s3 + $0xb0] sm:$0xff] }
  0x4a   : > { %1702 = vst [vmem:[%s2607_s16 + $0x58] sm:$0xff] %v1190_v45  ;;  %1703 = vst [vmem:[%s2607_s16 + $0x60] sm:$0xff] %v1191_v46  ;;  %v1194_v57 = vmin.f32 %v682_v48, 1.0  ;;  %v686_v58 = vmax.f32 %v174_v49, 0.0  ;;  %v687_v59 = vmax.f32 %v175_v50, 0.0  ;;  %v688_v60 = vmax.f32 %v176_v55, 0.0 }
  0x4b   : > { %1704 = vst [vmem:[%s2607_s16 + $0x68] sm:$0xff] %v1192_v47  ;;  %v178_v61 = vld [vmem:[%s2586_s3 + $0xb8] sm:$0xff]  ;;  %v179_v62 = vld [vmem:[%s2586_s3 + $0xc0] sm:$0xff]  ;;  %1705 = vst [vmem:[%s2607_s16 + $0x70] sm:$0xff] %v1193_v51  ;;  %v1195_v63 = vmin.f32 %v683_v52, 1.0  ;;  %v1196_v0 = vmin.f32 %v684_v53, 1.0 }
  0x4c   : > { %v1197_v1 = vmin.f32 %v685_v54, 1.0  ;;  %v689_v2 = vmax.f32 %v177_v56, 0.0  ;;  %v180_v3 = vld [vmem:[%s2586_s3 + $0xc8] sm:$0xff]  ;;  %v181_v4 = vld [vmem:[%s2586_s3 + $0xd0] sm:$0xff]  ;;  %1706 = vst [vmem:[%s2607_s16 + $0x78] sm:$0xff] %v1194_v57  ;;  %v1198_v5 = vmin.f32 %v686_v58, 1.0 }
  0x4d   : > { %v1199_v6 = vmin.f32 %v687_v59, 1.0  ;;  %v1200_v7 = vmin.f32 %v688_v60, 1.0  ;;  %v690_v8 = vmax.f32 %v178_v61, 0.0  ;;  %v182_v9 = vld [vmem:[%s2586_s3 + $0xd8] sm:$0xff]  ;;  %v183_v10 = vld [vmem:[%s2586_s3 + $0xe0] sm:$0xff]  ;;  %1707 = vst [vmem:[%s2607_s16 + $0x80] sm:$0xff] %v1195_v63 }
  0x4e   : > { %1708 = vst [vmem:[%s2607_s16 + $0x88] sm:$0xff] %v1196_v0  ;;  %1709 = vst [vmem:[%s2607_s16 + $0x90] sm:$0xff] %v1197_v1  ;;  %v1201_v11 = vmin.f32 %v689_v2, 1.0  ;;  %v691_v12 = vmax.f32 %v179_v62, 0.0  ;;  %v692_v13 = vmax.f32 %v180_v3, 0.0  ;;  %v693_v14 = vmax.f32 %v181_v4, 0.0 }
  0x4f   : > { %v184_v15 = vld [vmem:[%s2586_s3 + $0xe8] sm:$0xff]  ;;  %v185_v16 = vld [vmem:[%s2586_s3 + $0xf0] sm:$0xff]  ;;  %1710 = vst [vmem:[%s2607_s16 + $0x98] sm:$0xff] %v1198_v5  ;;  %1711 = vst [vmem:[%s2607_s16 + $0xa0] sm:$0xff] %v1199_v6  ;;  %v1202_v17 = vmin.f32 %v690_v8, 1.0  ;;  %v694_v18 = vmax.f32 %v182_v9, 0.0 }
  0x50   : > { %1712 = vst [vmem:[%s2607_s16 + $0xa8] sm:$0xff] %v1200_v7  ;;  %v695_v19 = vmax.f32 %v183_v10, 0.0  ;;  %v696_v20 = vmax.f32 %v184_v15, 0.0  ;;  %v186_v21 = vld [vmem:[%s2586_s3 + $0xf8] sm:$0xff]  ;;  %v187_v22 = vld [vmem:[%s2586_s3 + $0x100] sm:$0xff]  ;;  %1713 = vst [vmem:[%s2607_s16 + $0xb0] sm:$0xff] %v1201_v11 }
  0x51   : > { %v1203_v23 = vmin.f32 %v691_v12, 1.0  ;;  %v1204_v24 = vmin.f32 %v692_v13, 1.0  ;;  %v1205_v25 = vmin.f32 %v693_v14, 1.0  ;;  %v697_v26 = vmax.f32 %v185_v16, 0.0  ;;  %v188_v27 = vld [vmem:[%s2586_s3 + $0x108] sm:$0xff]  ;;  %v189_v28 = vld [vmem:[%s2586_s3 + $0x110] sm:$0xff] }
  0x52   : > { %1714 = vst [vmem:[%s2607_s16 + $0xb8] sm:$0xff] %v1202_v17  ;;  %v1206_v29 = vmin.f32 %v694_v18, 1.0  ;;  %v1207_v30 = vmin.f32 %v695_v19, 1.0  ;;  %v1208_v31 = vmin.f32 %v696_v20, 1.0  ;;  %v698_v32 = vmax.f32 %v186_v21, 0.0  ;;  %v190_v33 = vld [vmem:[%s2586_s3 + $0x118] sm:$0xff] }
  0x53   : > { %v191_v34 = vld [vmem:[%s2586_s3 + $0x120] sm:$0xff]  ;;  %1715 = vst [vmem:[%s2607_s16 + $0xc0] sm:$0xff] %v1203_v23  ;;  %1716 = vst [vmem:[%s2607_s16 + $0xc8] sm:$0xff] %v1204_v24  ;;  %v1209_v35 = vmin.f32 %v697_v26, 1.0  ;;  %v699_v36 = vmax.f32 %v187_v22, 0.0  ;;  %v700_v37 = vmax.f32 %v188_v27, 0.0 }
  0x54   : > { %1717 = vst [vmem:[%s2607_s16 + $0xd0] sm:$0xff] %v1205_v25  ;;  %v701_v38 = vmax.f32 %v189_v28, 0.0  ;;  %v192_v39 = vld [vmem:[%s2586_s3 + $0x128] sm:$0xff]  ;;  %v193_v40 = vld [vmem:[%s2586_s3 + $0x130] sm:$0xff]  ;;  %1718 = vst [vmem:[%s2607_s16 + $0xd8] sm:$0xff] %v1206_v29  ;;  %v1210_v41 = vmin.f32 %v698_v32, 1.0 }
  0x55   : > { %1719 = vst [vmem:[%s2607_s16 + $0xe0] sm:$0xff] %v1207_v30  ;;  %1720 = vst [vmem:[%s2607_s16 + $0xe8] sm:$0xff] %v1208_v31  ;;  %v702_v42 = vmax.f32 %v190_v33, 0.0  ;;  %v703_v43 = vmax.f32 %v191_v34, 0.0  ;;  %v704_v44 = vmax.f32 %v192_v39, 0.0  ;;  %v194_v45 = vld [vmem:[%s2586_s3 + $0x138] sm:$0xff] }
  0x56   : > { %v195_v46 = vld [vmem:[%s2586_s3 + $0x140] sm:$0xff]  ;;  %1721 = vst [vmem:[%s2607_s16 + $0xf0] sm:$0xff] %v1209_v35  ;;  %v1211_v47 = vmin.f32 %v699_v36, 1.0  ;;  %v1212_v48 = vmin.f32 %v700_v37, 1.0  ;;  %v1213_v49 = vmin.f32 %v701_v38, 1.0  ;;  %v705_v50 = vmax.f32 %v193_v40, 0.0 }
  0x57   : > { %v196_v51 = vld [vmem:[%s2586_s3 + $0x148] sm:$0xff]  ;;  %v197_v52 = vld [vmem:[%s2586_s3 + $0x150] sm:$0xff]  ;;  %1722 = vst [vmem:[%s2607_s16 + $0xf8] sm:$0xff] %v1210_v41  ;;  %v1214_v53 = vmin.f32 %v702_v42, 1.0  ;;  %v1215_v54 = vmin.f32 %v703_v43, 1.0  ;;  %v1216_v55 = vmin.f32 %v704_v44, 1.0 }
  0x58   : > { %v706_v56 = vmax.f32 %v194_v45, 0.0  ;;  %v198_v57 = vld [vmem:[%s2586_s3 + $0x158] sm:$0xff]  ;;  %v199_v58 = vld [vmem:[%s2586_s3 + $0x160] sm:$0xff]  ;;  %1723 = vst [vmem:[%s2607_s16 + $0x100] sm:$0xff] %v1211_v47  ;;  %1724 = vst [vmem:[%s2607_s16 + $0x108] sm:$0xff] %v1212_v48  ;;  %v1217_v59 = vmin.f32 %v705_v50, 1.0 }
  0x59   : > { %1725 = vst [vmem:[%s2607_s16 + $0x110] sm:$0xff] %v1213_v49  ;;  %v707_v60 = vmax.f32 %v195_v46, 0.0  ;;  %v708_v61 = vmax.f32 %v196_v51, 0.0  ;;  %v709_v62 = vmax.f32 %v197_v52, 0.0  ;;  %v200_v63 = vld [vmem:[%s2586_s3 + $0x168] sm:$0xff]  ;;  %v201_v0 = vld [vmem:[%s2586_s3 + $0x170] sm:$0xff] }
  0x5a   : > { %1726 = vst [vmem:[%s2607_s16 + $0x118] sm:$0xff] %v1214_v53  ;;  %1727 = vst [vmem:[%s2607_s16 + $0x120] sm:$0xff] %v1215_v54  ;;  %v1218_v1 = vmin.f32 %v706_v56, 1.0  ;;  %v710_v2 = vmax.f32 %v198_v57, 0.0  ;;  %v711_v3 = vmax.f32 %v199_v58, 0.0  ;;  %v712_v4 = vmax.f32 %v200_v63, 0.0 }
  0x5b   : > { %1728 = vst [vmem:[%s2607_s16 + $0x128] sm:$0xff] %v1216_v55  ;;  %v202_v5 = vld [vmem:[%s2586_s3 + $0x178] sm:$0xff]  ;;  %v203_v6 = vld [vmem:[%s2586_s3 + $0x180] sm:$0xff]  ;;  %1729 = vst [vmem:[%s2607_s16 + $0x130] sm:$0xff] %v1217_v59  ;;  %v1219_v7 = vmin.f32 %v707_v60, 1.0  ;;  %v1220_v8 = vmin.f32 %v708_v61, 1.0 }
  0x5c   : > { %v1221_v9 = vmin.f32 %v709_v62, 1.0  ;;  %v713_v10 = vmax.f32 %v201_v0, 0.0  ;;  %v204_v11 = vld [vmem:[%s2586_s3 + $0x188] sm:$0xff]  ;;  %v205_v12 = vld [vmem:[%s2586_s3 + $0x190] sm:$0xff]  ;;  %1730 = vst [vmem:[%s2607_s16 + $0x138] sm:$0xff] %v1218_v1  ;;  %v1222_v13 = vmin.f32 %v710_v2, 1.0 }
  0x5d   : > { %v1223_v14 = vmin.f32 %v711_v3, 1.0  ;;  %v1224_v15 = vmin.f32 %v712_v4, 1.0  ;;  %v714_v16 = vmax.f32 %v202_v5, 0.0  ;;  %v206_v17 = vld [vmem:[%s2586_s3 + $0x198] sm:$0xff]  ;;  %v207_v18 = vld [vmem:[%s2586_s3 + $0x1a0] sm:$0xff]  ;;  %1731 = vst [vmem:[%s2607_s16 + $0x140] sm:$0xff] %v1219_v7 }
  0x5e   : > { %1732 = vst [vmem:[%s2607_s16 + $0x148] sm:$0xff] %v1220_v8  ;;  %1733 = vst [vmem:[%s2607_s16 + $0x150] sm:$0xff] %v1221_v9  ;;  %v1225_v19 = vmin.f32 %v713_v10, 1.0  ;;  %v715_v20 = vmax.f32 %v203_v6, 0.0  ;;  %v716_v21 = vmax.f32 %v204_v11, 0.0  ;;  %v717_v22 = vmax.f32 %v205_v12, 0.0 }
  0x5f   : > { %v208_v23 = vld [vmem:[%s2586_s3 + $0x1a8] sm:$0xff]  ;;  %v209_v24 = vld [vmem:[%s2586_s3 + $0x1b0] sm:$0xff]  ;;  %1734 = vst [vmem:[%s2607_s16 + $0x158] sm:$0xff] %v1222_v13  ;;  %1735 = vst [vmem:[%s2607_s16 + $0x160] sm:$0xff] %v1223_v14  ;;  %v1226_v25 = vmin.f32 %v714_v16, 1.0  ;;  %v718_v26 = vmax.f32 %v206_v17, 0.0 }
  0x60   : > { %1736 = vst [vmem:[%s2607_s16 + $0x168] sm:$0xff] %v1224_v15  ;;  %v719_v27 = vmax.f32 %v207_v18, 0.0  ;;  %v720_v28 = vmax.f32 %v208_v23, 0.0  ;;  %v210_v29 = vld [vmem:[%s2586_s3 + $0x1b8] sm:$0xff]  ;;  %v211_v30 = vld [vmem:[%s2586_s3 + $0x1c0] sm:$0xff]  ;;  %1737 = vst [vmem:[%s2607_s16 + $0x170] sm:$0xff] %v1225_v19 }
  0x61   : > { %v1227_v31 = vmin.f32 %v715_v20, 1.0  ;;  %v1228_v32 = vmin.f32 %v716_v21, 1.0  ;;  %v1229_v33 = vmin.f32 %v717_v22, 1.0  ;;  %v721_v34 = vmax.f32 %v209_v24, 0.0  ;;  %v212_v35 = vld [vmem:[%s2586_s3 + $0x1c8] sm:$0xff]  ;;  %v213_v36 = vld [vmem:[%s2586_s3 + $0x1d0] sm:$0xff] }
  0x62   : > { %1738 = vst [vmem:[%s2607_s16 + $0x178] sm:$0xff] %v1226_v25  ;;  %v1230_v37 = vmin.f32 %v718_v26, 1.0  ;;  %v1231_v38 = vmin.f32 %v719_v27, 1.0  ;;  %v1232_v39 = vmin.f32 %v720_v28, 1.0  ;;  %v722_v40 = vmax.f32 %v210_v29, 0.0  ;;  %v214_v41 = vld [vmem:[%s2586_s3 + $0x1d8] sm:$0xff] }
  0x63   : > { %v215_v42 = vld [vmem:[%s2586_s3 + $0x1e0] sm:$0xff]  ;;  %1739 = vst [vmem:[%s2607_s16 + $0x180] sm:$0xff] %v1227_v31  ;;  %1740 = vst [vmem:[%s2607_s16 + $0x188] sm:$0xff] %v1228_v32  ;;  %v1233_v43 = vmin.f32 %v721_v34, 1.0  ;;  %v723_v44 = vmax.f32 %v211_v30, 0.0  ;;  %v724_v45 = vmax.f32 %v212_v35, 0.0 }
  0x64   : > { %1741 = vst [vmem:[%s2607_s16 + $0x190] sm:$0xff] %v1229_v33  ;;  %v725_v46 = vmax.f32 %v213_v36, 0.0  ;;  %v216_v47 = vld [vmem:[%s2586_s3 + $0x1e8] sm:$0xff]  ;;  %v217_v48 = vld [vmem:[%s2586_s3 + $0x1f0] sm:$0xff]  ;;  %1742 = vst [vmem:[%s2607_s16 + $0x198] sm:$0xff] %v1230_v37  ;;  %v1234_v49 = vmin.f32 %v722_v40, 1.0 }
  0x65   : > { %1743 = vst [vmem:[%s2607_s16 + $0x1a0] sm:$0xff] %v1231_v38  ;;  %1744 = vst [vmem:[%s2607_s16 + $0x1a8] sm:$0xff] %v1232_v39  ;;  %v726_v50 = vmax.f32 %v214_v41, 0.0  ;;  %v727_v51 = vmax.f32 %v215_v42, 0.0  ;;  %v728_v52 = vmax.f32 %v216_v47, 0.0  ;;  %v218_v53 = vld [vmem:[%s2586_s3 + $0x1f8] sm:$0xff] }
  0x66   : > { %v219_v54 = vld [vmem:[%s2586_s3 + $0x200] sm:$0xff]  ;;  %1745 = vst [vmem:[%s2607_s16 + $0x1b0] sm:$0xff] %v1233_v43  ;;  %v1235_v55 = vmin.f32 %v723_v44, 1.0  ;;  %v1236_v56 = vmin.f32 %v724_v45, 1.0  ;;  %v1237_v57 = vmin.f32 %v725_v46, 1.0  ;;  %v729_v58 = vmax.f32 %v217_v48, 0.0 }
  0x67   : > { %v220_v59 = vld [vmem:[%s2586_s3 + $0x208] sm:$0xff]  ;;  %v221_v60 = vld [vmem:[%s2586_s3 + $0x210] sm:$0xff]  ;;  %1746 = vst [vmem:[%s2607_s16 + $0x1b8] sm:$0xff] %v1234_v49  ;;  %v1238_v61 = vmin.f32 %v726_v50, 1.0  ;;  %v1239_v62 = vmin.f32 %v727_v51, 1.0  ;;  %v1240_v63 = vmin.f32 %v728_v52, 1.0 }
  0x68   : > { %v730_v0 = vmax.f32 %v218_v53, 0.0  ;;  %v222_v1 = vld [vmem:[%s2586_s3 + $0x218] sm:$0xff]  ;;  %v223_v2 = vld [vmem:[%s2586_s3 + $0x220] sm:$0xff]  ;;  %1747 = vst [vmem:[%s2607_s16 + $0x1c0] sm:$0xff] %v1235_v55  ;;  %1748 = vst [vmem:[%s2607_s16 + $0x1c8] sm:$0xff] %v1236_v56  ;;  %v1241_v3 = vmin.f32 %v729_v58, 1.0 }
  0x69   : > { %1749 = vst [vmem:[%s2607_s16 + $0x1d0] sm:$0xff] %v1237_v57  ;;  %v731_v4 = vmax.f32 %v219_v54, 0.0  ;;  %v732_v5 = vmax.f32 %v220_v59, 0.0  ;;  %v733_v6 = vmax.f32 %v221_v60, 0.0  ;;  %v224_v7 = vld [vmem:[%s2586_s3 + $0x228] sm:$0xff]  ;;  %v225_v8 = vld [vmem:[%s2586_s3 + $0x230] sm:$0xff] }
  0x6a   : > { %1750 = vst [vmem:[%s2607_s16 + $0x1d8] sm:$0xff] %v1238_v61  ;;  %1751 = vst [vmem:[%s2607_s16 + $0x1e0] sm:$0xff] %v1239_v62  ;;  %v1242_v9 = vmin.f32 %v730_v0, 1.0  ;;  %v734_v10 = vmax.f32 %v222_v1, 0.0  ;;  %v735_v11 = vmax.f32 %v223_v2, 0.0  ;;  %v736_v12 = vmax.f32 %v224_v7, 0.0 }
  0x6b   : > { %1752 = vst [vmem:[%s2607_s16 + $0x1e8] sm:$0xff] %v1240_v63  ;;  %v226_v13 = vld [vmem:[%s2586_s3 + $0x238] sm:$0xff]  ;;  %v227_v14 = vld [vmem:[%s2586_s3 + $0x240] sm:$0xff]  ;;  %1753 = vst [vmem:[%s2607_s16 + $0x1f0] sm:$0xff] %v1241_v3  ;;  %v1243_v15 = vmin.f32 %v731_v4, 1.0  ;;  %v1244_v16 = vmin.f32 %v732_v5, 1.0 }
  0x6c   : > { %v1245_v17 = vmin.f32 %v733_v6, 1.0  ;;  %v737_v18 = vmax.f32 %v225_v8, 0.0  ;;  %v228_v19 = vld [vmem:[%s2586_s3 + $0x248] sm:$0xff]  ;;  %v229_v20 = vld [vmem:[%s2586_s3 + $0x250] sm:$0xff]  ;;  %1754 = vst [vmem:[%s2607_s16 + $0x1f8] sm:$0xff] %v1242_v9  ;;  %v1246_v21 = vmin.f32 %v734_v10, 1.0 }
  0x6d   : > { %v1247_v22 = vmin.f32 %v735_v11, 1.0  ;;  %v1248_v23 = vmin.f32 %v736_v12, 1.0  ;;  %v738_v24 = vmax.f32 %v226_v13, 0.0  ;;  %v230_v25 = vld [vmem:[%s2586_s3 + $0x258] sm:$0xff]  ;;  %v231_v26 = vld [vmem:[%s2586_s3 + $0x260] sm:$0xff]  ;;  %1755 = vst [vmem:[%s2607_s16 + $0x200] sm:$0xff] %v1243_v15 }
  0x6e   : > { %1756 = vst [vmem:[%s2607_s16 + $0x208] sm:$0xff] %v1244_v16  ;;  %1757 = vst [vmem:[%s2607_s16 + $0x210] sm:$0xff] %v1245_v17  ;;  %v1249_v27 = vmin.f32 %v737_v18, 1.0  ;;  %v739_v28 = vmax.f32 %v227_v14, 0.0  ;;  %v740_v29 = vmax.f32 %v228_v19, 0.0  ;;  %v741_v30 = vmax.f32 %v229_v20, 0.0 }
  0x6f   : > { %v232_v31 = vld [vmem:[%s2586_s3 + $0x268] sm:$0xff]  ;;  %v233_v32 = vld [vmem:[%s2586_s3 + $0x270] sm:$0xff]  ;;  %1758 = vst [vmem:[%s2607_s16 + $0x218] sm:$0xff] %v1246_v21  ;;  %1759 = vst [vmem:[%s2607_s16 + $0x220] sm:$0xff] %v1247_v22  ;;  %v1250_v33 = vmin.f32 %v738_v24, 1.0  ;;  %v742_v34 = vmax.f32 %v230_v25, 0.0 }
  0x70   : > { %1760 = vst [vmem:[%s2607_s16 + $0x228] sm:$0xff] %v1248_v23  ;;  %v743_v35 = vmax.f32 %v231_v26, 0.0  ;;  %v744_v36 = vmax.f32 %v232_v31, 0.0  ;;  %v234_v37 = vld [vmem:[%s2586_s3 + $0x278] sm:$0xff]  ;;  %v235_v38 = vld [vmem:[%s2586_s3 + $0x280] sm:$0xff]  ;;  %1761 = vst [vmem:[%s2607_s16 + $0x230] sm:$0xff] %v1249_v27 }
  0x71   : > { %v1251_v39 = vmin.f32 %v739_v28, 1.0  ;;  %v1252_v40 = vmin.f32 %v740_v29, 1.0  ;;  %v1253_v41 = vmin.f32 %v741_v30, 1.0  ;;  %v745_v42 = vmax.f32 %v233_v32, 0.0  ;;  %v236_v43 = vld [vmem:[%s2586_s3 + $0x288] sm:$0xff]  ;;  %v237_v44 = vld [vmem:[%s2586_s3 + $0x290] sm:$0xff] }
  0x72   : > { %1762 = vst [vmem:[%s2607_s16 + $0x238] sm:$0xff] %v1250_v33  ;;  %v1254_v45 = vmin.f32 %v742_v34, 1.0  ;;  %v1255_v46 = vmin.f32 %v743_v35, 1.0  ;;  %v1256_v47 = vmin.f32 %v744_v36, 1.0  ;;  %v746_v48 = vmax.f32 %v234_v37, 0.0  ;;  %v238_v49 = vld [vmem:[%s2586_s3 + $0x298] sm:$0xff] }
  0x73   : > { %v239_v50 = vld [vmem:[%s2586_s3 + $0x2a0] sm:$0xff]  ;;  %1763 = vst [vmem:[%s2607_s16 + $0x240] sm:$0xff] %v1251_v39  ;;  %1764 = vst [vmem:[%s2607_s16 + $0x248] sm:$0xff] %v1252_v40  ;;  %v1257_v51 = vmin.f32 %v745_v42, 1.0  ;;  %v747_v52 = vmax.f32 %v235_v38, 0.0  ;;  %v748_v53 = vmax.f32 %v236_v43, 0.0 }
  0x74   : > { %1765 = vst [vmem:[%s2607_s16 + $0x250] sm:$0xff] %v1253_v41  ;;  %v749_v54 = vmax.f32 %v237_v44, 0.0  ;;  %v240_v55 = vld [vmem:[%s2586_s3 + $0x2a8] sm:$0xff]  ;;  %v241_v56 = vld [vmem:[%s2586_s3 + $0x2b0] sm:$0xff]  ;;  %1766 = vst [vmem:[%s2607_s16 + $0x258] sm:$0xff] %v1254_v45  ;;  %v1258_v57 = vmin.f32 %v746_v48, 1.0 }
  0x75   : > { %1767 = vst [vmem:[%s2607_s16 + $0x260] sm:$0xff] %v1255_v46  ;;  %1768 = vst [vmem:[%s2607_s16 + $0x268] sm:$0xff] %v1256_v47  ;;  %v750_v58 = vmax.f32 %v238_v49, 0.0  ;;  %v751_v59 = vmax.f32 %v239_v50, 0.0  ;;  %v752_v60 = vmax.f32 %v240_v55, 0.0  ;;  %v242_v61 = vld [vmem:[%s2586_s3 + $0x2b8] sm:$0xff] }
  0x76   : > { %v243_v62 = vld [vmem:[%s2586_s3 + $0x2c0] sm:$0xff]  ;;  %1769 = vst [vmem:[%s2607_s16 + $0x270] sm:$0xff] %v1257_v51  ;;  %v1259_v63 = vmin.f32 %v747_v52, 1.0  ;;  %v1260_v0 = vmin.f32 %v748_v53, 1.0  ;;  %v1261_v1 = vmin.f32 %v749_v54, 1.0  ;;  %v753_v2 = vmax.f32 %v241_v56, 0.0 }
  0x77   : > { %v244_v3 = vld [vmem:[%s2586_s3 + $0x2c8] sm:$0xff]  ;;  %v245_v4 = vld [vmem:[%s2586_s3 + $0x2d0] sm:$0xff]  ;;  %1770 = vst [vmem:[%s2607_s16 + $0x278] sm:$0xff] %v1258_v57  ;;  %v1262_v5 = vmin.f32 %v750_v58, 1.0  ;;  %v1263_v6 = vmin.f32 %v751_v59, 1.0  ;;  %v1264_v7 = vmin.f32 %v752_v60, 1.0 }
  0x78   : > { %v754_v8 = vmax.f32 %v242_v61, 0.0  ;;  %v246_v9 = vld [vmem:[%s2586_s3 + $0x2d8] sm:$0xff]  ;;  %v247_v10 = vld [vmem:[%s2586_s3 + $0x2e0] sm:$0xff]  ;;  %1771 = vst [vmem:[%s2607_s16 + $0x280] sm:$0xff] %v1259_v63  ;;  %1772 = vst [vmem:[%s2607_s16 + $0x288] sm:$0xff] %v1260_v0  ;;  %v1265_v11 = vmin.f32 %v753_v2, 1.0 }
  0x79   : > { %1773 = vst [vmem:[%s2607_s16 + $0x290] sm:$0xff] %v1261_v1  ;;  %v755_v12 = vmax.f32 %v243_v62, 0.0  ;;  %v756_v13 = vmax.f32 %v244_v3, 0.0  ;;  %v757_v14 = vmax.f32 %v245_v4, 0.0  ;;  %v248_v15 = vld [vmem:[%s2586_s3 + $0x2e8] sm:$0xff]  ;;  %v249_v16 = vld [vmem:[%s2586_s3 + $0x2f0] sm:$0xff] }
  0x7a   : > { %1774 = vst [vmem:[%s2607_s16 + $0x298] sm:$0xff] %v1262_v5  ;;  %1775 = vst [vmem:[%s2607_s16 + $0x2a0] sm:$0xff] %v1263_v6  ;;  %v1266_v17 = vmin.f32 %v754_v8, 1.0  ;;  %v758_v18 = vmax.f32 %v246_v9, 0.0  ;;  %v759_v19 = vmax.f32 %v247_v10, 0.0  ;;  %v760_v20 = vmax.f32 %v248_v15, 0.0 }
  0x7b   : > { %1776 = vst [vmem:[%s2607_s16 + $0x2a8] sm:$0xff] %v1264_v7  ;;  %v250_v21 = vld [vmem:[%s2586_s3 + $0x2f8] sm:$0xff]  ;;  %v251_v22 = vld [vmem:[%s2586_s3 + $0x300] sm:$0xff]  ;;  %1777 = vst [vmem:[%s2607_s16 + $0x2b0] sm:$0xff] %v1265_v11  ;;  %v1267_v23 = vmin.f32 %v755_v12, 1.0  ;;  %v1268_v24 = vmin.f32 %v756_v13, 1.0 }
  0x7c   : > { %v1269_v25 = vmin.f32 %v757_v14, 1.0  ;;  %v761_v26 = vmax.f32 %v249_v16, 0.0  ;;  %v252_v27 = vld [vmem:[%s2586_s3 + $0x308] sm:$0xff]  ;;  %v253_v28 = vld [vmem:[%s2586_s3 + $0x310] sm:$0xff]  ;;  %1778 = vst [vmem:[%s2607_s16 + $0x2b8] sm:$0xff] %v1266_v17  ;;  %v1270_v29 = vmin.f32 %v758_v18, 1.0 }
  0x7d   : > { %v1271_v30 = vmin.f32 %v759_v19, 1.0  ;;  %v1272_v31 = vmin.f32 %v760_v20, 1.0  ;;  %v762_v32 = vmax.f32 %v250_v21, 0.0  ;;  %v254_v33 = vld [vmem:[%s2586_s3 + $0x318] sm:$0xff]  ;;  %v255_v34 = vld [vmem:[%s2586_s3 + $0x320] sm:$0xff]  ;;  %1779 = vst [vmem:[%s2607_s16 + $0x2c0] sm:$0xff] %v1267_v23 }
  0x7e   : > { %1780 = vst [vmem:[%s2607_s16 + $0x2c8] sm:$0xff] %v1268_v24  ;;  %1781 = vst [vmem:[%s2607_s16 + $0x2d0] sm:$0xff] %v1269_v25  ;;  %v1273_v35 = vmin.f32 %v761_v26, 1.0  ;;  %v763_v36 = vmax.f32 %v251_v22, 0.0  ;;  %v764_v37 = vmax.f32 %v252_v27, 0.0  ;;  %v765_v38 = vmax.f32 %v253_v28, 0.0 }
  0x7f   : > { %v256_v39 = vld [vmem:[%s2586_s3 + $0x328] sm:$0xff]  ;;  %v257_v40 = vld [vmem:[%s2586_s3 + $0x330] sm:$0xff]  ;;  %1782 = vst [vmem:[%s2607_s16 + $0x2d8] sm:$0xff] %v1270_v29  ;;  %1783 = vst [vmem:[%s2607_s16 + $0x2e0] sm:$0xff] %v1271_v30  ;;  %v1274_v41 = vmin.f32 %v762_v32, 1.0  ;;  %v766_v42 = vmax.f32 %v254_v33, 0.0 }
  0x80   : > { %1784 = vst [vmem:[%s2607_s16 + $0x2e8] sm:$0xff] %v1272_v31  ;;  %v767_v43 = vmax.f32 %v255_v34, 0.0  ;;  %v768_v44 = vmax.f32 %v256_v39, 0.0  ;;  %v258_v45 = vld [vmem:[%s2586_s3 + $0x338] sm:$0xff]  ;;  %v259_v46 = vld [vmem:[%s2586_s3 + $0x340] sm:$0xff]  ;;  %1785 = vst [vmem:[%s2607_s16 + $0x2f0] sm:$0xff] %v1273_v35 }
  0x81   : > { %v1275_v47 = vmin.f32 %v763_v36, 1.0  ;;  %v1276_v48 = vmin.f32 %v764_v37, 1.0  ;;  %v1277_v49 = vmin.f32 %v765_v38, 1.0  ;;  %v769_v50 = vmax.f32 %v257_v40, 0.0  ;;  %v260_v51 = vld [vmem:[%s2586_s3 + $0x348] sm:$0xff]  ;;  %v261_v52 = vld [vmem:[%s2586_s3 + $0x350] sm:$0xff] }
  0x82   : > { %1786 = vst [vmem:[%s2607_s16 + $0x2f8] sm:$0xff] %v1274_v41  ;;  %v1278_v53 = vmin.f32 %v766_v42, 1.0  ;;  %v1279_v54 = vmin.f32 %v767_v43, 1.0  ;;  %v1280_v55 = vmin.f32 %v768_v44, 1.0  ;;  %v770_v56 = vmax.f32 %v258_v45, 0.0  ;;  %v262_v57 = vld [vmem:[%s2586_s3 + $0x358] sm:$0xff] }
  0x83   : > { %v263_v58 = vld [vmem:[%s2586_s3 + $0x360] sm:$0xff]  ;;  %1787 = vst [vmem:[%s2607_s16 + $0x300] sm:$0xff] %v1275_v47  ;;  %1788 = vst [vmem:[%s2607_s16 + $0x308] sm:$0xff] %v1276_v48  ;;  %v1281_v59 = vmin.f32 %v769_v50, 1.0  ;;  %v771_v60 = vmax.f32 %v259_v46, 0.0  ;;  %v772_v61 = vmax.f32 %v260_v51, 0.0 }
  0x84   : > { %1789 = vst [vmem:[%s2607_s16 + $0x310] sm:$0xff] %v1277_v49  ;;  %v773_v62 = vmax.f32 %v261_v52, 0.0  ;;  %v264_v63 = vld [vmem:[%s2586_s3 + $0x368] sm:$0xff]  ;;  %v265_v0 = vld [vmem:[%s2586_s3 + $0x370] sm:$0xff]  ;;  %1790 = vst [vmem:[%s2607_s16 + $0x318] sm:$0xff] %v1278_v53  ;;  %v1282_v1 = vmin.f32 %v770_v56, 1.0 }
  0x85   : > { %1791 = vst [vmem:[%s2607_s16 + $0x320] sm:$0xff] %v1279_v54  ;;  %1792 = vst [vmem:[%s2607_s16 + $0x328] sm:$0xff] %v1280_v55  ;;  %v774_v2 = vmax.f32 %v262_v57, 0.0  ;;  %v775_v3 = vmax.f32 %v263_v58, 0.0  ;;  %v776_v4 = vmax.f32 %v264_v63, 0.0  ;;  %v266_v5 = vld [vmem:[%s2586_s3 + $0x378] sm:$0xff] }
  0x86   : > { %v267_v6 = vld [vmem:[%s2586_s3 + $0x380] sm:$0xff]  ;;  %1793 = vst [vmem:[%s2607_s16 + $0x330] sm:$0xff] %v1281_v59  ;;  %v1283_v7 = vmin.f32 %v771_v60, 1.0  ;;  %v1284_v8 = vmin.f32 %v772_v61, 1.0  ;;  %v1285_v9 = vmin.f32 %v773_v62, 1.0  ;;  %v777_v10 = vmax.f32 %v265_v0, 0.0 }
  0x87   : > { %v268_v11 = vld [vmem:[%s2586_s3 + $0x388] sm:$0xff]  ;;  %v269_v12 = vld [vmem:[%s2586_s3 + $0x390] sm:$0xff]  ;;  %1794 = vst [vmem:[%s2607_s16 + $0x338] sm:$0xff] %v1282_v1  ;;  %v1286_v13 = vmin.f32 %v774_v2, 1.0  ;;  %v1287_v14 = vmin.f32 %v775_v3, 1.0  ;;  %v1288_v15 = vmin.f32 %v776_v4, 1.0 }
  0x88   : > { %v778_v16 = vmax.f32 %v266_v5, 0.0  ;;  %v270_v17 = vld [vmem:[%s2586_s3 + $0x398] sm:$0xff]  ;;  %v271_v18 = vld [vmem:[%s2586_s3 + $0x3a0] sm:$0xff]  ;;  %1795 = vst [vmem:[%s2607_s16 + $0x340] sm:$0xff] %v1283_v7  ;;  %1796 = vst [vmem:[%s2607_s16 + $0x348] sm:$0xff] %v1284_v8  ;;  %v1289_v19 = vmin.f32 %v777_v10, 1.0 }
  0x89   : > { %1797 = vst [vmem:[%s2607_s16 + $0x350] sm:$0xff] %v1285_v9  ;;  %v779_v20 = vmax.f32 %v267_v6, 0.0  ;;  %v780_v21 = vmax.f32 %v268_v11, 0.0  ;;  %v781_v22 = vmax.f32 %v269_v12, 0.0  ;;  %v272_v23 = vld [vmem:[%s2586_s3 + $0x3a8] sm:$0xff]  ;;  %v273_v24 = vld [vmem:[%s2586_s3 + $0x3b0] sm:$0xff] }
  0x8a   : > { %1798 = vst [vmem:[%s2607_s16 + $0x358] sm:$0xff] %v1286_v13  ;;  %1799 = vst [vmem:[%s2607_s16 + $0x360] sm:$0xff] %v1287_v14  ;;  %v1290_v25 = vmin.f32 %v778_v16, 1.0  ;;  %v782_v26 = vmax.f32 %v270_v17, 0.0  ;;  %v783_v27 = vmax.f32 %v271_v18, 0.0  ;;  %v784_v28 = vmax.f32 %v272_v23, 0.0 }
  0x8b   : > { %1800 = vst [vmem:[%s2607_s16 + $0x368] sm:$0xff] %v1288_v15  ;;  %v274_v29 = vld [vmem:[%s2586_s3 + $0x3b8] sm:$0xff]  ;;  %v275_v30 = vld [vmem:[%s2586_s3 + $0x3c0] sm:$0xff]  ;;  %1801 = vst [vmem:[%s2607_s16 + $0x370] sm:$0xff] %v1289_v19  ;;  %v1291_v31 = vmin.f32 %v779_v20, 1.0  ;;  %v1292_v32 = vmin.f32 %v780_v21, 1.0 }
  0x8c   : > { %v1293_v33 = vmin.f32 %v781_v22, 1.0  ;;  %v785_v34 = vmax.f32 %v273_v24, 0.0  ;;  %v276_v35 = vld [vmem:[%s2586_s3 + $0x3c8] sm:$0xff]  ;;  %v277_v36 = vld [vmem:[%s2586_s3 + $0x3d0] sm:$0xff]  ;;  %1802 = vst [vmem:[%s2607_s16 + $0x378] sm:$0xff] %v1290_v25  ;;  %v1294_v37 = vmin.f32 %v782_v26, 1.0 }
  0x8d   : > { %v1295_v38 = vmin.f32 %v783_v27, 1.0  ;;  %v1296_v39 = vmin.f32 %v784_v28, 1.0  ;;  %v786_v40 = vmax.f32 %v274_v29, 0.0  ;;  %v278_v41 = vld [vmem:[%s2586_s3 + $0x3d8] sm:$0xff]  ;;  %v279_v42 = vld [vmem:[%s2586_s3 + $0x3e0] sm:$0xff]  ;;  %1803 = vst [vmem:[%s2607_s16 + $0x380] sm:$0xff] %v1291_v31 }
  0x8e   : > { %1804 = vst [vmem:[%s2607_s16 + $0x388] sm:$0xff] %v1292_v32  ;;  %1805 = vst [vmem:[%s2607_s16 + $0x390] sm:$0xff] %v1293_v33  ;;  %v1297_v43 = vmin.f32 %v785_v34, 1.0  ;;  %v787_v44 = vmax.f32 %v275_v30, 0.0  ;;  %v788_v45 = vmax.f32 %v276_v35, 0.0  ;;  %v789_v46 = vmax.f32 %v277_v36, 0.0 }
  0x8f   : > { %v280_v47 = vld [vmem:[%s2586_s3 + $0x3e8] sm:$0xff]  ;;  %v281_v48 = vld [vmem:[%s2586_s3 + $0x3f0] sm:$0xff]  ;;  %1806 = vst [vmem:[%s2607_s16 + $0x398] sm:$0xff] %v1294_v37  ;;  %1807 = vst [vmem:[%s2607_s16 + $0x3a0] sm:$0xff] %v1295_v38  ;;  %v1298_v49 = vmin.f32 %v786_v40, 1.0  ;;  %v790_v50 = vmax.f32 %v278_v41, 0.0 }
  0x90   : > { %1808 = vst [vmem:[%s2607_s16 + $0x3a8] sm:$0xff] %v1296_v39  ;;  %v791_v51 = vmax.f32 %v279_v42, 0.0  ;;  %v792_v52 = vmax.f32 %v280_v47, 0.0  ;;  %v282_v53 = vld [vmem:[%s2586_s3 + $0x3f8] sm:$0xff]  ;;  %v283_v54 = vld [vmem:[%s2586_s3 + $0x400] sm:$0xff]  ;;  %1809 = vst [vmem:[%s2607_s16 + $0x3b0] sm:$0xff] %v1297_v43 }
  0x91   : > { %v1299_v55 = vmin.f32 %v787_v44, 1.0  ;;  %v1300_v56 = vmin.f32 %v788_v45, 1.0  ;;  %v1301_v57 = vmin.f32 %v789_v46, 1.0  ;;  %v793_v58 = vmax.f32 %v281_v48, 0.0  ;;  %v284_v59 = vld [vmem:[%s2586_s3 + $0x408] sm:$0xff]  ;;  %v285_v60 = vld [vmem:[%s2586_s3 + $0x410] sm:$0xff] }
  0x92   : > { %1810 = vst [vmem:[%s2607_s16 + $0x3b8] sm:$0xff] %v1298_v49  ;;  %v1302_v61 = vmin.f32 %v790_v50, 1.0  ;;  %v1303_v62 = vmin.f32 %v791_v51, 1.0  ;;  %v1304_v63 = vmin.f32 %v792_v52, 1.0  ;;  %v794_v0 = vmax.f32 %v282_v53, 0.0  ;;  %v286_v1 = vld [vmem:[%s2586_s3 + $0x418] sm:$0xff] }
  0x93   : > { %v287_v2 = vld [vmem:[%s2586_s3 + $0x420] sm:$0xff]  ;;  %1811 = vst [vmem:[%s2607_s16 + $0x3c0] sm:$0xff] %v1299_v55  ;;  %1812 = vst [vmem:[%s2607_s16 + $0x3c8] sm:$0xff] %v1300_v56  ;;  %v1305_v3 = vmin.f32 %v793_v58, 1.0  ;;  %v795_v4 = vmax.f32 %v283_v54, 0.0  ;;  %v796_v5 = vmax.f32 %v284_v59, 0.0 }
  0x94   : > { %1813 = vst [vmem:[%s2607_s16 + $0x3d0] sm:$0xff] %v1301_v57  ;;  %v797_v6 = vmax.f32 %v285_v60, 0.0  ;;  %v288_v7 = vld [vmem:[%s2586_s3 + $0x428] sm:$0xff]  ;;  %v289_v8 = vld [vmem:[%s2586_s3 + $0x430] sm:$0xff]  ;;  %1814 = vst [vmem:[%s2607_s16 + $0x3d8] sm:$0xff] %v1302_v61  ;;  %v1306_v9 = vmin.f32 %v794_v0, 1.0 }
  0x95   : > { %1815 = vst [vmem:[%s2607_s16 + $0x3e0] sm:$0xff] %v1303_v62  ;;  %1816 = vst [vmem:[%s2607_s16 + $0x3e8] sm:$0xff] %v1304_v63  ;;  %v798_v10 = vmax.f32 %v286_v1, 0.0  ;;  %v799_v11 = vmax.f32 %v287_v2, 0.0  ;;  %v800_v12 = vmax.f32 %v288_v7, 0.0  ;;  %v290_v13 = vld [vmem:[%s2586_s3 + $0x438] sm:$0xff] }
  0x96   : > { %v291_v14 = vld [vmem:[%s2586_s3 + $0x440] sm:$0xff]  ;;  %1817 = vst [vmem:[%s2607_s16 + $0x3f0] sm:$0xff] %v1305_v3  ;;  %v1307_v15 = vmin.f32 %v795_v4, 1.0  ;;  %v1308_v16 = vmin.f32 %v796_v5, 1.0  ;;  %v1309_v17 = vmin.f32 %v797_v6, 1.0  ;;  %v801_v18 = vmax.f32 %v289_v8, 0.0 }
  0x97   : > { %v292_v19 = vld [vmem:[%s2586_s3 + $0x448] sm:$0xff]  ;;  %v293_v20 = vld [vmem:[%s2586_s3 + $0x450] sm:$0xff]  ;;  %1818 = vst [vmem:[%s2607_s16 + $0x3f8] sm:$0xff] %v1306_v9  ;;  %v1310_v21 = vmin.f32 %v798_v10, 1.0  ;;  %v1311_v22 = vmin.f32 %v799_v11, 1.0  ;;  %v1312_v23 = vmin.f32 %v800_v12, 1.0 }
  0x98   : > { %v802_v24 = vmax.f32 %v290_v13, 0.0  ;;  %v294_v25 = vld [vmem:[%s2586_s3 + $0x458] sm:$0xff]  ;;  %v295_v26 = vld [vmem:[%s2586_s3 + $0x460] sm:$0xff]  ;;  %1819 = vst [vmem:[%s2607_s16 + $0x400] sm:$0xff] %v1307_v15  ;;  %1820 = vst [vmem:[%s2607_s16 + $0x408] sm:$0xff] %v1308_v16  ;;  %v1313_v27 = vmin.f32 %v801_v18, 1.0 }
  0x99   : > { %1821 = vst [vmem:[%s2607_s16 + $0x410] sm:$0xff] %v1309_v17  ;;  %v803_v28 = vmax.f32 %v291_v14, 0.0  ;;  %v804_v29 = vmax.f32 %v292_v19, 0.0  ;;  %v805_v30 = vmax.f32 %v293_v20, 0.0  ;;  %v296_v31 = vld [vmem:[%s2586_s3 + $0x468] sm:$0xff]  ;;  %v297_v32 = vld [vmem:[%s2586_s3 + $0x470] sm:$0xff] }
  0x9a   : > { %1822 = vst [vmem:[%s2607_s16 + $0x418] sm:$0xff] %v1310_v21  ;;  %1823 = vst [vmem:[%s2607_s16 + $0x420] sm:$0xff] %v1311_v22  ;;  %v1314_v33 = vmin.f32 %v802_v24, 1.0  ;;  %v806_v34 = vmax.f32 %v294_v25, 0.0  ;;  %v807_v35 = vmax.f32 %v295_v26, 0.0  ;;  %v808_v36 = vmax.f32 %v296_v31, 0.0 }
  0x9b   : > { %1824 = vst [vmem:[%s2607_s16 + $0x428] sm:$0xff] %v1312_v23  ;;  %v298_v37 = vld [vmem:[%s2586_s3 + $0x478] sm:$0xff]  ;;  %v299_v38 = vld [vmem:[%s2586_s3 + $0x480] sm:$0xff]  ;;  %1825 = vst [vmem:[%s2607_s16 + $0x430] sm:$0xff] %v1313_v27  ;;  %v1315_v39 = vmin.f32 %v803_v28, 1.0  ;;  %v1316_v40 = vmin.f32 %v804_v29, 1.0 }
  0x9c   : > { %v1317_v41 = vmin.f32 %v805_v30, 1.0  ;;  %v809_v42 = vmax.f32 %v297_v32, 0.0  ;;  %v300_v43 = vld [vmem:[%s2586_s3 + $0x488] sm:$0xff]  ;;  %v301_v44 = vld [vmem:[%s2586_s3 + $0x490] sm:$0xff]  ;;  %1826 = vst [vmem:[%s2607_s16 + $0x438] sm:$0xff] %v1314_v33  ;;  %v1318_v45 = vmin.f32 %v806_v34, 1.0 }
  0x9d   : > { %v1319_v46 = vmin.f32 %v807_v35, 1.0  ;;  %v1320_v47 = vmin.f32 %v808_v36, 1.0  ;;  %v810_v48 = vmax.f32 %v298_v37, 0.0  ;;  %v302_v49 = vld [vmem:[%s2586_s3 + $0x498] sm:$0xff]  ;;  %v303_v50 = vld [vmem:[%s2586_s3 + $0x4a0] sm:$0xff]  ;;  %1827 = vst [vmem:[%s2607_s16 + $0x440] sm:$0xff] %v1315_v39 }
  0x9e   : > { %1828 = vst [vmem:[%s2607_s16 + $0x448] sm:$0xff] %v1316_v40  ;;  %1829 = vst [vmem:[%s2607_s16 + $0x450] sm:$0xff] %v1317_v41  ;;  %v1321_v51 = vmin.f32 %v809_v42, 1.0  ;;  %v811_v52 = vmax.f32 %v299_v38, 0.0  ;;  %v812_v53 = vmax.f32 %v300_v43, 0.0  ;;  %v813_v54 = vmax.f32 %v301_v44, 0.0 }
  0x9f   : > { %v304_v55 = vld [vmem:[%s2586_s3 + $0x4a8] sm:$0xff]  ;;  %v305_v56 = vld [vmem:[%s2586_s3 + $0x4b0] sm:$0xff]  ;;  %1830 = vst [vmem:[%s2607_s16 + $0x458] sm:$0xff] %v1318_v45  ;;  %1831 = vst [vmem:[%s2607_s16 + $0x460] sm:$0xff] %v1319_v46  ;;  %v1322_v57 = vmin.f32 %v810_v48, 1.0  ;;  %v814_v58 = vmax.f32 %v302_v49, 0.0 }
  0xa0   : > { %1832 = vst [vmem:[%s2607_s16 + $0x468] sm:$0xff] %v1320_v47  ;;  %v815_v59 = vmax.f32 %v303_v50, 0.0  ;;  %v816_v60 = vmax.f32 %v304_v55, 0.0  ;;  %v306_v61 = vld [vmem:[%s2586_s3 + $0x4b8] sm:$0xff]  ;;  %v307_v62 = vld [vmem:[%s2586_s3 + $0x4c0] sm:$0xff]  ;;  %1833 = vst [vmem:[%s2607_s16 + $0x470] sm:$0xff] %v1321_v51 }
  0xa1   : > { %v1323_v63 = vmin.f32 %v811_v52, 1.0  ;;  %v1324_v0 = vmin.f32 %v812_v53, 1.0  ;;  %v1325_v1 = vmin.f32 %v813_v54, 1.0  ;;  %v817_v2 = vmax.f32 %v305_v56, 0.0  ;;  %v308_v3 = vld [vmem:[%s2586_s3 + $0x4c8] sm:$0xff]  ;;  %v309_v4 = vld [vmem:[%s2586_s3 + $0x4d0] sm:$0xff] }
  0xa2   : > { %1834 = vst [vmem:[%s2607_s16 + $0x478] sm:$0xff] %v1322_v57  ;;  %v1326_v5 = vmin.f32 %v814_v58, 1.0  ;;  %v1327_v6 = vmin.f32 %v815_v59, 1.0  ;;  %v1328_v7 = vmin.f32 %v816_v60, 1.0  ;;  %v818_v8 = vmax.f32 %v306_v61, 0.0  ;;  %v310_v9 = vld [vmem:[%s2586_s3 + $0x4d8] sm:$0xff] }
  0xa3   : > { %v311_v10 = vld [vmem:[%s2586_s3 + $0x4e0] sm:$0xff]  ;;  %1835 = vst [vmem:[%s2607_s16 + $0x480] sm:$0xff] %v1323_v63  ;;  %1836 = vst [vmem:[%s2607_s16 + $0x488] sm:$0xff] %v1324_v0  ;;  %v1329_v11 = vmin.f32 %v817_v2, 1.0  ;;  %v819_v12 = vmax.f32 %v307_v62, 0.0  ;;  %v820_v13 = vmax.f32 %v308_v3, 0.0 }
  0xa4   : > { %1837 = vst [vmem:[%s2607_s16 + $0x490] sm:$0xff] %v1325_v1  ;;  %v821_v14 = vmax.f32 %v309_v4, 0.0  ;;  %v312_v15 = vld [vmem:[%s2586_s3 + $0x4e8] sm:$0xff]  ;;  %v313_v16 = vld [vmem:[%s2586_s3 + $0x4f0] sm:$0xff]  ;;  %1838 = vst [vmem:[%s2607_s16 + $0x498] sm:$0xff] %v1326_v5  ;;  %v1330_v17 = vmin.f32 %v818_v8, 1.0 }
  0xa5   : > { %1839 = vst [vmem:[%s2607_s16 + $0x4a0] sm:$0xff] %v1327_v6  ;;  %1840 = vst [vmem:[%s2607_s16 + $0x4a8] sm:$0xff] %v1328_v7  ;;  %v822_v18 = vmax.f32 %v310_v9, 0.0  ;;  %v823_v19 = vmax.f32 %v311_v10, 0.0  ;;  %v824_v20 = vmax.f32 %v312_v15, 0.0  ;;  %v314_v21 = vld [vmem:[%s2586_s3 + $0x4f8] sm:$0xff] }
  0xa6   : > { %v315_v22 = vld [vmem:[%s2586_s3 + $0x500] sm:$0xff]  ;;  %1841 = vst [vmem:[%s2607_s16 + $0x4b0] sm:$0xff] %v1329_v11  ;;  %v1331_v23 = vmin.f32 %v819_v12, 1.0  ;;  %v1332_v24 = vmin.f32 %v820_v13, 1.0  ;;  %v1333_v25 = vmin.f32 %v821_v14, 1.0  ;;  %v825_v26 = vmax.f32 %v313_v16, 0.0 }
  0xa7   : > { %v316_v27 = vld [vmem:[%s2586_s3 + $0x508] sm:$0xff]  ;;  %v317_v28 = vld [vmem:[%s2586_s3 + $0x510] sm:$0xff]  ;;  %1842 = vst [vmem:[%s2607_s16 + $0x4b8] sm:$0xff] %v1330_v17  ;;  %v1334_v29 = vmin.f32 %v822_v18, 1.0  ;;  %v1335_v30 = vmin.f32 %v823_v19, 1.0  ;;  %v1336_v31 = vmin.f32 %v824_v20, 1.0 }
  0xa8   : > { %v826_v32 = vmax.f32 %v314_v21, 0.0  ;;  %v318_v33 = vld [vmem:[%s2586_s3 + $0x518] sm:$0xff]  ;;  %v319_v34 = vld [vmem:[%s2586_s3 + $0x520] sm:$0xff]  ;;  %1843 = vst [vmem:[%s2607_s16 + $0x4c0] sm:$0xff] %v1331_v23  ;;  %1844 = vst [vmem:[%s2607_s16 + $0x4c8] sm:$0xff] %v1332_v24  ;;  %v1337_v35 = vmin.f32 %v825_v26, 1.0 }
  0xa9   : > { %1845 = vst [vmem:[%s2607_s16 + $0x4d0] sm:$0xff] %v1333_v25  ;;  %v827_v36 = vmax.f32 %v315_v22, 0.0  ;;  %v828_v37 = vmax.f32 %v316_v27, 0.0  ;;  %v829_v38 = vmax.f32 %v317_v28, 0.0  ;;  %v320_v39 = vld [vmem:[%s2586_s3 + $0x528] sm:$0xff]  ;;  %v321_v40 = vld [vmem:[%s2586_s3 + $0x530] sm:$0xff] }
  0xaa   : > { %1846 = vst [vmem:[%s2607_s16 + $0x4d8] sm:$0xff] %v1334_v29  ;;  %1847 = vst [vmem:[%s2607_s16 + $0x4e0] sm:$0xff] %v1335_v30  ;;  %v1338_v41 = vmin.f32 %v826_v32, 1.0  ;;  %v830_v42 = vmax.f32 %v318_v33, 0.0  ;;  %v831_v43 = vmax.f32 %v319_v34, 0.0  ;;  %v832_v44 = vmax.f32 %v320_v39, 0.0 }
  0xab   : > { %1848 = vst [vmem:[%s2607_s16 + $0x4e8] sm:$0xff] %v1336_v31  ;;  %v322_v45 = vld [vmem:[%s2586_s3 + $0x538] sm:$0xff]  ;;  %v323_v46 = vld [vmem:[%s2586_s3 + $0x540] sm:$0xff]  ;;  %1849 = vst [vmem:[%s2607_s16 + $0x4f0] sm:$0xff] %v1337_v35  ;;  %v1339_v47 = vmin.f32 %v827_v36, 1.0  ;;  %v1340_v48 = vmin.f32 %v828_v37, 1.0 }
  0xac   : > { %v1341_v49 = vmin.f32 %v829_v38, 1.0  ;;  %v833_v50 = vmax.f32 %v321_v40, 0.0  ;;  %v324_v51 = vld [vmem:[%s2586_s3 + $0x548] sm:$0xff]  ;;  %v325_v52 = vld [vmem:[%s2586_s3 + $0x550] sm:$0xff]  ;;  %1850 = vst [vmem:[%s2607_s16 + $0x4f8] sm:$0xff] %v1338_v41  ;;  %v1342_v53 = vmin.f32 %v830_v42, 1.0 }
  0xad   : > { %v1343_v54 = vmin.f32 %v831_v43, 1.0  ;;  %v1344_v55 = vmin.f32 %v832_v44, 1.0  ;;  %v834_v56 = vmax.f32 %v322_v45, 0.0  ;;  %v326_v57 = vld [vmem:[%s2586_s3 + $0x558] sm:$0xff]  ;;  %v327_v58 = vld [vmem:[%s2586_s3 + $0x560] sm:$0xff]  ;;  %1851 = vst [vmem:[%s2607_s16 + $0x500] sm:$0xff] %v1339_v47 }
  0xae   : > { %1852 = vst [vmem:[%s2607_s16 + $0x508] sm:$0xff] %v1340_v48  ;;  %1853 = vst [vmem:[%s2607_s16 + $0x510] sm:$0xff] %v1341_v49  ;;  %v1345_v59 = vmin.f32 %v833_v50, 1.0  ;;  %v835_v60 = vmax.f32 %v323_v46, 0.0  ;;  %v836_v61 = vmax.f32 %v324_v51, 0.0  ;;  %v837_v62 = vmax.f32 %v325_v52, 0.0 }
  0xaf   : > { %v328_v63 = vld [vmem:[%s2586_s3 + $0x568] sm:$0xff]  ;;  %v329_v0 = vld [vmem:[%s2586_s3 + $0x570] sm:$0xff]  ;;  %1854 = vst [vmem:[%s2607_s16 + $0x518] sm:$0xff] %v1342_v53  ;;  %1855 = vst [vmem:[%s2607_s16 + $0x520] sm:$0xff] %v1343_v54  ;;  %v1346_v1 = vmin.f32 %v834_v56, 1.0  ;;  %v838_v2 = vmax.f32 %v326_v57, 0.0 }
  0xb0   : > { %1856 = vst [vmem:[%s2607_s16 + $0x528] sm:$0xff] %v1344_v55  ;;  %v839_v3 = vmax.f32 %v327_v58, 0.0  ;;  %v840_v4 = vmax.f32 %v328_v63, 0.0  ;;  %v330_v5 = vld [vmem:[%s2586_s3 + $0x578] sm:$0xff]  ;;  %v331_v6 = vld [vmem:[%s2586_s3 + $0x580] sm:$0xff]  ;;  %1857 = vst [vmem:[%s2607_s16 + $0x530] sm:$0xff] %v1345_v59 }
  0xb1   : > { %v1347_v7 = vmin.f32 %v835_v60, 1.0  ;;  %v1348_v8 = vmin.f32 %v836_v61, 1.0  ;;  %v1349_v9 = vmin.f32 %v837_v62, 1.0  ;;  %v841_v10 = vmax.f32 %v329_v0, 0.0  ;;  %v332_v11 = vld [vmem:[%s2586_s3 + $0x588] sm:$0xff]  ;;  %v333_v12 = vld [vmem:[%s2586_s3 + $0x590] sm:$0xff] }
  0xb2   : > { %1858 = vst [vmem:[%s2607_s16 + $0x538] sm:$0xff] %v1346_v1  ;;  %v1350_v13 = vmin.f32 %v838_v2, 1.0  ;;  %v1351_v14 = vmin.f32 %v839_v3, 1.0  ;;  %v1352_v15 = vmin.f32 %v840_v4, 1.0  ;;  %v842_v16 = vmax.f32 %v330_v5, 0.0  ;;  %v334_v17 = vld [vmem:[%s2586_s3 + $0x598] sm:$0xff] }
  0xb3   : > { %v335_v18 = vld [vmem:[%s2586_s3 + $0x5a0] sm:$0xff]  ;;  %1859 = vst [vmem:[%s2607_s16 + $0x540] sm:$0xff] %v1347_v7  ;;  %1860 = vst [vmem:[%s2607_s16 + $0x548] sm:$0xff] %v1348_v8  ;;  %v1353_v19 = vmin.f32 %v841_v10, 1.0  ;;  %v843_v20 = vmax.f32 %v331_v6, 0.0  ;;  %v844_v21 = vmax.f32 %v332_v11, 0.0 }
  0xb4   : > { %1861 = vst [vmem:[%s2607_s16 + $0x550] sm:$0xff] %v1349_v9  ;;  %v845_v22 = vmax.f32 %v333_v12, 0.0  ;;  %v336_v23 = vld [vmem:[%s2586_s3 + $0x5a8] sm:$0xff]  ;;  %v337_v24 = vld [vmem:[%s2586_s3 + $0x5b0] sm:$0xff]  ;;  %1862 = vst [vmem:[%s2607_s16 + $0x558] sm:$0xff] %v1350_v13  ;;  %v1354_v25 = vmin.f32 %v842_v16, 1.0 }
  0xb5   : > { %1863 = vst [vmem:[%s2607_s16 + $0x560] sm:$0xff] %v1351_v14  ;;  %1864 = vst [vmem:[%s2607_s16 + $0x568] sm:$0xff] %v1352_v15  ;;  %v846_v26 = vmax.f32 %v334_v17, 0.0  ;;  %v847_v27 = vmax.f32 %v335_v18, 0.0  ;;  %v848_v28 = vmax.f32 %v336_v23, 0.0  ;;  %v338_v29 = vld [vmem:[%s2586_s3 + $0x5b8] sm:$0xff] }
  0xb6   : > { %v339_v30 = vld [vmem:[%s2586_s3 + $0x5c0] sm:$0xff]  ;;  %1865 = vst [vmem:[%s2607_s16 + $0x570] sm:$0xff] %v1353_v19  ;;  %v1355_v31 = vmin.f32 %v843_v20, 1.0  ;;  %v1356_v32 = vmin.f32 %v844_v21, 1.0  ;;  %v1357_v33 = vmin.f32 %v845_v22, 1.0  ;;  %v849_v34 = vmax.f32 %v337_v24, 0.0 }
  0xb7   : > { %v340_v35 = vld [vmem:[%s2586_s3 + $0x5c8] sm:$0xff]  ;;  %v341_v36 = vld [vmem:[%s2586_s3 + $0x5d0] sm:$0xff]  ;;  %1866 = vst [vmem:[%s2607_s16 + $0x578] sm:$0xff] %v1354_v25  ;;  %v1358_v37 = vmin.f32 %v846_v26, 1.0  ;;  %v1359_v38 = vmin.f32 %v847_v27, 1.0  ;;  %v1360_v39 = vmin.f32 %v848_v28, 1.0 }
  0xb8   : > { %v850_v40 = vmax.f32 %v338_v29, 0.0  ;;  %v342_v41 = vld [vmem:[%s2586_s3 + $0x5d8] sm:$0xff]  ;;  %v343_v42 = vld [vmem:[%s2586_s3 + $0x5e0] sm:$0xff]  ;;  %1867 = vst [vmem:[%s2607_s16 + $0x580] sm:$0xff] %v1355_v31  ;;  %1868 = vst [vmem:[%s2607_s16 + $0x588] sm:$0xff] %v1356_v32  ;;  %v1361_v43 = vmin.f32 %v849_v34, 1.0 }
  0xb9   : > { %1869 = vst [vmem:[%s2607_s16 + $0x590] sm:$0xff] %v1357_v33  ;;  %v851_v44 = vmax.f32 %v339_v30, 0.0  ;;  %v852_v45 = vmax.f32 %v340_v35, 0.0  ;;  %v853_v46 = vmax.f32 %v341_v36, 0.0  ;;  %v344_v47 = vld [vmem:[%s2586_s3 + $0x5e8] sm:$0xff]  ;;  %v345_v48 = vld [vmem:[%s2586_s3 + $0x5f0] sm:$0xff] }
  0xba   : > { %1870 = vst [vmem:[%s2607_s16 + $0x598] sm:$0xff] %v1358_v37  ;;  %1871 = vst [vmem:[%s2607_s16 + $0x5a0] sm:$0xff] %v1359_v38  ;;  %v1362_v49 = vmin.f32 %v850_v40, 1.0  ;;  %v854_v50 = vmax.f32 %v342_v41, 0.0  ;;  %v855_v51 = vmax.f32 %v343_v42, 0.0  ;;  %v856_v52 = vmax.f32 %v344_v47, 0.0 }
  0xbb   : > { %1872 = vst [vmem:[%s2607_s16 + $0x5a8] sm:$0xff] %v1360_v39  ;;  %v346_v53 = vld [vmem:[%s2586_s3 + $0x5f8] sm:$0xff]  ;;  %v347_v54 = vld [vmem:[%s2586_s3 + $0x600] sm:$0xff]  ;;  %1873 = vst [vmem:[%s2607_s16 + $0x5b0] sm:$0xff] %v1361_v43  ;;  %v1363_v55 = vmin.f32 %v851_v44, 1.0  ;;  %v1364_v56 = vmin.f32 %v852_v45, 1.0 }
  0xbc   : > { %v1365_v57 = vmin.f32 %v853_v46, 1.0  ;;  %v857_v58 = vmax.f32 %v345_v48, 0.0  ;;  %v348_v59 = vld [vmem:[%s2586_s3 + $0x608] sm:$0xff]  ;;  %v349_v60 = vld [vmem:[%s2586_s3 + $0x610] sm:$0xff]  ;;  %1874 = vst [vmem:[%s2607_s16 + $0x5b8] sm:$0xff] %v1362_v49  ;;  %v1366_v61 = vmin.f32 %v854_v50, 1.0 }
  0xbd   : > { %v1367_v62 = vmin.f32 %v855_v51, 1.0  ;;  %v1368_v63 = vmin.f32 %v856_v52, 1.0  ;;  %v858_v0 = vmax.f32 %v346_v53, 0.0  ;;  %v350_v1 = vld [vmem:[%s2586_s3 + $0x618] sm:$0xff]  ;;  %v351_v2 = vld [vmem:[%s2586_s3 + $0x620] sm:$0xff]  ;;  %1875 = vst [vmem:[%s2607_s16 + $0x5c0] sm:$0xff] %v1363_v55 }
  0xbe   : > { %1876 = vst [vmem:[%s2607_s16 + $0x5c8] sm:$0xff] %v1364_v56  ;;  %1877 = vst [vmem:[%s2607_s16 + $0x5d0] sm:$0xff] %v1365_v57  ;;  %v1369_v3 = vmin.f32 %v857_v58, 1.0  ;;  %v859_v4 = vmax.f32 %v347_v54, 0.0  ;;  %v860_v5 = vmax.f32 %v348_v59, 0.0  ;;  %v861_v6 = vmax.f32 %v349_v60, 0.0 }
  0xbf   : > { %v352_v7 = vld [vmem:[%s2586_s3 + $0x628] sm:$0xff]  ;;  %v353_v8 = vld [vmem:[%s2586_s3 + $0x630] sm:$0xff]  ;;  %1878 = vst [vmem:[%s2607_s16 + $0x5d8] sm:$0xff] %v1366_v61  ;;  %1879 = vst [vmem:[%s2607_s16 + $0x5e0] sm:$0xff] %v1367_v62  ;;  %v1370_v9 = vmin.f32 %v858_v0, 1.0  ;;  %v862_v10 = vmax.f32 %v350_v1, 0.0 }
  0xc0   : > { %1880 = vst [vmem:[%s2607_s16 + $0x5e8] sm:$0xff] %v1368_v63  ;;  %v863_v11 = vmax.f32 %v351_v2, 0.0  ;;  %v864_v12 = vmax.f32 %v352_v7, 0.0  ;;  %v354_v13 = vld [vmem:[%s2586_s3 + $0x638] sm:$0xff]  ;;  %v355_v14 = vld [vmem:[%s2586_s3 + $0x640] sm:$0xff]  ;;  %1881 = vst [vmem:[%s2607_s16 + $0x5f0] sm:$0xff] %v1369_v3 }
  0xc1   : > { %v1371_v15 = vmin.f32 %v859_v4, 1.0  ;;  %v1372_v16 = vmin.f32 %v860_v5, 1.0  ;;  %v1373_v17 = vmin.f32 %v861_v6, 1.0  ;;  %v865_v18 = vmax.f32 %v353_v8, 0.0  ;;  %v356_v19 = vld [vmem:[%s2586_s3 + $0x648] sm:$0xff]  ;;  %v357_v20 = vld [vmem:[%s2586_s3 + $0x650] sm:$0xff] }
  0xc2   : > { %1882 = vst [vmem:[%s2607_s16 + $0x5f8] sm:$0xff] %v1370_v9  ;;  %v1374_v21 = vmin.f32 %v862_v10, 1.0  ;;  %v1375_v22 = vmin.f32 %v863_v11, 1.0  ;;  %v1376_v23 = vmin.f32 %v864_v12, 1.0  ;;  %v866_v24 = vmax.f32 %v354_v13, 0.0  ;;  %v358_v25 = vld [vmem:[%s2586_s3 + $0x658] sm:$0xff] }
  0xc3   : > { %v359_v26 = vld [vmem:[%s2586_s3 + $0x660] sm:$0xff]  ;;  %1883 = vst [vmem:[%s2607_s16 + $0x600] sm:$0xff] %v1371_v15  ;;  %1884 = vst [vmem:[%s2607_s16 + $0x608] sm:$0xff] %v1372_v16  ;;  %v1377_v27 = vmin.f32 %v865_v18, 1.0  ;;  %v867_v28 = vmax.f32 %v355_v14, 0.0  ;;  %v868_v29 = vmax.f32 %v356_v19, 0.0 }
  0xc4   : > { %1885 = vst [vmem:[%s2607_s16 + $0x610] sm:$0xff] %v1373_v17  ;;  %v869_v30 = vmax.f32 %v357_v20, 0.0  ;;  %v360_v31 = vld [vmem:[%s2586_s3 + $0x668] sm:$0xff]  ;;  %v361_v32 = vld [vmem:[%s2586_s3 + $0x670] sm:$0xff]  ;;  %1886 = vst [vmem:[%s2607_s16 + $0x618] sm:$0xff] %v1374_v21  ;;  %v1378_v33 = vmin.f32 %v866_v24, 1.0 }
  0xc5   : > { %1887 = vst [vmem:[%s2607_s16 + $0x620] sm:$0xff] %v1375_v22  ;;  %1888 = vst [vmem:[%s2607_s16 + $0x628] sm:$0xff] %v1376_v23  ;;  %v870_v34 = vmax.f32 %v358_v25, 0.0  ;;  %v871_v35 = vmax.f32 %v359_v26, 0.0  ;;  %v872_v36 = vmax.f32 %v360_v31, 0.0  ;;  %v362_v37 = vld [vmem:[%s2586_s3 + $0x678] sm:$0xff] }
  0xc6   : > { %v363_v38 = vld [vmem:[%s2586_s3 + $0x680] sm:$0xff]  ;;  %1889 = vst [vmem:[%s2607_s16 + $0x630] sm:$0xff] %v1377_v27  ;;  %v1379_v39 = vmin.f32 %v867_v28, 1.0  ;;  %v1380_v40 = vmin.f32 %v868_v29, 1.0  ;;  %v1381_v41 = vmin.f32 %v869_v30, 1.0  ;;  %v873_v42 = vmax.f32 %v361_v32, 0.0 }
  0xc7   : > { %v364_v43 = vld [vmem:[%s2586_s3 + $0x688] sm:$0xff]  ;;  %v365_v44 = vld [vmem:[%s2586_s3 + $0x690] sm:$0xff]  ;;  %1890 = vst [vmem:[%s2607_s16 + $0x638] sm:$0xff] %v1378_v33  ;;  %v1382_v45 = vmin.f32 %v870_v34, 1.0  ;;  %v1383_v46 = vmin.f32 %v871_v35, 1.0  ;;  %v1384_v47 = vmin.f32 %v872_v36, 1.0 }
  0xc8   : > { %v874_v48 = vmax.f32 %v362_v37, 0.0  ;;  %v366_v49 = vld [vmem:[%s2586_s3 + $0x698] sm:$0xff]  ;;  %v367_v50 = vld [vmem:[%s2586_s3 + $0x6a0] sm:$0xff]  ;;  %1891 = vst [vmem:[%s2607_s16 + $0x640] sm:$0xff] %v1379_v39  ;;  %1892 = vst [vmem:[%s2607_s16 + $0x648] sm:$0xff] %v1380_v40  ;;  %v1385_v51 = vmin.f32 %v873_v42, 1.0 }
  0xc9   : > { %1893 = vst [vmem:[%s2607_s16 + $0x650] sm:$0xff] %v1381_v41  ;;  %v875_v52 = vmax.f32 %v363_v38, 0.0  ;;  %v876_v53 = vmax.f32 %v364_v43, 0.0  ;;  %v877_v54 = vmax.f32 %v365_v44, 0.0  ;;  %v368_v55 = vld [vmem:[%s2586_s3 + $0x6a8] sm:$0xff]  ;;  %v369_v56 = vld [vmem:[%s2586_s3 + $0x6b0] sm:$0xff] }
  0xca   : > { %1894 = vst [vmem:[%s2607_s16 + $0x658] sm:$0xff] %v1382_v45  ;;  %1895 = vst [vmem:[%s2607_s16 + $0x660] sm:$0xff] %v1383_v46  ;;  %v1386_v57 = vmin.f32 %v874_v48, 1.0  ;;  %v878_v58 = vmax.f32 %v366_v49, 0.0  ;;  %v879_v59 = vmax.f32 %v367_v50, 0.0  ;;  %v880_v60 = vmax.f32 %v368_v55, 0.0 }
  0xcb   : > { %1896 = vst [vmem:[%s2607_s16 + $0x668] sm:$0xff] %v1384_v47  ;;  %v370_v61 = vld [vmem:[%s2586_s3 + $0x6b8] sm:$0xff]  ;;  %v371_v62 = vld [vmem:[%s2586_s3 + $0x6c0] sm:$0xff]  ;;  %1897 = vst [vmem:[%s2607_s16 + $0x670] sm:$0xff] %v1385_v51  ;;  %v1387_v63 = vmin.f32 %v875_v52, 1.0  ;;  %v1388_v0 = vmin.f32 %v876_v53, 1.0 }
  0xcc   : > { %v1389_v1 = vmin.f32 %v877_v54, 1.0  ;;  %v881_v2 = vmax.f32 %v369_v56, 0.0  ;;  %v372_v3 = vld [vmem:[%s2586_s3 + $0x6c8] sm:$0xff]  ;;  %v373_v4 = vld [vmem:[%s2586_s3 + $0x6d0] sm:$0xff]  ;;  %1898 = vst [vmem:[%s2607_s16 + $0x678] sm:$0xff] %v1386_v57  ;;  %v1390_v5 = vmin.f32 %v878_v58, 1.0 }
  0xcd   : > { %v1391_v6 = vmin.f32 %v879_v59, 1.0  ;;  %v1392_v7 = vmin.f32 %v880_v60, 1.0  ;;  %v882_v8 = vmax.f32 %v370_v61, 0.0  ;;  %v374_v9 = vld [vmem:[%s2586_s3 + $0x6d8] sm:$0xff]  ;;  %v375_v10 = vld [vmem:[%s2586_s3 + $0x6e0] sm:$0xff]  ;;  %1899 = vst [vmem:[%s2607_s16 + $0x680] sm:$0xff] %v1387_v63 }
  0xce   : > { %1900 = vst [vmem:[%s2607_s16 + $0x688] sm:$0xff] %v1388_v0  ;;  %1901 = vst [vmem:[%s2607_s16 + $0x690] sm:$0xff] %v1389_v1  ;;  %v1393_v11 = vmin.f32 %v881_v2, 1.0  ;;  %v883_v12 = vmax.f32 %v371_v62, 0.0  ;;  %v884_v13 = vmax.f32 %v372_v3, 0.0  ;;  %v885_v14 = vmax.f32 %v373_v4, 0.0 }
  0xcf   : > { %v376_v15 = vld [vmem:[%s2586_s3 + $0x6e8] sm:$0xff]  ;;  %v377_v16 = vld [vmem:[%s2586_s3 + $0x6f0] sm:$0xff]  ;;  %1902 = vst [vmem:[%s2607_s16 + $0x698] sm:$0xff] %v1390_v5  ;;  %1903 = vst [vmem:[%s2607_s16 + $0x6a0] sm:$0xff] %v1391_v6  ;;  %v1394_v17 = vmin.f32 %v882_v8, 1.0  ;;  %v886_v18 = vmax.f32 %v374_v9, 0.0 }
  0xd0   : > { %1904 = vst [vmem:[%s2607_s16 + $0x6a8] sm:$0xff] %v1392_v7  ;;  %v887_v19 = vmax.f32 %v375_v10, 0.0  ;;  %v888_v20 = vmax.f32 %v376_v15, 0.0  ;;  %v378_v21 = vld [vmem:[%s2586_s3 + $0x6f8] sm:$0xff]  ;;  %v379_v22 = vld [vmem:[%s2586_s3 + $0x700] sm:$0xff]  ;;  %1905 = vst [vmem:[%s2607_s16 + $0x6b0] sm:$0xff] %v1393_v11 }
  0xd1   : > { %v1395_v23 = vmin.f32 %v883_v12, 1.0  ;;  %v1396_v24 = vmin.f32 %v884_v13, 1.0  ;;  %v1397_v25 = vmin.f32 %v885_v14, 1.0  ;;  %v889_v26 = vmax.f32 %v377_v16, 0.0  ;;  %v380_v27 = vld [vmem:[%s2586_s3 + $0x708] sm:$0xff]  ;;  %v381_v28 = vld [vmem:[%s2586_s3 + $0x710] sm:$0xff] }
  0xd2   : > { %1906 = vst [vmem:[%s2607_s16 + $0x6b8] sm:$0xff] %v1394_v17  ;;  %v1398_v29 = vmin.f32 %v886_v18, 1.0  ;;  %v1399_v30 = vmin.f32 %v887_v19, 1.0  ;;  %v1400_v31 = vmin.f32 %v888_v20, 1.0  ;;  %v890_v32 = vmax.f32 %v378_v21, 0.0  ;;  %v382_v33 = vld [vmem:[%s2586_s3 + $0x718] sm:$0xff] }
  0xd3   : > { %v383_v34 = vld [vmem:[%s2586_s3 + $0x720] sm:$0xff]  ;;  %1907 = vst [vmem:[%s2607_s16 + $0x6c0] sm:$0xff] %v1395_v23  ;;  %1908 = vst [vmem:[%s2607_s16 + $0x6c8] sm:$0xff] %v1396_v24  ;;  %v1401_v35 = vmin.f32 %v889_v26, 1.0  ;;  %v891_v36 = vmax.f32 %v379_v22, 0.0  ;;  %v892_v37 = vmax.f32 %v380_v27, 0.0 }
  0xd4   : > { %1909 = vst [vmem:[%s2607_s16 + $0x6d0] sm:$0xff] %v1397_v25  ;;  %v893_v38 = vmax.f32 %v381_v28, 0.0  ;;  %v384_v39 = vld [vmem:[%s2586_s3 + $0x728] sm:$0xff]  ;;  %v385_v40 = vld [vmem:[%s2586_s3 + $0x730] sm:$0xff]  ;;  %1910 = vst [vmem:[%s2607_s16 + $0x6d8] sm:$0xff] %v1398_v29  ;;  %v1402_v41 = vmin.f32 %v890_v32, 1.0 }
  0xd5   : > { %1911 = vst [vmem:[%s2607_s16 + $0x6e0] sm:$0xff] %v1399_v30  ;;  %1912 = vst [vmem:[%s2607_s16 + $0x6e8] sm:$0xff] %v1400_v31  ;;  %v894_v42 = vmax.f32 %v382_v33, 0.0  ;;  %v895_v43 = vmax.f32 %v383_v34, 0.0  ;;  %v896_v44 = vmax.f32 %v384_v39, 0.0  ;;  %v386_v45 = vld [vmem:[%s2586_s3 + $0x738] sm:$0xff] }
  0xd6   : > { %v387_v46 = vld [vmem:[%s2586_s3 + $0x740] sm:$0xff]  ;;  %1913 = vst [vmem:[%s2607_s16 + $0x6f0] sm:$0xff] %v1401_v35  ;;  %v1403_v47 = vmin.f32 %v891_v36, 1.0  ;;  %v1404_v48 = vmin.f32 %v892_v37, 1.0  ;;  %v1405_v49 = vmin.f32 %v893_v38, 1.0  ;;  %v897_v50 = vmax.f32 %v385_v40, 0.0 }
  0xd7   : > { %v388_v51 = vld [vmem:[%s2586_s3 + $0x748] sm:$0xff]  ;;  %v389_v52 = vld [vmem:[%s2586_s3 + $0x750] sm:$0xff]  ;;  %1914 = vst [vmem:[%s2607_s16 + $0x6f8] sm:$0xff] %v1402_v41  ;;  %v1406_v53 = vmin.f32 %v894_v42, 1.0  ;;  %v1407_v54 = vmin.f32 %v895_v43, 1.0  ;;  %v1408_v55 = vmin.f32 %v896_v44, 1.0 }
  0xd8   : > { %v898_v56 = vmax.f32 %v386_v45, 0.0  ;;  %v390_v57 = vld [vmem:[%s2586_s3 + $0x758] sm:$0xff]  ;;  %v391_v58 = vld [vmem:[%s2586_s3 + $0x760] sm:$0xff]  ;;  %1915 = vst [vmem:[%s2607_s16 + $0x700] sm:$0xff] %v1403_v47  ;;  %1916 = vst [vmem:[%s2607_s16 + $0x708] sm:$0xff] %v1404_v48  ;;  %v1409_v59 = vmin.f32 %v897_v50, 1.0 }
  0xd9   : > { %1917 = vst [vmem:[%s2607_s16 + $0x710] sm:$0xff] %v1405_v49  ;;  %v899_v60 = vmax.f32 %v387_v46, 0.0  ;;  %v900_v61 = vmax.f32 %v388_v51, 0.0  ;;  %v901_v62 = vmax.f32 %v389_v52, 0.0  ;;  %v392_v63 = vld [vmem:[%s2586_s3 + $0x768] sm:$0xff]  ;;  %v393_v0 = vld [vmem:[%s2586_s3 + $0x770] sm:$0xff] }
  0xda   : > { %1918 = vst [vmem:[%s2607_s16 + $0x718] sm:$0xff] %v1406_v53  ;;  %1919 = vst [vmem:[%s2607_s16 + $0x720] sm:$0xff] %v1407_v54  ;;  %v1410_v1 = vmin.f32 %v898_v56, 1.0  ;;  %v902_v2 = vmax.f32 %v390_v57, 0.0  ;;  %v903_v3 = vmax.f32 %v391_v58, 0.0  ;;  %v904_v4 = vmax.f32 %v392_v63, 0.0 }
  0xdb   : > { %1920 = vst [vmem:[%s2607_s16 + $0x728] sm:$0xff] %v1408_v55  ;;  %v394_v5 = vld [vmem:[%s2586_s3 + $0x778] sm:$0xff]  ;;  %v395_v6 = vld [vmem:[%s2586_s3 + $0x780] sm:$0xff]  ;;  %1921 = vst [vmem:[%s2607_s16 + $0x730] sm:$0xff] %v1409_v59  ;;  %v1411_v7 = vmin.f32 %v899_v60, 1.0  ;;  %v1412_v8 = vmin.f32 %v900_v61, 1.0 }
  0xdc   : > { %v1413_v9 = vmin.f32 %v901_v62, 1.0  ;;  %v905_v10 = vmax.f32 %v393_v0, 0.0  ;;  %v396_v11 = vld [vmem:[%s2586_s3 + $0x788] sm:$0xff]  ;;  %v397_v12 = vld [vmem:[%s2586_s3 + $0x790] sm:$0xff]  ;;  %1922 = vst [vmem:[%s2607_s16 + $0x738] sm:$0xff] %v1410_v1  ;;  %v1414_v13 = vmin.f32 %v902_v2, 1.0 }
  0xdd   : > { %v1415_v14 = vmin.f32 %v903_v3, 1.0  ;;  %v1416_v15 = vmin.f32 %v904_v4, 1.0  ;;  %v906_v16 = vmax.f32 %v394_v5, 0.0  ;;  %v398_v17 = vld [vmem:[%s2586_s3 + $0x798] sm:$0xff]  ;;  %v399_v18 = vld [vmem:[%s2586_s3 + $0x7a0] sm:$0xff]  ;;  %1923 = vst [vmem:[%s2607_s16 + $0x740] sm:$0xff] %v1411_v7 }
  0xde   : > { %1924 = vst [vmem:[%s2607_s16 + $0x748] sm:$0xff] %v1412_v8  ;;  %1925 = vst [vmem:[%s2607_s16 + $0x750] sm:$0xff] %v1413_v9  ;;  %v1417_v19 = vmin.f32 %v905_v10, 1.0  ;;  %v907_v20 = vmax.f32 %v395_v6, 0.0  ;;  %v908_v21 = vmax.f32 %v396_v11, 0.0  ;;  %v909_v22 = vmax.f32 %v397_v12, 0.0 }
  0xdf   : > { %v400_v23 = vld [vmem:[%s2586_s3 + $0x7a8] sm:$0xff]  ;;  %v401_v24 = vld [vmem:[%s2586_s3 + $0x7b0] sm:$0xff]  ;;  %1926 = vst [vmem:[%s2607_s16 + $0x758] sm:$0xff] %v1414_v13  ;;  %1927 = vst [vmem:[%s2607_s16 + $0x760] sm:$0xff] %v1415_v14  ;;  %v1418_v25 = vmin.f32 %v906_v16, 1.0  ;;  %v910_v26 = vmax.f32 %v398_v17, 0.0 }
  0xe0   : > { %1928 = vst [vmem:[%s2607_s16 + $0x768] sm:$0xff] %v1416_v15  ;;  %v911_v27 = vmax.f32 %v399_v18, 0.0  ;;  %v912_v28 = vmax.f32 %v400_v23, 0.0  ;;  %v402_v29 = vld [vmem:[%s2586_s3 + $0x7b8] sm:$0xff]  ;;  %v403_v30 = vld [vmem:[%s2586_s3 + $0x7c0] sm:$0xff]  ;;  %1929 = vst [vmem:[%s2607_s16 + $0x770] sm:$0xff] %v1417_v19 }
  0xe1   : > { %v1419_v31 = vmin.f32 %v907_v20, 1.0  ;;  %v1420_v32 = vmin.f32 %v908_v21, 1.0  ;;  %v1421_v33 = vmin.f32 %v909_v22, 1.0  ;;  %v913_v34 = vmax.f32 %v401_v24, 0.0  ;;  %v404_v35 = vld [vmem:[%s2586_s3 + $0x7c8] sm:$0xff]  ;;  %v405_v36 = vld [vmem:[%s2586_s3 + $0x7d0] sm:$0xff] }
  0xe2   : > { %1930 = vst [vmem:[%s2607_s16 + $0x778] sm:$0xff] %v1418_v25  ;;  %v1422_v37 = vmin.f32 %v910_v26, 1.0  ;;  %v1423_v38 = vmin.f32 %v911_v27, 1.0  ;;  %v1424_v39 = vmin.f32 %v912_v28, 1.0  ;;  %v914_v40 = vmax.f32 %v402_v29, 0.0  ;;  %v406_v41 = vld [vmem:[%s2586_s3 + $0x7d8] sm:$0xff] }
  0xe3   : > { %v407_v42 = vld [vmem:[%s2586_s3 + $0x7e0] sm:$0xff]  ;;  %1931 = vst [vmem:[%s2607_s16 + $0x780] sm:$0xff] %v1419_v31  ;;  %1932 = vst [vmem:[%s2607_s16 + $0x788] sm:$0xff] %v1420_v32  ;;  %v1425_v43 = vmin.f32 %v913_v34, 1.0  ;;  %v915_v44 = vmax.f32 %v403_v30, 0.0  ;;  %v916_v45 = vmax.f32 %v404_v35, 0.0 }
  0xe4   : > { %1933 = vst [vmem:[%s2607_s16 + $0x790] sm:$0xff] %v1421_v33  ;;  %v917_v46 = vmax.f32 %v405_v36, 0.0  ;;  %v408_v47 = vld [vmem:[%s2586_s3 + $0x7e8] sm:$0xff]  ;;  %v409_v48 = vld [vmem:[%s2586_s3 + $0x7f0] sm:$0xff]  ;;  %1934 = vst [vmem:[%s2607_s16 + $0x798] sm:$0xff] %v1422_v37  ;;  %v1426_v49 = vmin.f32 %v914_v40, 1.0 }
  0xe5   : > { %1935 = vst [vmem:[%s2607_s16 + $0x7a0] sm:$0xff] %v1423_v38  ;;  %1936 = vst [vmem:[%s2607_s16 + $0x7a8] sm:$0xff] %v1424_v39  ;;  %v918_v50 = vmax.f32 %v406_v41, 0.0  ;;  %v919_v51 = vmax.f32 %v407_v42, 0.0  ;;  %v920_v52 = vmax.f32 %v408_v47, 0.0  ;;  %v410_v53 = vld [vmem:[%s2586_s3 + $0x7f8] sm:$0xff] }
  0xe6   : > { %v411_v54 = vld [vmem:[%s2586_s3 + $0x800] sm:$0xff]  ;;  %1937 = vst [vmem:[%s2607_s16 + $0x7b0] sm:$0xff] %v1425_v43  ;;  %v1427_v55 = vmin.f32 %v915_v44, 1.0  ;;  %v1428_v56 = vmin.f32 %v916_v45, 1.0  ;;  %v1429_v57 = vmin.f32 %v917_v46, 1.0  ;;  %v921_v58 = vmax.f32 %v409_v48, 0.0 }
  0xe7   : > { %v412_v59 = vld [vmem:[%s2586_s3 + $0x808] sm:$0xff]  ;;  %v413_v60 = vld [vmem:[%s2586_s3 + $0x810] sm:$0xff]  ;;  %1938 = vst [vmem:[%s2607_s16 + $0x7b8] sm:$0xff] %v1426_v49  ;;  %v1430_v61 = vmin.f32 %v918_v50, 1.0  ;;  %v1431_v62 = vmin.f32 %v919_v51, 1.0  ;;  %v1432_v63 = vmin.f32 %v920_v52, 1.0 }
  0xe8   : > { %v922_v0 = vmax.f32 %v410_v53, 0.0  ;;  %v414_v1 = vld [vmem:[%s2586_s3 + $0x818] sm:$0xff]  ;;  %v415_v2 = vld [vmem:[%s2586_s3 + $0x820] sm:$0xff]  ;;  %1939 = vst [vmem:[%s2607_s16 + $0x7c0] sm:$0xff] %v1427_v55  ;;  %1940 = vst [vmem:[%s2607_s16 + $0x7c8] sm:$0xff] %v1428_v56  ;;  %v1433_v3 = vmin.f32 %v921_v58, 1.0 }
  0xe9   : > { %1941 = vst [vmem:[%s2607_s16 + $0x7d0] sm:$0xff] %v1429_v57  ;;  %v923_v4 = vmax.f32 %v411_v54, 0.0  ;;  %v924_v5 = vmax.f32 %v412_v59, 0.0  ;;  %v925_v6 = vmax.f32 %v413_v60, 0.0  ;;  %v416_v7 = vld [vmem:[%s2586_s3 + $0x828] sm:$0xff]  ;;  %v417_v8 = vld [vmem:[%s2586_s3 + $0x830] sm:$0xff] }
  0xea   : > { %1942 = vst [vmem:[%s2607_s16 + $0x7d8] sm:$0xff] %v1430_v61  ;;  %1943 = vst [vmem:[%s2607_s16 + $0x7e0] sm:$0xff] %v1431_v62  ;;  %v1434_v9 = vmin.f32 %v922_v0, 1.0  ;;  %v926_v10 = vmax.f32 %v414_v1, 0.0  ;;  %v927_v11 = vmax.f32 %v415_v2, 0.0  ;;  %v928_v12 = vmax.f32 %v416_v7, 0.0 }
  0xeb   : > { %1944 = vst [vmem:[%s2607_s16 + $0x7e8] sm:$0xff] %v1432_v63  ;;  %v418_v13 = vld [vmem:[%s2586_s3 + $0x838] sm:$0xff]  ;;  %v419_v14 = vld [vmem:[%s2586_s3 + $0x840] sm:$0xff]  ;;  %1945 = vst [vmem:[%s2607_s16 + $0x7f0] sm:$0xff] %v1433_v3  ;;  %v1435_v15 = vmin.f32 %v923_v4, 1.0  ;;  %v1436_v16 = vmin.f32 %v924_v5, 1.0 }
  0xec   : > { %v1437_v17 = vmin.f32 %v925_v6, 1.0  ;;  %v929_v18 = vmax.f32 %v417_v8, 0.0  ;;  %v420_v19 = vld [vmem:[%s2586_s3 + $0x848] sm:$0xff]  ;;  %v421_v20 = vld [vmem:[%s2586_s3 + $0x850] sm:$0xff]  ;;  %1946 = vst [vmem:[%s2607_s16 + $0x7f8] sm:$0xff] %v1434_v9  ;;  %v1438_v21 = vmin.f32 %v926_v10, 1.0 }
  0xed   : > { %v1439_v22 = vmin.f32 %v927_v11, 1.0  ;;  %v1440_v23 = vmin.f32 %v928_v12, 1.0  ;;  %v930_v24 = vmax.f32 %v418_v13, 0.0  ;;  %v422_v25 = vld [vmem:[%s2586_s3 + $0x858] sm:$0xff]  ;;  %v423_v26 = vld [vmem:[%s2586_s3 + $0x860] sm:$0xff]  ;;  %1947 = vst [vmem:[%s2607_s16 + $0x800] sm:$0xff] %v1435_v15 }
  0xee   : > { %1948 = vst [vmem:[%s2607_s16 + $0x808] sm:$0xff] %v1436_v16  ;;  %1949 = vst [vmem:[%s2607_s16 + $0x810] sm:$0xff] %v1437_v17  ;;  %v1441_v27 = vmin.f32 %v929_v18, 1.0  ;;  %v931_v28 = vmax.f32 %v419_v14, 0.0  ;;  %v932_v29 = vmax.f32 %v420_v19, 0.0  ;;  %v933_v30 = vmax.f32 %v421_v20, 0.0 }
  0xef   : > { %v424_v31 = vld [vmem:[%s2586_s3 + $0x868] sm:$0xff]  ;;  %v425_v32 = vld [vmem:[%s2586_s3 + $0x870] sm:$0xff]  ;;  %1950 = vst [vmem:[%s2607_s16 + $0x818] sm:$0xff] %v1438_v21  ;;  %1951 = vst [vmem:[%s2607_s16 + $0x820] sm:$0xff] %v1439_v22  ;;  %v1442_v33 = vmin.f32 %v930_v24, 1.0  ;;  %v934_v34 = vmax.f32 %v422_v25, 0.0 }
  0xf0   : > { %1952 = vst [vmem:[%s2607_s16 + $0x828] sm:$0xff] %v1440_v23  ;;  %v935_v35 = vmax.f32 %v423_v26, 0.0  ;;  %v936_v36 = vmax.f32 %v424_v31, 0.0  ;;  %v426_v37 = vld [vmem:[%s2586_s3 + $0x878] sm:$0xff]  ;;  %v427_v38 = vld [vmem:[%s2586_s3 + $0x880] sm:$0xff]  ;;  %1953 = vst [vmem:[%s2607_s16 + $0x830] sm:$0xff] %v1441_v27 }
  0xf1   : > { %v1443_v39 = vmin.f32 %v931_v28, 1.0  ;;  %v1444_v40 = vmin.f32 %v932_v29, 1.0  ;;  %v1445_v41 = vmin.f32 %v933_v30, 1.0  ;;  %v937_v42 = vmax.f32 %v425_v32, 0.0  ;;  %v428_v43 = vld [vmem:[%s2586_s3 + $0x888] sm:$0xff]  ;;  %v429_v44 = vld [vmem:[%s2586_s3 + $0x890] sm:$0xff] }
  0xf2   : > { %1954 = vst [vmem:[%s2607_s16 + $0x838] sm:$0xff] %v1442_v33  ;;  %v1446_v45 = vmin.f32 %v934_v34, 1.0  ;;  %v1447_v46 = vmin.f32 %v935_v35, 1.0  ;;  %v1448_v47 = vmin.f32 %v936_v36, 1.0  ;;  %v938_v48 = vmax.f32 %v426_v37, 0.0  ;;  %v430_v49 = vld [vmem:[%s2586_s3 + $0x898] sm:$0xff] }
  0xf3   : > { %v431_v50 = vld [vmem:[%s2586_s3 + $0x8a0] sm:$0xff]  ;;  %1955 = vst [vmem:[%s2607_s16 + $0x840] sm:$0xff] %v1443_v39  ;;  %1956 = vst [vmem:[%s2607_s16 + $0x848] sm:$0xff] %v1444_v40  ;;  %v1449_v51 = vmin.f32 %v937_v42, 1.0  ;;  %v939_v52 = vmax.f32 %v427_v38, 0.0  ;;  %v940_v53 = vmax.f32 %v428_v43, 0.0 }
  0xf4   : > { %1957 = vst [vmem:[%s2607_s16 + $0x850] sm:$0xff] %v1445_v41  ;;  %v941_v54 = vmax.f32 %v429_v44, 0.0  ;;  %v432_v55 = vld [vmem:[%s2586_s3 + $0x8a8] sm:$0xff]  ;;  %v433_v56 = vld [vmem:[%s2586_s3 + $0x8b0] sm:$0xff]  ;;  %1958 = vst [vmem:[%s2607_s16 + $0x858] sm:$0xff] %v1446_v45  ;;  %v1450_v57 = vmin.f32 %v938_v48, 1.0 }
  0xf5   : > { %1959 = vst [vmem:[%s2607_s16 + $0x860] sm:$0xff] %v1447_v46  ;;  %1960 = vst [vmem:[%s2607_s16 + $0x868] sm:$0xff] %v1448_v47  ;;  %v942_v58 = vmax.f32 %v430_v49, 0.0  ;;  %v943_v59 = vmax.f32 %v431_v50, 0.0  ;;  %v944_v60 = vmax.f32 %v432_v55, 0.0  ;;  %v434_v61 = vld [vmem:[%s2586_s3 + $0x8b8] sm:$0xff] }
  0xf6   : > { %v435_v62 = vld [vmem:[%s2586_s3 + $0x8c0] sm:$0xff]  ;;  %1961 = vst [vmem:[%s2607_s16 + $0x870] sm:$0xff] %v1449_v51  ;;  %v1451_v63 = vmin.f32 %v939_v52, 1.0  ;;  %v1452_v0 = vmin.f32 %v940_v53, 1.0  ;;  %v1453_v1 = vmin.f32 %v941_v54, 1.0  ;;  %v945_v2 = vmax.f32 %v433_v56, 0.0 }
  0xf7   : > { %v436_v3 = vld [vmem:[%s2586_s3 + $0x8c8] sm:$0xff]  ;;  %v437_v4 = vld [vmem:[%s2586_s3 + $0x8d0] sm:$0xff]  ;;  %1962 = vst [vmem:[%s2607_s16 + $0x878] sm:$0xff] %v1450_v57  ;;  %v1454_v5 = vmin.f32 %v942_v58, 1.0  ;;  %v1455_v6 = vmin.f32 %v943_v59, 1.0  ;;  %v1456_v7 = vmin.f32 %v944_v60, 1.0 }
  0xf8   : > { %v946_v8 = vmax.f32 %v434_v61, 0.0  ;;  %v438_v9 = vld [vmem:[%s2586_s3 + $0x8d8] sm:$0xff]  ;;  %v439_v10 = vld [vmem:[%s2586_s3 + $0x8e0] sm:$0xff]  ;;  %1963 = vst [vmem:[%s2607_s16 + $0x880] sm:$0xff] %v1451_v63  ;;  %1964 = vst [vmem:[%s2607_s16 + $0x888] sm:$0xff] %v1452_v0  ;;  %v1457_v11 = vmin.f32 %v945_v2, 1.0 }
  0xf9   : > { %1965 = vst [vmem:[%s2607_s16 + $0x890] sm:$0xff] %v1453_v1  ;;  %v947_v12 = vmax.f32 %v435_v62, 0.0  ;;  %v948_v13 = vmax.f32 %v436_v3, 0.0  ;;  %v949_v14 = vmax.f32 %v437_v4, 0.0  ;;  %v440_v15 = vld [vmem:[%s2586_s3 + $0x8e8] sm:$0xff]  ;;  %v441_v16 = vld [vmem:[%s2586_s3 + $0x8f0] sm:$0xff] }
  0xfa   : > { %1966 = vst [vmem:[%s2607_s16 + $0x898] sm:$0xff] %v1454_v5  ;;  %1967 = vst [vmem:[%s2607_s16 + $0x8a0] sm:$0xff] %v1455_v6  ;;  %v1458_v17 = vmin.f32 %v946_v8, 1.0  ;;  %v950_v18 = vmax.f32 %v438_v9, 0.0  ;;  %v951_v19 = vmax.f32 %v439_v10, 0.0  ;;  %v952_v20 = vmax.f32 %v440_v15, 0.0 }
  0xfb   : > { %1968 = vst [vmem:[%s2607_s16 + $0x8a8] sm:$0xff] %v1456_v7  ;;  %v442_v21 = vld [vmem:[%s2586_s3 + $0x8f8] sm:$0xff]  ;;  %v443_v22 = vld [vmem:[%s2586_s3 + $0x900] sm:$0xff]  ;;  %1969 = vst [vmem:[%s2607_s16 + $0x8b0] sm:$0xff] %v1457_v11  ;;  %v1459_v23 = vmin.f32 %v947_v12, 1.0  ;;  %v1460_v24 = vmin.f32 %v948_v13, 1.0 }
  0xfc   : > { %v1461_v25 = vmin.f32 %v949_v14, 1.0  ;;  %v953_v26 = vmax.f32 %v441_v16, 0.0  ;;  %v444_v27 = vld [vmem:[%s2586_s3 + $0x908] sm:$0xff]  ;;  %v445_v28 = vld [vmem:[%s2586_s3 + $0x910] sm:$0xff]  ;;  %1970 = vst [vmem:[%s2607_s16 + $0x8b8] sm:$0xff] %v1458_v17  ;;  %v1462_v29 = vmin.f32 %v950_v18, 1.0 }
  0xfd   : > { %v1463_v30 = vmin.f32 %v951_v19, 1.0  ;;  %v1464_v31 = vmin.f32 %v952_v20, 1.0  ;;  %v954_v32 = vmax.f32 %v442_v21, 0.0  ;;  %v446_v33 = vld [vmem:[%s2586_s3 + $0x918] sm:$0xff]  ;;  %v447_v34 = vld [vmem:[%s2586_s3 + $0x920] sm:$0xff]  ;;  %1971 = vst [vmem:[%s2607_s16 + $0x8c0] sm:$0xff] %v1459_v23 }
  0xfe   : > { %1972 = vst [vmem:[%s2607_s16 + $0x8c8] sm:$0xff] %v1460_v24  ;;  %1973 = vst [vmem:[%s2607_s16 + $0x8d0] sm:$0xff] %v1461_v25  ;;  %v1465_v35 = vmin.f32 %v953_v26, 1.0  ;;  %v955_v36 = vmax.f32 %v443_v22, 0.0  ;;  %v956_v37 = vmax.f32 %v444_v27, 0.0  ;;  %v957_v38 = vmax.f32 %v445_v28, 0.0 }
  0xff   : > { %v448_v39 = vld [vmem:[%s2586_s3 + $0x928] sm:$0xff]  ;;  %v449_v40 = vld [vmem:[%s2586_s3 + $0x930] sm:$0xff]  ;;  %1974 = vst [vmem:[%s2607_s16 + $0x8d8] sm:$0xff] %v1462_v29  ;;  %1975 = vst [vmem:[%s2607_s16 + $0x8e0] sm:$0xff] %v1463_v30  ;;  %v1466_v41 = vmin.f32 %v954_v32, 1.0  ;;  %v958_v42 = vmax.f32 %v446_v33, 0.0 }
 0x100   : > { %1976 = vst [vmem:[%s2607_s16 + $0x8e8] sm:$0xff] %v1464_v31  ;;  %v959_v43 = vmax.f32 %v447_v34, 0.0  ;;  %v960_v44 = vmax.f32 %v448_v39, 0.0  ;;  %v450_v45 = vld [vmem:[%s2586_s3 + $0x938] sm:$0xff]  ;;  %v451_v46 = vld [vmem:[%s2586_s3 + $0x940] sm:$0xff]  ;;  %1977 = vst [vmem:[%s2607_s16 + $0x8f0] sm:$0xff] %v1465_v35 }
 0x101   : > { %v1467_v47 = vmin.f32 %v955_v36, 1.0  ;;  %v1468_v48 = vmin.f32 %v956_v37, 1.0  ;;  %v1469_v49 = vmin.f32 %v957_v38, 1.0  ;;  %v961_v50 = vmax.f32 %v449_v40, 0.0  ;;  %v452_v51 = vld [vmem:[%s2586_s3 + $0x948] sm:$0xff]  ;;  %v453_v52 = vld [vmem:[%s2586_s3 + $0x950] sm:$0xff] }
 0x102   : > { %1978 = vst [vmem:[%s2607_s16 + $0x8f8] sm:$0xff] %v1466_v41  ;;  %v1470_v53 = vmin.f32 %v958_v42, 1.0  ;;  %v1471_v54 = vmin.f32 %v959_v43, 1.0  ;;  %v1472_v55 = vmin.f32 %v960_v44, 1.0  ;;  %v962_v56 = vmax.f32 %v450_v45, 0.0  ;;  %v454_v57 = vld [vmem:[%s2586_s3 + $0x958] sm:$0xff] }
 0x103   : > { %v455_v58 = vld [vmem:[%s2586_s3 + $0x960] sm:$0xff]  ;;  %1979 = vst [vmem:[%s2607_s16 + $0x900] sm:$0xff] %v1467_v47  ;;  %1980 = vst [vmem:[%s2607_s16 + $0x908] sm:$0xff] %v1468_v48  ;;  %v1473_v59 = vmin.f32 %v961_v50, 1.0  ;;  %v963_v60 = vmax.f32 %v451_v46, 0.0  ;;  %v964_v61 = vmax.f32 %v452_v51, 0.0 }
 0x104   : > { %1981 = vst [vmem:[%s2607_s16 + $0x910] sm:$0xff] %v1469_v49  ;;  %v965_v62 = vmax.f32 %v453_v52, 0.0  ;;  %v456_v63 = vld [vmem:[%s2586_s3 + $0x968] sm:$0xff]  ;;  %v457_v0 = vld [vmem:[%s2586_s3 + $0x970] sm:$0xff]  ;;  %1982 = vst [vmem:[%s2607_s16 + $0x918] sm:$0xff] %v1470_v53  ;;  %v1474_v1 = vmin.f32 %v962_v56, 1.0 }
 0x105   : > { %1983 = vst [vmem:[%s2607_s16 + $0x920] sm:$0xff] %v1471_v54  ;;  %1984 = vst [vmem:[%s2607_s16 + $0x928] sm:$0xff] %v1472_v55  ;;  %v966_v2 = vmax.f32 %v454_v57, 0.0  ;;  %v967_v3 = vmax.f32 %v455_v58, 0.0  ;;  %v968_v4 = vmax.f32 %v456_v63, 0.0  ;;  %v458_v5 = vld [vmem:[%s2586_s3 + $0x978] sm:$0xff] }
 0x106   : > { %v459_v6 = vld [vmem:[%s2586_s3 + $0x980] sm:$0xff]  ;;  %1985 = vst [vmem:[%s2607_s16 + $0x930] sm:$0xff] %v1473_v59  ;;  %v1475_v7 = vmin.f32 %v963_v60, 1.0  ;;  %v1476_v8 = vmin.f32 %v964_v61, 1.0  ;;  %v1477_v9 = vmin.f32 %v965_v62, 1.0  ;;  %v969_v10 = vmax.f32 %v457_v0, 0.0 }
 0x107   : > { %v460_v11 = vld [vmem:[%s2586_s3 + $0x988] sm:$0xff]  ;;  %v461_v12 = vld [vmem:[%s2586_s3 + $0x990] sm:$0xff]  ;;  %1986 = vst [vmem:[%s2607_s16 + $0x938] sm:$0xff] %v1474_v1  ;;  %v1478_v13 = vmin.f32 %v966_v2, 1.0  ;;  %v1479_v14 = vmin.f32 %v967_v3, 1.0  ;;  %v1480_v15 = vmin.f32 %v968_v4, 1.0 }
 0x108   : > { %v970_v16 = vmax.f32 %v458_v5, 0.0  ;;  %v462_v17 = vld [vmem:[%s2586_s3 + $0x998] sm:$0xff]  ;;  %v463_v18 = vld [vmem:[%s2586_s3 + $0x9a0] sm:$0xff]  ;;  %1987 = vst [vmem:[%s2607_s16 + $0x940] sm:$0xff] %v1475_v7  ;;  %1988 = vst [vmem:[%s2607_s16 + $0x948] sm:$0xff] %v1476_v8  ;;  %v1481_v19 = vmin.f32 %v969_v10, 1.0 }
 0x109   : > { %1989 = vst [vmem:[%s2607_s16 + $0x950] sm:$0xff] %v1477_v9  ;;  %v971_v20 = vmax.f32 %v459_v6, 0.0  ;;  %v972_v21 = vmax.f32 %v460_v11, 0.0  ;;  %v973_v22 = vmax.f32 %v461_v12, 0.0  ;;  %v464_v23 = vld [vmem:[%s2586_s3 + $0x9a8] sm:$0xff]  ;;  %v465_v24 = vld [vmem:[%s2586_s3 + $0x9b0] sm:$0xff] }
 0x10a   : > { %1990 = vst [vmem:[%s2607_s16 + $0x958] sm:$0xff] %v1478_v13  ;;  %1991 = vst [vmem:[%s2607_s16 + $0x960] sm:$0xff] %v1479_v14  ;;  %v1482_v25 = vmin.f32 %v970_v16, 1.0  ;;  %v974_v26 = vmax.f32 %v462_v17, 0.0  ;;  %v975_v27 = vmax.f32 %v463_v18, 0.0  ;;  %v976_v28 = vmax.f32 %v464_v23, 0.0 }
 0x10b   : > { %1992 = vst [vmem:[%s2607_s16 + $0x968] sm:$0xff] %v1480_v15  ;;  %v466_v29 = vld [vmem:[%s2586_s3 + $0x9b8] sm:$0xff]  ;;  %v467_v30 = vld [vmem:[%s2586_s3 + $0x9c0] sm:$0xff]  ;;  %1993 = vst [vmem:[%s2607_s16 + $0x970] sm:$0xff] %v1481_v19  ;;  %v1483_v31 = vmin.f32 %v971_v20, 1.0  ;;  %v1484_v32 = vmin.f32 %v972_v21, 1.0 }
 0x10c   : > { %v1485_v33 = vmin.f32 %v973_v22, 1.0  ;;  %v977_v34 = vmax.f32 %v465_v24, 0.0  ;;  %v468_v35 = vld [vmem:[%s2586_s3 + $0x9c8] sm:$0xff]  ;;  %v469_v36 = vld [vmem:[%s2586_s3 + $0x9d0] sm:$0xff]  ;;  %1994 = vst [vmem:[%s2607_s16 + $0x978] sm:$0xff] %v1482_v25  ;;  %v1486_v37 = vmin.f32 %v974_v26, 1.0 }
 0x10d   : > { %v1487_v38 = vmin.f32 %v975_v27, 1.0  ;;  %v1488_v39 = vmin.f32 %v976_v28, 1.0  ;;  %v978_v40 = vmax.f32 %v466_v29, 0.0  ;;  %v470_v41 = vld [vmem:[%s2586_s3 + $0x9d8] sm:$0xff]  ;;  %v471_v42 = vld [vmem:[%s2586_s3 + $0x9e0] sm:$0xff]  ;;  %1995 = vst [vmem:[%s2607_s16 + $0x980] sm:$0xff] %v1483_v31 }
 0x10e   : > { %1996 = vst [vmem:[%s2607_s16 + $0x988] sm:$0xff] %v1484_v32  ;;  %1997 = vst [vmem:[%s2607_s16 + $0x990] sm:$0xff] %v1485_v33  ;;  %v1489_v43 = vmin.f32 %v977_v34, 1.0  ;;  %v979_v44 = vmax.f32 %v467_v30, 0.0  ;;  %v980_v45 = vmax.f32 %v468_v35, 0.0  ;;  %v981_v46 = vmax.f32 %v469_v36, 0.0 }
 0x10f   : > { %v472_v47 = vld [vmem:[%s2586_s3 + $0x9e8] sm:$0xff]  ;;  %v473_v48 = vld [vmem:[%s2586_s3 + $0x9f0] sm:$0xff]  ;;  %1998 = vst [vmem:[%s2607_s16 + $0x998] sm:$0xff] %v1486_v37  ;;  %1999 = vst [vmem:[%s2607_s16 + $0x9a0] sm:$0xff] %v1487_v38  ;;  %v1490_v49 = vmin.f32 %v978_v40, 1.0  ;;  %v982_v50 = vmax.f32 %v470_v41, 0.0 }
 0x110   : > { %2000 = vst [vmem:[%s2607_s16 + $0x9a8] sm:$0xff] %v1488_v39  ;;  %v983_v51 = vmax.f32 %v471_v42, 0.0  ;;  %v984_v52 = vmax.f32 %v472_v47, 0.0  ;;  %v474_v53 = vld [vmem:[%s2586_s3 + $0x9f8] sm:$0xff]  ;;  %v475_v54 = vld [vmem:[%s2586_s3 + $0xa00] sm:$0xff]  ;;  %2001 = vst [vmem:[%s2607_s16 + $0x9b0] sm:$0xff] %v1489_v43 }
 0x111   : > { %v1491_v55 = vmin.f32 %v979_v44, 1.0  ;;  %v1492_v56 = vmin.f32 %v980_v45, 1.0  ;;  %v1493_v57 = vmin.f32 %v981_v46, 1.0  ;;  %v985_v58 = vmax.f32 %v473_v48, 0.0  ;;  %v476_v59 = vld [vmem:[%s2586_s3 + $0xa08] sm:$0xff]  ;;  %v477_v60 = vld [vmem:[%s2586_s3 + $0xa10] sm:$0xff] }
 0x112   : > { %2002 = vst [vmem:[%s2607_s16 + $0x9b8] sm:$0xff] %v1490_v49  ;;  %v1494_v61 = vmin.f32 %v982_v50, 1.0  ;;  %v1495_v62 = vmin.f32 %v983_v51, 1.0  ;;  %v1496_v63 = vmin.f32 %v984_v52, 1.0  ;;  %v986_v0 = vmax.f32 %v474_v53, 0.0  ;;  %v478_v1 = vld [vmem:[%s2586_s3 + $0xa18] sm:$0xff] }
 0x113   : > { %v479_v2 = vld [vmem:[%s2586_s3 + $0xa20] sm:$0xff]  ;;  %2003 = vst [vmem:[%s2607_s16 + $0x9c0] sm:$0xff] %v1491_v55  ;;  %2004 = vst [vmem:[%s2607_s16 + $0x9c8] sm:$0xff] %v1492_v56  ;;  %v1497_v3 = vmin.f32 %v985_v58, 1.0  ;;  %v987_v4 = vmax.f32 %v475_v54, 0.0  ;;  %v988_v5 = vmax.f32 %v476_v59, 0.0 }
 0x114   : > { %2005 = vst [vmem:[%s2607_s16 + $0x9d0] sm:$0xff] %v1493_v57  ;;  %v989_v6 = vmax.f32 %v477_v60, 0.0  ;;  %v480_v7 = vld [vmem:[%s2586_s3 + $0xa28] sm:$0xff]  ;;  %v481_v8 = vld [vmem:[%s2586_s3 + $0xa30] sm:$0xff]  ;;  %2006 = vst [vmem:[%s2607_s16 + $0x9d8] sm:$0xff] %v1494_v61  ;;  %v1498_v9 = vmin.f32 %v986_v0, 1.0 }
 0x115   : > { %2007 = vst [vmem:[%s2607_s16 + $0x9e0] sm:$0xff] %v1495_v62  ;;  %2008 = vst [vmem:[%s2607_s16 + $0x9e8] sm:$0xff] %v1496_v63  ;;  %v990_v10 = vmax.f32 %v478_v1, 0.0  ;;  %v991_v11 = vmax.f32 %v479_v2, 0.0  ;;  %v992_v12 = vmax.f32 %v480_v7, 0.0  ;;  %v482_v13 = vld [vmem:[%s2586_s3 + $0xa38] sm:$0xff] }
 0x116   : > { %v483_v14 = vld [vmem:[%s2586_s3 + $0xa40] sm:$0xff]  ;;  %2009 = vst [vmem:[%s2607_s16 + $0x9f0] sm:$0xff] %v1497_v3  ;;  %v1499_v15 = vmin.f32 %v987_v4, 1.0  ;;  %v1500_v16 = vmin.f32 %v988_v5, 1.0  ;;  %v1501_v17 = vmin.f32 %v989_v6, 1.0  ;;  %v993_v18 = vmax.f32 %v481_v8, 0.0 }
 0x117   : > { %v484_v19 = vld [vmem:[%s2586_s3 + $0xa48] sm:$0xff]  ;;  %v485_v20 = vld [vmem:[%s2586_s3 + $0xa50] sm:$0xff]  ;;  %2010 = vst [vmem:[%s2607_s16 + $0x9f8] sm:$0xff] %v1498_v9  ;;  %v1502_v21 = vmin.f32 %v990_v10, 1.0  ;;  %v1503_v22 = vmin.f32 %v991_v11, 1.0  ;;  %v1504_v23 = vmin.f32 %v992_v12, 1.0 }
 0x118   : > { %v994_v24 = vmax.f32 %v482_v13, 0.0  ;;  %v486_v25 = vld [vmem:[%s2586_s3 + $0xa58] sm:$0xff]  ;;  %v487_v26 = vld [vmem:[%s2586_s3 + $0xa60] sm:$0xff]  ;;  %2011 = vst [vmem:[%s2607_s16 + $0xa00] sm:$0xff] %v1499_v15  ;;  %2012 = vst [vmem:[%s2607_s16 + $0xa08] sm:$0xff] %v1500_v16  ;;  %v1505_v27 = vmin.f32 %v993_v18, 1.0 }
 0x119   : > { %2013 = vst [vmem:[%s2607_s16 + $0xa10] sm:$0xff] %v1501_v17  ;;  %v995_v28 = vmax.f32 %v483_v14, 0.0  ;;  %v996_v29 = vmax.f32 %v484_v19, 0.0  ;;  %v997_v30 = vmax.f32 %v485_v20, 0.0  ;;  %v488_v31 = vld [vmem:[%s2586_s3 + $0xa68] sm:$0xff]  ;;  %v489_v32 = vld [vmem:[%s2586_s3 + $0xa70] sm:$0xff] }
 0x11a   : > { %2014 = vst [vmem:[%s2607_s16 + $0xa18] sm:$0xff] %v1502_v21  ;;  %2015 = vst [vmem:[%s2607_s16 + $0xa20] sm:$0xff] %v1503_v22  ;;  %v1506_v33 = vmin.f32 %v994_v24, 1.0  ;;  %v998_v34 = vmax.f32 %v486_v25, 0.0  ;;  %v999_v35 = vmax.f32 %v487_v26, 0.0  ;;  %v1000_v36 = vmax.f32 %v488_v31, 0.0 }
 0x11b   : > { %2016 = vst [vmem:[%s2607_s16 + $0xa28] sm:$0xff] %v1504_v23  ;;  %v490_v37 = vld [vmem:[%s2586_s3 + $0xa78] sm:$0xff]  ;;  %v491_v38 = vld [vmem:[%s2586_s3 + $0xa80] sm:$0xff]  ;;  %2017 = vst [vmem:[%s2607_s16 + $0xa30] sm:$0xff] %v1505_v27  ;;  %v1507_v39 = vmin.f32 %v995_v28, 1.0  ;;  %v1508_v40 = vmin.f32 %v996_v29, 1.0 }
 0x11c   : > { %v1509_v41 = vmin.f32 %v997_v30, 1.0  ;;  %v1001_v42 = vmax.f32 %v489_v32, 0.0  ;;  %v492_v43 = vld [vmem:[%s2586_s3 + $0xa88] sm:$0xff]  ;;  %v493_v44 = vld [vmem:[%s2586_s3 + $0xa90] sm:$0xff]  ;;  %2018 = vst [vmem:[%s2607_s16 + $0xa38] sm:$0xff] %v1506_v33  ;;  %v1510_v45 = vmin.f32 %v998_v34, 1.0 }
 0x11d   : > { %v1511_v46 = vmin.f32 %v999_v35, 1.0  ;;  %v1512_v47 = vmin.f32 %v1000_v36, 1.0  ;;  %v1002_v48 = vmax.f32 %v490_v37, 0.0  ;;  %v494_v49 = vld [vmem:[%s2586_s3 + $0xa98] sm:$0xff]  ;;  %v495_v50 = vld [vmem:[%s2586_s3 + $0xaa0] sm:$0xff]  ;;  %2019 = vst [vmem:[%s2607_s16 + $0xa40] sm:$0xff] %v1507_v39 }
 0x11e   : > { %2020 = vst [vmem:[%s2607_s16 + $0xa48] sm:$0xff] %v1508_v40  ;;  %2021 = vst [vmem:[%s2607_s16 + $0xa50] sm:$0xff] %v1509_v41  ;;  %v1513_v51 = vmin.f32 %v1001_v42, 1.0  ;;  %v1003_v52 = vmax.f32 %v491_v38, 0.0  ;;  %v1004_v53 = vmax.f32 %v492_v43, 0.0  ;;  %v1005_v54 = vmax.f32 %v493_v44, 0.0 }
 0x11f   : > { %v496_v55 = vld [vmem:[%s2586_s3 + $0xaa8] sm:$0xff]  ;;  %v497_v56 = vld [vmem:[%s2586_s3 + $0xab0] sm:$0xff]  ;;  %2022 = vst [vmem:[%s2607_s16 + $0xa58] sm:$0xff] %v1510_v45  ;;  %2023 = vst [vmem:[%s2607_s16 + $0xa60] sm:$0xff] %v1511_v46  ;;  %v1514_v57 = vmin.f32 %v1002_v48, 1.0  ;;  %v1006_v58 = vmax.f32 %v494_v49, 0.0 }
 0x120   : > { %2024 = vst [vmem:[%s2607_s16 + $0xa68] sm:$0xff] %v1512_v47  ;;  %v1007_v59 = vmax.f32 %v495_v50, 0.0  ;;  %v1008_v60 = vmax.f32 %v496_v55, 0.0  ;;  %v498_v61 = vld [vmem:[%s2586_s3 + $0xab8] sm:$0xff]  ;;  %v499_v62 = vld [vmem:[%s2586_s3 + $0xac0] sm:$0xff]  ;;  %2025 = vst [vmem:[%s2607_s16 + $0xa70] sm:$0xff] %v1513_v51 }
 0x121   : > { %v1515_v63 = vmin.f32 %v1003_v52, 1.0  ;;  %v1516_v0 = vmin.f32 %v1004_v53, 1.0  ;;  %v1517_v1 = vmin.f32 %v1005_v54, 1.0  ;;  %v1009_v2 = vmax.f32 %v497_v56, 0.0  ;;  %v500_v3 = vld [vmem:[%s2586_s3 + $0xac8] sm:$0xff]  ;;  %v501_v4 = vld [vmem:[%s2586_s3 + $0xad0] sm:$0xff] }
 0x122   : > { %2026 = vst [vmem:[%s2607_s16 + $0xa78] sm:$0xff] %v1514_v57  ;;  %v1518_v5 = vmin.f32 %v1006_v58, 1.0  ;;  %v1519_v6 = vmin.f32 %v1007_v59, 1.0  ;;  %v1520_v7 = vmin.f32 %v1008_v60, 1.0  ;;  %v1010_v8 = vmax.f32 %v498_v61, 0.0  ;;  %v502_v9 = vld [vmem:[%s2586_s3 + $0xad8] sm:$0xff] }
 0x123   : > { %v503_v10 = vld [vmem:[%s2586_s3 + $0xae0] sm:$0xff]  ;;  %2027 = vst [vmem:[%s2607_s16 + $0xa80] sm:$0xff] %v1515_v63  ;;  %2028 = vst [vmem:[%s2607_s16 + $0xa88] sm:$0xff] %v1516_v0  ;;  %v1521_v11 = vmin.f32 %v1009_v2, 1.0  ;;  %v1011_v12 = vmax.f32 %v499_v62, 0.0  ;;  %v1012_v13 = vmax.f32 %v500_v3, 0.0 }
 0x124   : > { %2029 = vst [vmem:[%s2607_s16 + $0xa90] sm:$0xff] %v1517_v1  ;;  %v1013_v14 = vmax.f32 %v501_v4, 0.0  ;;  %v504_v15 = vld [vmem:[%s2586_s3 + $0xae8] sm:$0xff]  ;;  %v505_v16 = vld [vmem:[%s2586_s3 + $0xaf0] sm:$0xff]  ;;  %2030 = vst [vmem:[%s2607_s16 + $0xa98] sm:$0xff] %v1518_v5  ;;  %v1522_v17 = vmin.f32 %v1010_v8, 1.0 }
 0x125   : > { %2031 = vst [vmem:[%s2607_s16 + $0xaa0] sm:$0xff] %v1519_v6  ;;  %2032 = vst [vmem:[%s2607_s16 + $0xaa8] sm:$0xff] %v1520_v7  ;;  %v1014_v18 = vmax.f32 %v502_v9, 0.0  ;;  %v1015_v19 = vmax.f32 %v503_v10, 0.0  ;;  %v1016_v20 = vmax.f32 %v504_v15, 0.0  ;;  %v506_v21 = vld [vmem:[%s2586_s3 + $0xaf8] sm:$0xff] }
 0x126   : > { %v507_v22 = vld [vmem:[%s2586_s3 + $0xb00] sm:$0xff]  ;;  %2033 = vst [vmem:[%s2607_s16 + $0xab0] sm:$0xff] %v1521_v11  ;;  %v1523_v23 = vmin.f32 %v1011_v12, 1.0  ;;  %v1524_v24 = vmin.f32 %v1012_v13, 1.0  ;;  %v1525_v25 = vmin.f32 %v1013_v14, 1.0  ;;  %v1017_v26 = vmax.f32 %v505_v16, 0.0 }
 0x127   : > { %v508_v27 = vld [vmem:[%s2586_s3 + $0xb08] sm:$0xff]  ;;  %v509_v28 = vld [vmem:[%s2586_s3 + $0xb10] sm:$0xff]  ;;  %2034 = vst [vmem:[%s2607_s16 + $0xab8] sm:$0xff] %v1522_v17  ;;  %v1526_v29 = vmin.f32 %v1014_v18, 1.0  ;;  %v1527_v30 = vmin.f32 %v1015_v19, 1.0  ;;  %v1528_v31 = vmin.f32 %v1016_v20, 1.0 }
 0x128   : > { %v1018_v32 = vmax.f32 %v506_v21, 0.0  ;;  %v510_v33 = vld [vmem:[%s2586_s3 + $0xb18] sm:$0xff]  ;;  %v511_v34 = vld [vmem:[%s2586_s3 + $0xb20] sm:$0xff]  ;;  %2035 = vst [vmem:[%s2607_s16 + $0xac0] sm:$0xff] %v1523_v23  ;;  %2036 = vst [vmem:[%s2607_s16 + $0xac8] sm:$0xff] %v1524_v24  ;;  %v1529_v35 = vmin.f32 %v1017_v26, 1.0 }
 0x129   : > { %2037 = vst [vmem:[%s2607_s16 + $0xad0] sm:$0xff] %v1525_v25  ;;  %v1019_v36 = vmax.f32 %v507_v22, 0.0  ;;  %v1020_v37 = vmax.f32 %v508_v27, 0.0  ;;  %v1021_v38 = vmax.f32 %v509_v28, 0.0  ;;  %v512_v39 = vld [vmem:[%s2586_s3 + $0xb28] sm:$0xff]  ;;  %v513_v40 = vld [vmem:[%s2586_s3 + $0xb30] sm:$0xff] }
 0x12a   : > { %2038 = vst [vmem:[%s2607_s16 + $0xad8] sm:$0xff] %v1526_v29  ;;  %2039 = vst [vmem:[%s2607_s16 + $0xae0] sm:$0xff] %v1527_v30  ;;  %v1530_v41 = vmin.f32 %v1018_v32, 1.0  ;;  %v1022_v42 = vmax.f32 %v510_v33, 0.0  ;;  %v1023_v43 = vmax.f32 %v511_v34, 0.0  ;;  %v1024_v44 = vmax.f32 %v512_v39, 0.0 }
 0x12b   : > { %2040 = vst [vmem:[%s2607_s16 + $0xae8] sm:$0xff] %v1528_v31  ;;  %v514_v45 = vld [vmem:[%s2586_s3 + $0xb38] sm:$0xff]  ;;  %v515_v46 = vld [vmem:[%s2586_s3 + $0xb40] sm:$0xff]  ;;  %2041 = vst [vmem:[%s2607_s16 + $0xaf0] sm:$0xff] %v1529_v35  ;;  %v1531_v47 = vmin.f32 %v1019_v36, 1.0  ;;  %v1532_v48 = vmin.f32 %v1020_v37, 1.0 }
 0x12c   : > { %v1533_v49 = vmin.f32 %v1021_v38, 1.0  ;;  %v1025_v50 = vmax.f32 %v513_v40, 0.0  ;;  %v516_v51 = vld [vmem:[%s2586_s3 + $0xb48] sm:$0xff]  ;;  %v517_v52 = vld [vmem:[%s2586_s3 + $0xb50] sm:$0xff]  ;;  %2042 = vst [vmem:[%s2607_s16 + $0xaf8] sm:$0xff] %v1530_v41  ;;  %v1534_v53 = vmin.f32 %v1022_v42, 1.0 }
 0x12d   : > { %v1535_v54 = vmin.f32 %v1023_v43, 1.0  ;;  %v1536_v55 = vmin.f32 %v1024_v44, 1.0  ;;  %v1026_v56 = vmax.f32 %v514_v45, 0.0  ;;  %v518_v57 = vld [vmem:[%s2586_s3 + $0xb58] sm:$0xff]  ;;  %v519_v58 = vld [vmem:[%s2586_s3 + $0xb60] sm:$0xff]  ;;  %2043 = vst [vmem:[%s2607_s16 + $0xb00] sm:$0xff] %v1531_v47 }
 0x12e   : > { %2044 = vst [vmem:[%s2607_s16 + $0xb08] sm:$0xff] %v1532_v48  ;;  %2045 = vst [vmem:[%s2607_s16 + $0xb10] sm:$0xff] %v1533_v49  ;;  %v1537_v59 = vmin.f32 %v1025_v50, 1.0  ;;  %v1027_v60 = vmax.f32 %v515_v46, 0.0  ;;  %v1028_v61 = vmax.f32 %v516_v51, 0.0  ;;  %v1029_v62 = vmax.f32 %v517_v52, 0.0 }
 0x12f   : > { %v520_v63 = vld [vmem:[%s2586_s3 + $0xb68] sm:$0xff]  ;;  %v521_v0 = vld [vmem:[%s2586_s3 + $0xb70] sm:$0xff]  ;;  %2046 = vst [vmem:[%s2607_s16 + $0xb18] sm:$0xff] %v1534_v53  ;;  %2047 = vst [vmem:[%s2607_s16 + $0xb20] sm:$0xff] %v1535_v54  ;;  %v1538_v1 = vmin.f32 %v1026_v56, 1.0  ;;  %v1030_v2 = vmax.f32 %v518_v57, 0.0 }
 0x130   : > { %2048 = vst [vmem:[%s2607_s16 + $0xb28] sm:$0xff] %v1536_v55  ;;  %v1031_v3 = vmax.f32 %v519_v58, 0.0  ;;  %v1032_v4 = vmax.f32 %v520_v63, 0.0  ;;  %v522_v5 = vld [vmem:[%s2586_s3 + $0xb78] sm:$0xff]  ;;  %v523_v6 = vld [vmem:[%s2586_s3 + $0xb80] sm:$0xff]  ;;  %2049 = vst [vmem:[%s2607_s16 + $0xb30] sm:$0xff] %v1537_v59 }
 0x131   : > { %v1539_v7 = vmin.f32 %v1027_v60, 1.0  ;;  %v1540_v8 = vmin.f32 %v1028_v61, 1.0  ;;  %v1541_v9 = vmin.f32 %v1029_v62, 1.0  ;;  %v1033_v10 = vmax.f32 %v521_v0, 0.0  ;;  %v524_v11 = vld [vmem:[%s2586_s3 + $0xb88] sm:$0xff]  ;;  %v525_v12 = vld [vmem:[%s2586_s3 + $0xb90] sm:$0xff] }
 0x132   : > { %2050 = vst [vmem:[%s2607_s16 + $0xb38] sm:$0xff] %v1538_v1  ;;  %v1542_v13 = vmin.f32 %v1030_v2, 1.0  ;;  %v1543_v14 = vmin.f32 %v1031_v3, 1.0  ;;  %v1544_v15 = vmin.f32 %v1032_v4, 1.0  ;;  %v1034_v16 = vmax.f32 %v522_v5, 0.0  ;;  %v526_v17 = vld [vmem:[%s2586_s3 + $0xb98] sm:$0xff] }
 0x133   : > { %v527_v18 = vld [vmem:[%s2586_s3 + $0xba0] sm:$0xff]  ;;  %2051 = vst [vmem:[%s2607_s16 + $0xb40] sm:$0xff] %v1539_v7  ;;  %2052 = vst [vmem:[%s2607_s16 + $0xb48] sm:$0xff] %v1540_v8  ;;  %v1545_v19 = vmin.f32 %v1033_v10, 1.0  ;;  %v1035_v20 = vmax.f32 %v523_v6, 0.0  ;;  %v1036_v21 = vmax.f32 %v524_v11, 0.0 }
 0x134   : > { %2053 = vst [vmem:[%s2607_s16 + $0xb50] sm:$0xff] %v1541_v9  ;;  %v1037_v22 = vmax.f32 %v525_v12, 0.0  ;;  %v528_v23 = vld [vmem:[%s2586_s3 + $0xba8] sm:$0xff]  ;;  %v529_v24 = vld [vmem:[%s2586_s3 + $0xbb0] sm:$0xff]  ;;  %2054 = vst [vmem:[%s2607_s16 + $0xb58] sm:$0xff] %v1542_v13  ;;  %v1546_v25 = vmin.f32 %v1034_v16, 1.0 }
 0x135   : > { %2055 = vst [vmem:[%s2607_s16 + $0xb60] sm:$0xff] %v1543_v14  ;;  %2056 = vst [vmem:[%s2607_s16 + $0xb68] sm:$0xff] %v1544_v15  ;;  %v1038_v26 = vmax.f32 %v526_v17, 0.0  ;;  %v1039_v27 = vmax.f32 %v527_v18, 0.0  ;;  %v1040_v28 = vmax.f32 %v528_v23, 0.0  ;;  %v530_v29 = vld [vmem:[%s2586_s3 + $0xbb8] sm:$0xff] }
 0x136   : > { %v531_v30 = vld [vmem:[%s2586_s3 + $0xbc0] sm:$0xff]  ;;  %2057 = vst [vmem:[%s2607_s16 + $0xb70] sm:$0xff] %v1545_v19  ;;  %v1547_v31 = vmin.f32 %v1035_v20, 1.0  ;;  %v1548_v32 = vmin.f32 %v1036_v21, 1.0  ;;  %v1549_v33 = vmin.f32 %v1037_v22, 1.0  ;;  %v1041_v34 = vmax.f32 %v529_v24, 0.0 }
 0x137   : > { %v532_v35 = vld [vmem:[%s2586_s3 + $0xbc8] sm:$0xff]  ;;  %v533_v36 = vld [vmem:[%s2586_s3 + $0xbd0] sm:$0xff]  ;;  %2058 = vst [vmem:[%s2607_s16 + $0xb78] sm:$0xff] %v1546_v25  ;;  %v1550_v37 = vmin.f32 %v1038_v26, 1.0  ;;  %v1551_v38 = vmin.f32 %v1039_v27, 1.0  ;;  %v1552_v39 = vmin.f32 %v1040_v28, 1.0 }
 0x138   : > { %v1042_v40 = vmax.f32 %v530_v29, 0.0  ;;  %v534_v41 = vld [vmem:[%s2586_s3 + $0xbd8] sm:$0xff]  ;;  %v535_v42 = vld [vmem:[%s2586_s3 + $0xbe0] sm:$0xff]  ;;  %2059 = vst [vmem:[%s2607_s16 + $0xb80] sm:$0xff] %v1547_v31  ;;  %2060 = vst [vmem:[%s2607_s16 + $0xb88] sm:$0xff] %v1548_v32  ;;  %v1553_v43 = vmin.f32 %v1041_v34, 1.0 }
 0x139   : > { %2061 = vst [vmem:[%s2607_s16 + $0xb90] sm:$0xff] %v1549_v33  ;;  %v1043_v44 = vmax.f32 %v531_v30, 0.0  ;;  %v1044_v45 = vmax.f32 %v532_v35, 0.0  ;;  %v1045_v46 = vmax.f32 %v533_v36, 0.0  ;;  %v536_v47 = vld [vmem:[%s2586_s3 + $0xbe8] sm:$0xff]  ;;  %v537_v48 = vld [vmem:[%s2586_s3 + $0xbf0] sm:$0xff] }
 0x13a   : > { %2062 = vst [vmem:[%s2607_s16 + $0xb98] sm:$0xff] %v1550_v37  ;;  %2063 = vst [vmem:[%s2607_s16 + $0xba0] sm:$0xff] %v1551_v38  ;;  %v1554_v49 = vmin.f32 %v1042_v40, 1.0  ;;  %v1046_v50 = vmax.f32 %v534_v41, 0.0  ;;  %v1047_v51 = vmax.f32 %v535_v42, 0.0  ;;  %v1048_v52 = vmax.f32 %v536_v47, 0.0 }
 0x13b   : > { %2064 = vst [vmem:[%s2607_s16 + $0xba8] sm:$0xff] %v1552_v39  ;;  %v538_v53 = vld [vmem:[%s2586_s3 + $0xbf8] sm:$0xff]  ;;  %v539_v54 = vld [vmem:[%s2586_s3 + $0xc00] sm:$0xff]  ;;  %2065 = vst [vmem:[%s2607_s16 + $0xbb0] sm:$0xff] %v1553_v43  ;;  %v1555_v55 = vmin.f32 %v1043_v44, 1.0  ;;  %v1556_v56 = vmin.f32 %v1044_v45, 1.0 }
 0x13c   : > { %v1557_v57 = vmin.f32 %v1045_v46, 1.0  ;;  %v1049_v58 = vmax.f32 %v537_v48, 0.0  ;;  %v540_v59 = vld [vmem:[%s2586_s3 + $0xc08] sm:$0xff]  ;;  %v541_v60 = vld [vmem:[%s2586_s3 + $0xc10] sm:$0xff]  ;;  %2066 = vst [vmem:[%s2607_s16 + $0xbb8] sm:$0xff] %v1554_v49  ;;  %v1558_v61 = vmin.f32 %v1046_v50, 1.0 }
 0x13d   : > { %v1559_v62 = vmin.f32 %v1047_v51, 1.0  ;;  %v1560_v63 = vmin.f32 %v1048_v52, 1.0  ;;  %v1050_v0 = vmax.f32 %v538_v53, 0.0  ;;  %v542_v1 = vld [vmem:[%s2586_s3 + $0xc18] sm:$0xff]  ;;  %v543_v2 = vld [vmem:[%s2586_s3 + $0xc20] sm:$0xff]  ;;  %2067 = vst [vmem:[%s2607_s16 + $0xbc0] sm:$0xff] %v1555_v55 }
 0x13e   : > { %2068 = vst [vmem:[%s2607_s16 + $0xbc8] sm:$0xff] %v1556_v56  ;;  %2069 = vst [vmem:[%s2607_s16 + $0xbd0] sm:$0xff] %v1557_v57  ;;  %v1561_v3 = vmin.f32 %v1049_v58, 1.0  ;;  %v1051_v4 = vmax.f32 %v539_v54, 0.0  ;;  %v1052_v5 = vmax.f32 %v540_v59, 0.0  ;;  %v1053_v6 = vmax.f32 %v541_v60, 0.0 }
 0x13f   : > { %v544_v7 = vld [vmem:[%s2586_s3 + $0xc28] sm:$0xff]  ;;  %v545_v8 = vld [vmem:[%s2586_s3 + $0xc30] sm:$0xff]  ;;  %2070 = vst [vmem:[%s2607_s16 + $0xbd8] sm:$0xff] %v1558_v61  ;;  %2071 = vst [vmem:[%s2607_s16 + $0xbe0] sm:$0xff] %v1559_v62  ;;  %v1562_v9 = vmin.f32 %v1050_v0, 1.0  ;;  %v1054_v10 = vmax.f32 %v542_v1, 0.0 }
 0x140   : > { %2072 = vst [vmem:[%s2607_s16 + $0xbe8] sm:$0xff] %v1560_v63  ;;  %v1055_v11 = vmax.f32 %v543_v2, 0.0  ;;  %v1056_v12 = vmax.f32 %v544_v7, 0.0  ;;  %v546_v13 = vld [vmem:[%s2586_s3 + $0xc38] sm:$0xff]  ;;  %v547_v14 = vld [vmem:[%s2586_s3 + $0xc40] sm:$0xff]  ;;  %2073 = vst [vmem:[%s2607_s16 + $0xbf0] sm:$0xff] %v1561_v3 }
 0x141   : > { %v1563_v15 = vmin.f32 %v1051_v4, 1.0  ;;  %v1564_v16 = vmin.f32 %v1052_v5, 1.0  ;;  %v1565_v17 = vmin.f32 %v1053_v6, 1.0  ;;  %v1057_v18 = vmax.f32 %v545_v8, 0.0  ;;  %v548_v19 = vld [vmem:[%s2586_s3 + $0xc48] sm:$0xff]  ;;  %v549_v20 = vld [vmem:[%s2586_s3 + $0xc50] sm:$0xff] }
 0x142   : > { %2074 = vst [vmem:[%s2607_s16 + $0xbf8] sm:$0xff] %v1562_v9  ;;  %v1566_v21 = vmin.f32 %v1054_v10, 1.0  ;;  %v1567_v22 = vmin.f32 %v1055_v11, 1.0  ;;  %v1568_v23 = vmin.f32 %v1056_v12, 1.0  ;;  %v1058_v24 = vmax.f32 %v546_v13, 0.0  ;;  %v550_v25 = vld [vmem:[%s2586_s3 + $0xc58] sm:$0xff] }
 0x143   : > { %v551_v26 = vld [vmem:[%s2586_s3 + $0xc60] sm:$0xff]  ;;  %2075 = vst [vmem:[%s2607_s16 + $0xc00] sm:$0xff] %v1563_v15  ;;  %2076 = vst [vmem:[%s2607_s16 + $0xc08] sm:$0xff] %v1564_v16  ;;  %v1569_v27 = vmin.f32 %v1057_v18, 1.0  ;;  %v1059_v28 = vmax.f32 %v547_v14, 0.0  ;;  %v1060_v29 = vmax.f32 %v548_v19, 0.0 }
 0x144   : > { %2077 = vst [vmem:[%s2607_s16 + $0xc10] sm:$0xff] %v1565_v17  ;;  %v1061_v30 = vmax.f32 %v549_v20, 0.0  ;;  %v552_v31 = vld [vmem:[%s2586_s3 + $0xc68] sm:$0xff]  ;;  %v553_v32 = vld [vmem:[%s2586_s3 + $0xc70] sm:$0xff]  ;;  %2078 = vst [vmem:[%s2607_s16 + $0xc18] sm:$0xff] %v1566_v21  ;;  %v1570_v33 = vmin.f32 %v1058_v24, 1.0 }
 0x145   : > { %2079 = vst [vmem:[%s2607_s16 + $0xc20] sm:$0xff] %v1567_v22  ;;  %2080 = vst [vmem:[%s2607_s16 + $0xc28] sm:$0xff] %v1568_v23  ;;  %v1062_v34 = vmax.f32 %v550_v25, 0.0  ;;  %v1063_v35 = vmax.f32 %v551_v26, 0.0  ;;  %v1064_v36 = vmax.f32 %v552_v31, 0.0  ;;  %v554_v37 = vld [vmem:[%s2586_s3 + $0xc78] sm:$0xff] }
 0x146   : > { %v555_v38 = vld [vmem:[%s2586_s3 + $0xc80] sm:$0xff]  ;;  %2081 = vst [vmem:[%s2607_s16 + $0xc30] sm:$0xff] %v1569_v27  ;;  %v1571_v39 = vmin.f32 %v1059_v28, 1.0  ;;  %v1572_v40 = vmin.f32 %v1060_v29, 1.0  ;;  %v1573_v41 = vmin.f32 %v1061_v30, 1.0  ;;  %v1065_v42 = vmax.f32 %v553_v32, 0.0 }
 0x147   : > { %v556_v43 = vld [vmem:[%s2586_s3 + $0xc88] sm:$0xff]  ;;  %v557_v44 = vld [vmem:[%s2586_s3 + $0xc90] sm:$0xff]  ;;  %2082 = vst [vmem:[%s2607_s16 + $0xc38] sm:$0xff] %v1570_v33  ;;  %v1574_v45 = vmin.f32 %v1062_v34, 1.0  ;;  %v1575_v46 = vmin.f32 %v1063_v35, 1.0  ;;  %v1576_v47 = vmin.f32 %v1064_v36, 1.0 }
 0x148   : > { %v1066_v48 = vmax.f32 %v554_v37, 0.0  ;;  %v558_v49 = vld [vmem:[%s2586_s3 + $0xc98] sm:$0xff]  ;;  %v559_v50 = vld [vmem:[%s2586_s3 + $0xca0] sm:$0xff]  ;;  %2083 = vst [vmem:[%s2607_s16 + $0xc40] sm:$0xff] %v1571_v39  ;;  %2084 = vst [vmem:[%s2607_s16 + $0xc48] sm:$0xff] %v1572_v40  ;;  %v1577_v51 = vmin.f32 %v1065_v42, 1.0 }
 0x149   : > { %2085 = vst [vmem:[%s2607_s16 + $0xc50] sm:$0xff] %v1573_v41  ;;  %v1067_v52 = vmax.f32 %v555_v38, 0.0  ;;  %v1068_v53 = vmax.f32 %v556_v43, 0.0  ;;  %v1069_v54 = vmax.f32 %v557_v44, 0.0  ;;  %v560_v55 = vld [vmem:[%s2586_s3 + $0xca8] sm:$0xff]  ;;  %v561_v56 = vld [vmem:[%s2586_s3 + $0xcb0] sm:$0xff] }
 0x14a   : > { %2086 = vst [vmem:[%s2607_s16 + $0xc58] sm:$0xff] %v1574_v45  ;;  %2087 = vst [vmem:[%s2607_s16 + $0xc60] sm:$0xff] %v1575_v46  ;;  %v1578_v57 = vmin.f32 %v1066_v48, 1.0  ;;  %v1070_v58 = vmax.f32 %v558_v49, 0.0  ;;  %v1071_v59 = vmax.f32 %v559_v50, 0.0  ;;  %v1072_v60 = vmax.f32 %v560_v55, 0.0 }
 0x14b   : > { %2088 = vst [vmem:[%s2607_s16 + $0xc68] sm:$0xff] %v1576_v47  ;;  %v562_v61 = vld [vmem:[%s2586_s3 + $0xcb8] sm:$0xff]  ;;  %v563_v62 = vld [vmem:[%s2586_s3 + $0xcc0] sm:$0xff]  ;;  %2089 = vst [vmem:[%s2607_s16 + $0xc70] sm:$0xff] %v1577_v51  ;;  %v1579_v63 = vmin.f32 %v1067_v52, 1.0  ;;  %v1580_v0 = vmin.f32 %v1068_v53, 1.0 }
 0x14c   : > { %v1581_v1 = vmin.f32 %v1069_v54, 1.0  ;;  %v1073_v2 = vmax.f32 %v561_v56, 0.0  ;;  %v564_v3 = vld [vmem:[%s2586_s3 + $0xcc8] sm:$0xff]  ;;  %v565_v4 = vld [vmem:[%s2586_s3 + $0xcd0] sm:$0xff]  ;;  %2090 = vst [vmem:[%s2607_s16 + $0xc78] sm:$0xff] %v1578_v57  ;;  %v1582_v5 = vmin.f32 %v1070_v58, 1.0 }
 0x14d   : > { %v1583_v6 = vmin.f32 %v1071_v59, 1.0  ;;  %v1584_v7 = vmin.f32 %v1072_v60, 1.0  ;;  %v1074_v8 = vmax.f32 %v562_v61, 0.0  ;;  %v566_v9 = vld [vmem:[%s2586_s3 + $0xcd8] sm:$0xff]  ;;  %v567_v10 = vld [vmem:[%s2586_s3 + $0xce0] sm:$0xff]  ;;  %2091 = vst [vmem:[%s2607_s16 + $0xc80] sm:$0xff] %v1579_v63 }
 0x14e   : > { %2092 = vst [vmem:[%s2607_s16 + $0xc88] sm:$0xff] %v1580_v0  ;;  %2093 = vst [vmem:[%s2607_s16 + $0xc90] sm:$0xff] %v1581_v1  ;;  %v1585_v11 = vmin.f32 %v1073_v2, 1.0  ;;  %v1075_v12 = vmax.f32 %v563_v62, 0.0  ;;  %v1076_v13 = vmax.f32 %v564_v3, 0.0  ;;  %v1077_v14 = vmax.f32 %v565_v4, 0.0 }
 0x14f   : > { %v568_v15 = vld [vmem:[%s2586_s3 + $0xce8] sm:$0xff]  ;;  %v569_v16 = vld [vmem:[%s2586_s3 + $0xcf0] sm:$0xff]  ;;  %2094 = vst [vmem:[%s2607_s16 + $0xc98] sm:$0xff] %v1582_v5  ;;  %2095 = vst [vmem:[%s2607_s16 + $0xca0] sm:$0xff] %v1583_v6  ;;  %v1586_v17 = vmin.f32 %v1074_v8, 1.0  ;;  %v1078_v18 = vmax.f32 %v566_v9, 0.0 }
 0x150   : > { %2096 = vst [vmem:[%s2607_s16 + $0xca8] sm:$0xff] %v1584_v7  ;;  %v1079_v19 = vmax.f32 %v567_v10, 0.0  ;;  %v1080_v20 = vmax.f32 %v568_v15, 0.0  ;;  %v570_v21 = vld [vmem:[%s2586_s3 + $0xcf8] sm:$0xff]  ;;  %v571_v22 = vld [vmem:[%s2586_s3 + $0xd00] sm:$0xff]  ;;  %2097 = vst [vmem:[%s2607_s16 + $0xcb0] sm:$0xff] %v1585_v11 }
 0x151   : > { %v1587_v23 = vmin.f32 %v1075_v12, 1.0  ;;  %v1588_v24 = vmin.f32 %v1076_v13, 1.0  ;;  %v1589_v25 = vmin.f32 %v1077_v14, 1.0  ;;  %v1081_v26 = vmax.f32 %v569_v16, 0.0  ;;  %v572_v27 = vld [vmem:[%s2586_s3 + $0xd08] sm:$0xff]  ;;  %v573_v28 = vld [vmem:[%s2586_s3 + $0xd10] sm:$0xff] }
 0x152   : > { %2098 = vst [vmem:[%s2607_s16 + $0xcb8] sm:$0xff] %v1586_v17  ;;  %v1590_v29 = vmin.f32 %v1078_v18, 1.0  ;;  %v1591_v30 = vmin.f32 %v1079_v19, 1.0  ;;  %v1592_v31 = vmin.f32 %v1080_v20, 1.0  ;;  %v1082_v32 = vmax.f32 %v570_v21, 0.0  ;;  %v574_v33 = vld [vmem:[%s2586_s3 + $0xd18] sm:$0xff] }
 0x153   : > { %v575_v34 = vld [vmem:[%s2586_s3 + $0xd20] sm:$0xff]  ;;  %2099 = vst [vmem:[%s2607_s16 + $0xcc0] sm:$0xff] %v1587_v23  ;;  %2100 = vst [vmem:[%s2607_s16 + $0xcc8] sm:$0xff] %v1588_v24  ;;  %v1593_v35 = vmin.f32 %v1081_v26, 1.0  ;;  %v1083_v36 = vmax.f32 %v571_v22, 0.0  ;;  %v1084_v37 = vmax.f32 %v572_v27, 0.0 }
 0x154   : > { %2101 = vst [vmem:[%s2607_s16 + $0xcd0] sm:$0xff] %v1589_v25  ;;  %v1085_v38 = vmax.f32 %v573_v28, 0.0  ;;  %v576_v39 = vld [vmem:[%s2586_s3 + $0xd28] sm:$0xff]  ;;  %v577_v40 = vld [vmem:[%s2586_s3 + $0xd30] sm:$0xff]  ;;  %2102 = vst [vmem:[%s2607_s16 + $0xcd8] sm:$0xff] %v1590_v29  ;;  %v1594_v41 = vmin.f32 %v1082_v32, 1.0 }
 0x155   : > { %2103 = vst [vmem:[%s2607_s16 + $0xce0] sm:$0xff] %v1591_v30  ;;  %2104 = vst [vmem:[%s2607_s16 + $0xce8] sm:$0xff] %v1592_v31  ;;  %v1086_v42 = vmax.f32 %v574_v33, 0.0  ;;  %v1087_v43 = vmax.f32 %v575_v34, 0.0  ;;  %v1088_v44 = vmax.f32 %v576_v39, 0.0  ;;  %v578_v45 = vld [vmem:[%s2586_s3 + $0xd38] sm:$0xff] }
 0x156   : > { %v579_v46 = vld [vmem:[%s2586_s3 + $0xd40] sm:$0xff]  ;;  %2105 = vst [vmem:[%s2607_s16 + $0xcf0] sm:$0xff] %v1593_v35  ;;  %v1595_v47 = vmin.f32 %v1083_v36, 1.0  ;;  %v1596_v48 = vmin.f32 %v1084_v37, 1.0  ;;  %v1597_v49 = vmin.f32 %v1085_v38, 1.0  ;;  %v1089_v50 = vmax.f32 %v577_v40, 0.0 }
 0x157   : > { %v580_v51 = vld [vmem:[%s2586_s3 + $0xd48] sm:$0xff]  ;;  %v581_v52 = vld [vmem:[%s2586_s3 + $0xd50] sm:$0xff]  ;;  %2106 = vst [vmem:[%s2607_s16 + $0xcf8] sm:$0xff] %v1594_v41  ;;  %v1598_v53 = vmin.f32 %v1086_v42, 1.0  ;;  %v1599_v54 = vmin.f32 %v1087_v43, 1.0  ;;  %v1600_v55 = vmin.f32 %v1088_v44, 1.0 }
 0x158   : > { %v1090_v56 = vmax.f32 %v578_v45, 0.0  ;;  %v582_v57 = vld [vmem:[%s2586_s3 + $0xd58] sm:$0xff]  ;;  %v583_v58 = vld [vmem:[%s2586_s3 + $0xd60] sm:$0xff]  ;;  %2107 = vst [vmem:[%s2607_s16 + $0xd00] sm:$0xff] %v1595_v47  ;;  %2108 = vst [vmem:[%s2607_s16 + $0xd08] sm:$0xff] %v1596_v48  ;;  %v1601_v59 = vmin.f32 %v1089_v50, 1.0 }
 0x159   : > { %2109 = vst [vmem:[%s2607_s16 + $0xd10] sm:$0xff] %v1597_v49  ;;  %v1091_v60 = vmax.f32 %v579_v46, 0.0  ;;  %v1092_v61 = vmax.f32 %v580_v51, 0.0  ;;  %v1093_v62 = vmax.f32 %v581_v52, 0.0  ;;  %v584_v63 = vld [vmem:[%s2586_s3 + $0xd68] sm:$0xff]  ;;  %v585_v0 = vld [vmem:[%s2586_s3 + $0xd70] sm:$0xff] }
 0x15a   : > { %2110 = vst [vmem:[%s2607_s16 + $0xd18] sm:$0xff] %v1598_v53  ;;  %2111 = vst [vmem:[%s2607_s16 + $0xd20] sm:$0xff] %v1599_v54  ;;  %v1602_v1 = vmin.f32 %v1090_v56, 1.0  ;;  %v1094_v2 = vmax.f32 %v582_v57, 0.0  ;;  %v1095_v3 = vmax.f32 %v583_v58, 0.0  ;;  %v1096_v4 = vmax.f32 %v584_v63, 0.0 }
 0x15b   : > { %2112 = vst [vmem:[%s2607_s16 + $0xd28] sm:$0xff] %v1600_v55  ;;  %v586_v5 = vld [vmem:[%s2586_s3 + $0xd78] sm:$0xff]  ;;  %v587_v6 = vld [vmem:[%s2586_s3 + $0xd80] sm:$0xff]  ;;  %2113 = vst [vmem:[%s2607_s16 + $0xd30] sm:$0xff] %v1601_v59  ;;  %v1603_v7 = vmin.f32 %v1091_v60, 1.0  ;;  %v1604_v8 = vmin.f32 %v1092_v61, 1.0 }
 0x15c   : > { %v1605_v9 = vmin.f32 %v1093_v62, 1.0  ;;  %v1097_v10 = vmax.f32 %v585_v0, 0.0  ;;  %v588_v11 = vld [vmem:[%s2586_s3 + $0xd88] sm:$0xff]  ;;  %v589_v12 = vld [vmem:[%s2586_s3 + $0xd90] sm:$0xff]  ;;  %2114 = vst [vmem:[%s2607_s16 + $0xd38] sm:$0xff] %v1602_v1  ;;  %v1606_v13 = vmin.f32 %v1094_v2, 1.0 }
 0x15d   : > { %v1607_v14 = vmin.f32 %v1095_v3, 1.0  ;;  %v1608_v15 = vmin.f32 %v1096_v4, 1.0  ;;  %v1098_v16 = vmax.f32 %v586_v5, 0.0  ;;  %v590_v17 = vld [vmem:[%s2586_s3 + $0xd98] sm:$0xff]  ;;  %v591_v18 = vld [vmem:[%s2586_s3 + $0xda0] sm:$0xff]  ;;  %2115 = vst [vmem:[%s2607_s16 + $0xd40] sm:$0xff] %v1603_v7 }
 0x15e   : > { %2116 = vst [vmem:[%s2607_s16 + $0xd48] sm:$0xff] %v1604_v8  ;;  %2117 = vst [vmem:[%s2607_s16 + $0xd50] sm:$0xff] %v1605_v9  ;;  %v1609_v19 = vmin.f32 %v1097_v10, 1.0  ;;  %v1099_v20 = vmax.f32 %v587_v6, 0.0  ;;  %v1100_v21 = vmax.f32 %v588_v11, 0.0  ;;  %v1101_v22 = vmax.f32 %v589_v12, 0.0 }
 0x15f   : > { %v592_v23 = vld [vmem:[%s2586_s3 + $0xda8] sm:$0xff]  ;;  %v593_v24 = vld [vmem:[%s2586_s3 + $0xdb0] sm:$0xff]  ;;  %2118 = vst [vmem:[%s2607_s16 + $0xd58] sm:$0xff] %v1606_v13  ;;  %2119 = vst [vmem:[%s2607_s16 + $0xd60] sm:$0xff] %v1607_v14  ;;  %v1610_v25 = vmin.f32 %v1098_v16, 1.0  ;;  %v1102_v26 = vmax.f32 %v590_v17, 0.0 }
 0x160   : > { %2120 = vst [vmem:[%s2607_s16 + $0xd68] sm:$0xff] %v1608_v15  ;;  %v1103_v27 = vmax.f32 %v591_v18, 0.0  ;;  %v1104_v28 = vmax.f32 %v592_v23, 0.0  ;;  %v594_v29 = vld [vmem:[%s2586_s3 + $0xdb8] sm:$0xff]  ;;  %v595_v30 = vld [vmem:[%s2586_s3 + $0xdc0] sm:$0xff]  ;;  %2121 = vst [vmem:[%s2607_s16 + $0xd70] sm:$0xff] %v1609_v19 }
 0x161   : > { %v1611_v31 = vmin.f32 %v1099_v20, 1.0  ;;  %v1612_v32 = vmin.f32 %v1100_v21, 1.0  ;;  %v1613_v33 = vmin.f32 %v1101_v22, 1.0  ;;  %v1105_v34 = vmax.f32 %v593_v24, 0.0  ;;  %v596_v35 = vld [vmem:[%s2586_s3 + $0xdc8] sm:$0xff]  ;;  %v597_v36 = vld [vmem:[%s2586_s3 + $0xdd0] sm:$0xff] }
 0x162   : > { %2122 = vst [vmem:[%s2607_s16 + $0xd78] sm:$0xff] %v1610_v25  ;;  %v1614_v37 = vmin.f32 %v1102_v26, 1.0  ;;  %v1615_v38 = vmin.f32 %v1103_v27, 1.0  ;;  %v1616_v39 = vmin.f32 %v1104_v28, 1.0  ;;  %v1106_v40 = vmax.f32 %v594_v29, 0.0  ;;  %v598_v41 = vld [vmem:[%s2586_s3 + $0xdd8] sm:$0xff] }
 0x163   : > { %v599_v42 = vld [vmem:[%s2586_s3 + $0xde0] sm:$0xff]  ;;  %2123 = vst [vmem:[%s2607_s16 + $0xd80] sm:$0xff] %v1611_v31  ;;  %2124 = vst [vmem:[%s2607_s16 + $0xd88] sm:$0xff] %v1612_v32  ;;  %v1617_v43 = vmin.f32 %v1105_v34, 1.0  ;;  %v1107_v44 = vmax.f32 %v595_v30, 0.0  ;;  %v1108_v45 = vmax.f32 %v596_v35, 0.0 }
 0x164   : > { %2125 = vst [vmem:[%s2607_s16 + $0xd90] sm:$0xff] %v1613_v33  ;;  %v1109_v46 = vmax.f32 %v597_v36, 0.0  ;;  %v600_v47 = vld [vmem:[%s2586_s3 + $0xde8] sm:$0xff]  ;;  %v601_v48 = vld [vmem:[%s2586_s3 + $0xdf0] sm:$0xff]  ;;  %2126 = vst [vmem:[%s2607_s16 + $0xd98] sm:$0xff] %v1614_v37  ;;  %v1618_v49 = vmin.f32 %v1106_v40, 1.0 }
 0x165   : > { %2127 = vst [vmem:[%s2607_s16 + $0xda0] sm:$0xff] %v1615_v38  ;;  %2128 = vst [vmem:[%s2607_s16 + $0xda8] sm:$0xff] %v1616_v39  ;;  %v1110_v50 = vmax.f32 %v598_v41, 0.0  ;;  %v1111_v51 = vmax.f32 %v599_v42, 0.0  ;;  %v1112_v52 = vmax.f32 %v600_v47, 0.0  ;;  %v602_v53 = vld [vmem:[%s2586_s3 + $0xdf8] sm:$0xff] }
 0x166   : > { %v603_v54 = vld [vmem:[%s2586_s3 + $0xe00] sm:$0xff]  ;;  %2129 = vst [vmem:[%s2607_s16 + $0xdb0] sm:$0xff] %v1617_v43  ;;  %v1619_v55 = vmin.f32 %v1107_v44, 1.0  ;;  %v1620_v56 = vmin.f32 %v1108_v45, 1.0  ;;  %v1621_v57 = vmin.f32 %v1109_v46, 1.0  ;;  %v1113_v58 = vmax.f32 %v601_v48, 0.0 }
 0x167   : > { %v604_v59 = vld [vmem:[%s2586_s3 + $0xe08] sm:$0xff]  ;;  %v605_v60 = vld [vmem:[%s2586_s3 + $0xe10] sm:$0xff]  ;;  %2130 = vst [vmem:[%s2607_s16 + $0xdb8] sm:$0xff] %v1618_v49  ;;  %v1622_v61 = vmin.f32 %v1110_v50, 1.0  ;;  %v1623_v62 = vmin.f32 %v1111_v51, 1.0  ;;  %v1624_v63 = vmin.f32 %v1112_v52, 1.0 }
 0x168   : > { %v1114_v0 = vmax.f32 %v602_v53, 0.0  ;;  %v606_v1 = vld [vmem:[%s2586_s3 + $0xe18] sm:$0xff]  ;;  %v607_v2 = vld [vmem:[%s2586_s3 + $0xe20] sm:$0xff]  ;;  %2131 = vst [vmem:[%s2607_s16 + $0xdc0] sm:$0xff] %v1619_v55  ;;  %2132 = vst [vmem:[%s2607_s16 + $0xdc8] sm:$0xff] %v1620_v56  ;;  %v1625_v3 = vmin.f32 %v1113_v58, 1.0 }
 0x169   : > { %2133 = vst [vmem:[%s2607_s16 + $0xdd0] sm:$0xff] %v1621_v57  ;;  %v1115_v4 = vmax.f32 %v603_v54, 0.0  ;;  %v1116_v5 = vmax.f32 %v604_v59, 0.0  ;;  %v1117_v6 = vmax.f32 %v605_v60, 0.0  ;;  %v608_v7 = vld [vmem:[%s2586_s3 + $0xe28] sm:$0xff]  ;;  %v609_v8 = vld [vmem:[%s2586_s3 + $0xe30] sm:$0xff] }
 0x16a   : > { %2134 = vst [vmem:[%s2607_s16 + $0xdd8] sm:$0xff] %v1622_v61  ;;  %2135 = vst [vmem:[%s2607_s16 + $0xde0] sm:$0xff] %v1623_v62  ;;  %v1626_v9 = vmin.f32 %v1114_v0, 1.0  ;;  %v1118_v10 = vmax.f32 %v606_v1, 0.0  ;;  %v1119_v11 = vmax.f32 %v607_v2, 0.0  ;;  %v1120_v12 = vmax.f32 %v608_v7, 0.0 }
 0x16b   : > { %2136 = vst [vmem:[%s2607_s16 + $0xde8] sm:$0xff] %v1624_v63  ;;  %v610_v13 = vld [vmem:[%s2586_s3 + $0xe38] sm:$0xff]  ;;  %v611_v14 = vld [vmem:[%s2586_s3 + $0xe40] sm:$0xff]  ;;  %2137 = vst [vmem:[%s2607_s16 + $0xdf0] sm:$0xff] %v1625_v3  ;;  %v1627_v15 = vmin.f32 %v1115_v4, 1.0  ;;  %v1628_v16 = vmin.f32 %v1116_v5, 1.0 }
 0x16c   : > { %v1629_v17 = vmin.f32 %v1117_v6, 1.0  ;;  %v1121_v18 = vmax.f32 %v609_v8, 0.0  ;;  %v612_v19 = vld [vmem:[%s2586_s3 + $0xe48] sm:$0xff]  ;;  %v613_v20 = vld [vmem:[%s2586_s3 + $0xe50] sm:$0xff]  ;;  %2138 = vst [vmem:[%s2607_s16 + $0xdf8] sm:$0xff] %v1626_v9  ;;  %v1630_v21 = vmin.f32 %v1118_v10, 1.0 }
 0x16d   : > { %v1631_v22 = vmin.f32 %v1119_v11, 1.0  ;;  %v1632_v23 = vmin.f32 %v1120_v12, 1.0  ;;  %v1122_v24 = vmax.f32 %v610_v13, 0.0  ;;  %v614_v25 = vld [vmem:[%s2586_s3 + $0xe58] sm:$0xff]  ;;  %v615_v26 = vld [vmem:[%s2586_s3 + $0xe60] sm:$0xff]  ;;  %2139 = vst [vmem:[%s2607_s16 + $0xe00] sm:$0xff] %v1627_v15 }
 0x16e   : > { %2140 = vst [vmem:[%s2607_s16 + $0xe08] sm:$0xff] %v1628_v16  ;;  %2141 = vst [vmem:[%s2607_s16 + $0xe10] sm:$0xff] %v1629_v17  ;;  %v1633_v27 = vmin.f32 %v1121_v18, 1.0  ;;  %v1123_v28 = vmax.f32 %v611_v14, 0.0  ;;  %v1124_v29 = vmax.f32 %v612_v19, 0.0  ;;  %v1125_v30 = vmax.f32 %v613_v20, 0.0 }
 0x16f   : > { %v616_v31 = vld [vmem:[%s2586_s3 + $0xe68] sm:$0xff]  ;;  %v617_v32 = vld [vmem:[%s2586_s3 + $0xe70] sm:$0xff]  ;;  %2142 = vst [vmem:[%s2607_s16 + $0xe18] sm:$0xff] %v1630_v21  ;;  %2143 = vst [vmem:[%s2607_s16 + $0xe20] sm:$0xff] %v1631_v22  ;;  %v1634_v33 = vmin.f32 %v1122_v24, 1.0  ;;  %v1126_v34 = vmax.f32 %v614_v25, 0.0 }
 0x170   : > { %2144 = vst [vmem:[%s2607_s16 + $0xe28] sm:$0xff] %v1632_v23  ;;  %v1127_v35 = vmax.f32 %v615_v26, 0.0  ;;  %v1128_v36 = vmax.f32 %v616_v31, 0.0  ;;  %v618_v37 = vld [vmem:[%s2586_s3 + $0xe78] sm:$0xff]  ;;  %v619_v38 = vld [vmem:[%s2586_s3 + $0xe80] sm:$0xff]  ;;  %2145 = vst [vmem:[%s2607_s16 + $0xe30] sm:$0xff] %v1633_v27 }
 0x171   : > { %v1635_v39 = vmin.f32 %v1123_v28, 1.0  ;;  %v1636_v40 = vmin.f32 %v1124_v29, 1.0  ;;  %v1637_v41 = vmin.f32 %v1125_v30, 1.0  ;;  %v1129_v42 = vmax.f32 %v617_v32, 0.0  ;;  %v620_v43 = vld [vmem:[%s2586_s3 + $0xe88] sm:$0xff]  ;;  %v621_v44 = vld [vmem:[%s2586_s3 + $0xe90] sm:$0xff] }
 0x172   : > { %2146 = vst [vmem:[%s2607_s16 + $0xe38] sm:$0xff] %v1634_v33  ;;  %v1638_v45 = vmin.f32 %v1126_v34, 1.0  ;;  %v1639_v46 = vmin.f32 %v1127_v35, 1.0  ;;  %v1640_v47 = vmin.f32 %v1128_v36, 1.0  ;;  %v1130_v48 = vmax.f32 %v618_v37, 0.0  ;;  %v622_v49 = vld [vmem:[%s2586_s3 + $0xe98] sm:$0xff] }
 0x173   : > { %v623_v50 = vld [vmem:[%s2586_s3 + $0xea0] sm:$0xff]  ;;  %2147 = vst [vmem:[%s2607_s16 + $0xe40] sm:$0xff] %v1635_v39  ;;  %2148 = vst [vmem:[%s2607_s16 + $0xe48] sm:$0xff] %v1636_v40  ;;  %v1641_v51 = vmin.f32 %v1129_v42, 1.0  ;;  %v1131_v52 = vmax.f32 %v619_v38, 0.0  ;;  %v1132_v53 = vmax.f32 %v620_v43, 0.0 }
 0x174   : > { %2149 = vst [vmem:[%s2607_s16 + $0xe50] sm:$0xff] %v1637_v41  ;;  %v1133_v54 = vmax.f32 %v621_v44, 0.0  ;;  %v624_v55 = vld [vmem:[%s2586_s3 + $0xea8] sm:$0xff]  ;;  %v625_v56 = vld [vmem:[%s2586_s3 + $0xeb0] sm:$0xff]  ;;  %2150 = vst [vmem:[%s2607_s16 + $0xe58] sm:$0xff] %v1638_v45  ;;  %v1642_v57 = vmin.f32 %v1130_v48, 1.0 }
 0x175   : > { %2151 = vst [vmem:[%s2607_s16 + $0xe60] sm:$0xff] %v1639_v46  ;;  %2152 = vst [vmem:[%s2607_s16 + $0xe68] sm:$0xff] %v1640_v47  ;;  %v1134_v58 = vmax.f32 %v622_v49, 0.0  ;;  %v1135_v59 = vmax.f32 %v623_v50, 0.0  ;;  %v1136_v60 = vmax.f32 %v624_v55, 0.0  ;;  %v626_v61 = vld [vmem:[%s2586_s3 + $0xeb8] sm:$0xff] }
 0x176   : > { %v627_v62 = vld [vmem:[%s2586_s3 + $0xec0] sm:$0xff]  ;;  %2153 = vst [vmem:[%s2607_s16 + $0xe70] sm:$0xff] %v1641_v51  ;;  %v1643_v63 = vmin.f32 %v1131_v52, 1.0  ;;  %v1644_v0 = vmin.f32 %v1132_v53, 1.0  ;;  %v1645_v1 = vmin.f32 %v1133_v54, 1.0  ;;  %v1137_v2 = vmax.f32 %v625_v56, 0.0 }
 0x177   : > { %v628_v3 = vld [vmem:[%s2586_s3 + $0xec8] sm:$0xff]  ;;  %v629_v4 = vld [vmem:[%s2586_s3 + $0xed0] sm:$0xff]  ;;  %2154 = vst [vmem:[%s2607_s16 + $0xe78] sm:$0xff] %v1642_v57  ;;  %v1646_v5 = vmin.f32 %v1134_v58, 1.0  ;;  %v1647_v6 = vmin.f32 %v1135_v59, 1.0  ;;  %v1648_v7 = vmin.f32 %v1136_v60, 1.0 }
 0x178   : > { %v1138_v8 = vmax.f32 %v626_v61, 0.0  ;;  %v630_v9 = vld [vmem:[%s2586_s3 + $0xed8] sm:$0xff]  ;;  %v631_v10 = vld [vmem:[%s2586_s3 + $0xee0] sm:$0xff]  ;;  %2155 = vst [vmem:[%s2607_s16 + $0xe80] sm:$0xff] %v1643_v63  ;;  %2156 = vst [vmem:[%s2607_s16 + $0xe88] sm:$0xff] %v1644_v0  ;;  %v1649_v11 = vmin.f32 %v1137_v2, 1.0 }
 0x179   : > { %2157 = vst [vmem:[%s2607_s16 + $0xe90] sm:$0xff] %v1645_v1  ;;  %v1139_v12 = vmax.f32 %v627_v62, 0.0  ;;  %v1140_v13 = vmax.f32 %v628_v3, 0.0  ;;  %v1141_v14 = vmax.f32 %v629_v4, 0.0  ;;  %v632_v15 = vld [vmem:[%s2586_s3 + $0xee8] sm:$0xff]  ;;  %v633_v16 = vld [vmem:[%s2586_s3 + $0xef0] sm:$0xff] }
 0x17a   : > { %2158 = vst [vmem:[%s2607_s16 + $0xe98] sm:$0xff] %v1646_v5  ;;  %2159 = vst [vmem:[%s2607_s16 + $0xea0] sm:$0xff] %v1647_v6  ;;  %v1650_v17 = vmin.f32 %v1138_v8, 1.0  ;;  %v1142_v18 = vmax.f32 %v630_v9, 0.0  ;;  %v1143_v19 = vmax.f32 %v631_v10, 0.0  ;;  %v1144_v20 = vmax.f32 %v632_v15, 0.0 }
 0x17b   : > { %2160 = vst [vmem:[%s2607_s16 + $0xea8] sm:$0xff] %v1648_v7  ;;  %v634_v21 = vld [vmem:[%s2586_s3 + $0xef8] sm:$0xff]  ;;  %v635_v22 = vld [vmem:[%s2586_s3 + $0xf00] sm:$0xff]  ;;  %2161 = vst [vmem:[%s2607_s16 + $0xeb0] sm:$0xff] %v1649_v11  ;;  %v1651_v23 = vmin.f32 %v1139_v12, 1.0  ;;  %v1652_v24 = vmin.f32 %v1140_v13, 1.0 }
 0x17c   : > { %v1653_v25 = vmin.f32 %v1141_v14, 1.0  ;;  %v1145_v26 = vmax.f32 %v633_v16, 0.0  ;;  %v636_v27 = vld [vmem:[%s2586_s3 + $0xf08] sm:$0xff]  ;;  %v637_v28 = vld [vmem:[%s2586_s3 + $0xf10] sm:$0xff]  ;;  %2162 = vst [vmem:[%s2607_s16 + $0xeb8] sm:$0xff] %v1650_v17  ;;  %v1654_v29 = vmin.f32 %v1142_v18, 1.0 }
 0x17d   : > { %v1655_v30 = vmin.f32 %v1143_v19, 1.0  ;;  %v1656_v31 = vmin.f32 %v1144_v20, 1.0  ;;  %v1146_v32 = vmax.f32 %v634_v21, 0.0  ;;  %v638_v33 = vld [vmem:[%s2586_s3 + $0xf18] sm:$0xff]  ;;  %v639_v34 = vld [vmem:[%s2586_s3 + $0xf20] sm:$0xff]  ;;  %2163 = vst [vmem:[%s2607_s16 + $0xec0] sm:$0xff] %v1651_v23 }
 0x17e   : > { %2164 = vst [vmem:[%s2607_s16 + $0xec8] sm:$0xff] %v1652_v24  ;;  %2165 = vst [vmem:[%s2607_s16 + $0xed0] sm:$0xff] %v1653_v25  ;;  %v1657_v35 = vmin.f32 %v1145_v26, 1.0  ;;  %v1147_v36 = vmax.f32 %v635_v22, 0.0  ;;  %v1148_v37 = vmax.f32 %v636_v27, 0.0  ;;  %v1149_v38 = vmax.f32 %v637_v28, 0.0 }
 0x17f   : > { %v640_v39 = vld [vmem:[%s2586_s3 + $0xf28] sm:$0xff]  ;;  %v641_v40 = vld [vmem:[%s2586_s3 + $0xf30] sm:$0xff]  ;;  %2166 = vst [vmem:[%s2607_s16 + $0xed8] sm:$0xff] %v1654_v29  ;;  %2167 = vst [vmem:[%s2607_s16 + $0xee0] sm:$0xff] %v1655_v30  ;;  %v1658_v41 = vmin.f32 %v1146_v32, 1.0  ;;  %v1150_v42 = vmax.f32 %v638_v33, 0.0 }
 0x180   : > { %2168 = vst [vmem:[%s2607_s16 + $0xee8] sm:$0xff] %v1656_v31  ;;  %v1151_v43 = vmax.f32 %v639_v34, 0.0  ;;  %v1152_v44 = vmax.f32 %v640_v39, 0.0  ;;  %v642_v45 = vld [vmem:[%s2586_s3 + $0xf38] sm:$0xff]  ;;  %v643_v46 = vld [vmem:[%s2586_s3 + $0xf40] sm:$0xff]  ;;  %2169 = vst [vmem:[%s2607_s16 + $0xef0] sm:$0xff] %v1657_v35 }
 0x181   : > { %v1659_v47 = vmin.f32 %v1147_v36, 1.0  ;;  %v1660_v48 = vmin.f32 %v1148_v37, 1.0  ;;  %v1661_v49 = vmin.f32 %v1149_v38, 1.0  ;;  %v1153_v50 = vmax.f32 %v641_v40, 0.0  ;;  %v644_v51 = vld [vmem:[%s2586_s3 + $0xf48] sm:$0xff]  ;;  %v645_v52 = vld [vmem:[%s2586_s3 + $0xf50] sm:$0xff] }
 0x182   : > { %2170 = vst [vmem:[%s2607_s16 + $0xef8] sm:$0xff] %v1658_v41  ;;  %v1662_v53 = vmin.f32 %v1150_v42, 1.0  ;;  %v1663_v54 = vmin.f32 %v1151_v43, 1.0  ;;  %v1664_v55 = vmin.f32 %v1152_v44, 1.0  ;;  %v1154_v56 = vmax.f32 %v642_v45, 0.0  ;;  %v646_v57 = vld [vmem:[%s2586_s3 + $0xf58] sm:$0xff] }
 0x183   : > { %v647_v58 = vld [vmem:[%s2586_s3 + $0xf60] sm:$0xff]  ;;  %2171 = vst [vmem:[%s2607_s16 + $0xf00] sm:$0xff] %v1659_v47  ;;  %2172 = vst [vmem:[%s2607_s16 + $0xf08] sm:$0xff] %v1660_v48  ;;  %v1665_v59 = vmin.f32 %v1153_v50, 1.0  ;;  %v1155_v60 = vmax.f32 %v643_v46, 0.0  ;;  %v1156_v61 = vmax.f32 %v644_v51, 0.0 }
 0x184   : > { %2173 = vst [vmem:[%s2607_s16 + $0xf10] sm:$0xff] %v1661_v49  ;;  %v1157_v62 = vmax.f32 %v645_v52, 0.0  ;;  %v648_v63 = vld [vmem:[%s2586_s3 + $0xf68] sm:$0xff]  ;;  %v649_v0 = vld [vmem:[%s2586_s3 + $0xf70] sm:$0xff]  ;;  %2174 = vst [vmem:[%s2607_s16 + $0xf18] sm:$0xff] %v1662_v53  ;;  %v1666_v1 = vmin.f32 %v1154_v56, 1.0 }
 0x185   : > { %2175 = vst [vmem:[%s2607_s16 + $0xf20] sm:$0xff] %v1663_v54  ;;  %2176 = vst [vmem:[%s2607_s16 + $0xf28] sm:$0xff] %v1664_v55  ;;  %v1158_v2 = vmax.f32 %v646_v57, 0.0  ;;  %v1159_v3 = vmax.f32 %v647_v58, 0.0  ;;  %v1160_v4 = vmax.f32 %v648_v63, 0.0  ;;  %v650_v5 = vld [vmem:[%s2586_s3 + $0xf78] sm:$0xff] }
 0x186   : > { %v651_v6 = vld [vmem:[%s2586_s3 + $0xf80] sm:$0xff]  ;;  %2177 = vst [vmem:[%s2607_s16 + $0xf30] sm:$0xff] %v1665_v59  ;;  %v1667_v7 = vmin.f32 %v1155_v60, 1.0  ;;  %v1668_v8 = vmin.f32 %v1156_v61, 1.0  ;;  %v1669_v9 = vmin.f32 %v1157_v62, 1.0  ;;  %v1161_v10 = vmax.f32 %v649_v0, 0.0 }
 0x187   : > { %v652_v11 = vld [vmem:[%s2586_s3 + $0xf88] sm:$0xff]  ;;  %v653_v12 = vld [vmem:[%s2586_s3 + $0xf90] sm:$0xff]  ;;  %2178 = vst [vmem:[%s2607_s16 + $0xf38] sm:$0xff] %v1666_v1  ;;  %v1670_v13 = vmin.f32 %v1158_v2, 1.0  ;;  %v1671_v14 = vmin.f32 %v1159_v3, 1.0  ;;  %v1672_v15 = vmin.f32 %v1160_v4, 1.0 }
 0x188   : > { %v1162_v16 = vmax.f32 %v650_v5, 0.0  ;;  %v654_v17 = vld [vmem:[%s2586_s3 + $0xf98] sm:$0xff]  ;;  %v655_v18 = vld [vmem:[%s2586_s3 + $0xfa0] sm:$0xff]  ;;  %2179 = vst [vmem:[%s2607_s16 + $0xf40] sm:$0xff] %v1667_v7  ;;  %2180 = vst [vmem:[%s2607_s16 + $0xf48] sm:$0xff] %v1668_v8  ;;  %v1673_v19 = vmin.f32 %v1161_v10, 1.0 }
 0x189   : > { %2181 = vst [vmem:[%s2607_s16 + $0xf50] sm:$0xff] %v1669_v9  ;;  %v1163_v20 = vmax.f32 %v651_v6, 0.0  ;;  %v1164_v21 = vmax.f32 %v652_v11, 0.0  ;;  %v1165_v22 = vmax.f32 %v653_v12, 0.0  ;;  %v656_v23 = vld [vmem:[%s2586_s3 + $0xfa8] sm:$0xff]  ;;  %v657_v24 = vld [vmem:[%s2586_s3 + $0xfb0] sm:$0xff] }
 0x18a   : > { %2182 = vst [vmem:[%s2607_s16 + $0xf58] sm:$0xff] %v1670_v13  ;;  %2183 = vst [vmem:[%s2607_s16 + $0xf60] sm:$0xff] %v1671_v14  ;;  %v1674_v25 = vmin.f32 %v1162_v16, 1.0  ;;  %v1166_v26 = vmax.f32 %v654_v17, 0.0  ;;  %v1167_v27 = vmax.f32 %v655_v18, 0.0  ;;  %v1168_v28 = vmax.f32 %v656_v23, 0.0 }
 0x18b   : > { %2184 = vst [vmem:[%s2607_s16 + $0xf68] sm:$0xff] %v1672_v15  ;;  %v658_v29 = vld [vmem:[%s2586_s3 + $0xfb8] sm:$0xff]  ;;  %v659_v30 = vld [vmem:[%s2586_s3 + $0xfc0] sm:$0xff]  ;;  %2185 = vst [vmem:[%s2607_s16 + $0xf70] sm:$0xff] %v1673_v19  ;;  %v1675_v31 = vmin.f32 %v1163_v20, 1.0  ;;  %v1676_v32 = vmin.f32 %v1164_v21, 1.0 }
 0x18c   : > { %v1677_v33 = vmin.f32 %v1165_v22, 1.0  ;;  %v1169_v34 = vmax.f32 %v657_v24, 0.0  ;;  %v660_v35 = vld [vmem:[%s2586_s3 + $0xfc8] sm:$0xff]  ;;  %v661_v36 = vld [vmem:[%s2586_s3 + $0xfd0] sm:$0xff]  ;;  %2186 = vst [vmem:[%s2607_s16 + $0xf78] sm:$0xff] %v1674_v25  ;;  %v1678_v37 = vmin.f32 %v1166_v26, 1.0 }
 0x18d   : > { %v1679_v38 = vmin.f32 %v1167_v27, 1.0  ;;  %v1680_v39 = vmin.f32 %v1168_v28, 1.0  ;;  %v1170_v40 = vmax.f32 %v658_v29, 0.0  ;;  %v662_v41 = vld [vmem:[%s2586_s3 + $0xfd8] sm:$0xff]  ;;  %v663_v42 = vld [vmem:[%s2586_s3 + $0xfe0] sm:$0xff]  ;;  %2187 = vst [vmem:[%s2607_s16 + $0xf80] sm:$0xff] %v1675_v31 }
 0x18e   : > { %2188 = vst [vmem:[%s2607_s16 + $0xf88] sm:$0xff] %v1676_v32  ;;  %2189 = vst [vmem:[%s2607_s16 + $0xf90] sm:$0xff] %v1677_v33  ;;  %v1681_v43 = vmin.f32 %v1169_v34, 1.0  ;;  %v1171_v44 = vmax.f32 %v659_v30, 0.0  ;;  %v1172_v45 = vmax.f32 %v660_v35, 0.0  ;;  %v1173_v46 = vmax.f32 %v661_v36, 0.0 }
 0x18f   : > { %v664_v47 = vld [vmem:[%s2586_s3 + $0xfe8] sm:$0xff]  ;;  %v665_v48 = vld [vmem:[%s2586_s3 + $0xff0] sm:$0xff]  ;;  %2190 = vst [vmem:[%s2607_s16 + $0xf98] sm:$0xff] %v1678_v37  ;;  %2191 = vst [vmem:[%s2607_s16 + $0xfa0] sm:$0xff] %v1679_v38  ;;  %v1682_v49 = vmin.f32 %v1170_v40, 1.0  ;;  %v1174_v50 = vmax.f32 %v662_v41, 0.0 }
 0x190   : > { %2192 = vst [vmem:[%s2607_s16 + $0xfa8] sm:$0xff] %v1680_v39  ;;  %v1175_v51 = vmax.f32 %v663_v42, 0.0  ;;  %v1176_v52 = vmax.f32 %v664_v47, 0.0  ;;  %v666_v53 = vld [vmem:[%s2586_s3 + $0xff8] sm:$0xff]  ;;  %2193 = vst [vmem:[%s2607_s16 + $0xfb0] sm:$0xff] %v1681_v43  ;;  %v1683_v54 = vmin.f32 %v1171_v44, 1.0 }
 0x191   : > { %v1684_v55 = vmin.f32 %v1172_v45, 1.0  ;;  %v1685_v56 = vmin.f32 %v1173_v46, 1.0  ;;  %v1177_v57 = vmax.f32 %v665_v48, 0.0  ;;  %2194 = vst [vmem:[%s2607_s16 + $0xfb8] sm:$0xff] %v1682_v49  ;;  %v1686_v58 = vmin.f32 %v1174_v50, 1.0  ;;  %s2212_s30 = ssub.s32 (%p2525_p9), 83, %s2314_s25 }
 0x192   : > { %v1687_v59 = vmin.f32 %v1175_v51, 1.0  ;;  %v1688_v60 = vmin.f32 %v1176_v52, 1.0  ;;  %v1178_v61 = vmax.f32 %v666_v53, 0.0  ;;  %2195 = vst [vmem:[%s2607_s16 + $0xfc0] sm:$0xff] %v1683_v54  ;;  %2210 = sbr.rel (!%p2525_p9) target bundleno = 434 (0x1b2), region = 32  ;;  %p2213_p6 = scmp.lt.s32.totalorder (%p2525_p9), %s2212_s30, 64 }
 0x193   : > { %2196 = vst [vmem:[%s2607_s16 + $0xfc8] sm:$0xff] %v1684_v55  ;;  %2197 = vst [vmem:[%s2607_s16 + $0xfd0] sm:$0xff] %v1685_v56  ;;  %v1689_v62 = vmin.f32 %v1177_v57, 1.0 }
 0x194   : > { %2198 = vst [vmem:[%s2607_s16 + $0xfd8] sm:$0xff] %v1686_v58  ;;  %2199 = vst [vmem:[%s2607_s16 + $0xfe0] sm:$0xff] %v1687_v59  ;;  %v1690_v63 = vmin.f32 %v1178_v61, 1.0 }
 0x195   : > { %2200 = vst [vmem:[%s2607_s16 + $0xfe8] sm:$0xff] %v1688_v60  ;;  %2201 = vst [vmem:[%s2607_s16 + $0xff0] sm:$0xff] %v1689_v62 }
 0x196   : > { %2202 = vst [vmem:[%s2607_s16 + $0xff8] sm:$0xff] %v1690_v63 }
 0x197   : > { %s3697_s30 = smov (!%p2213_p6, %s2212_s30), 64 }
 0x198   : > { %s3624_s2 = sshll.u32 %s3697_s30, 10 }
 0x199   : > { %s2218_s4 = ssub.s32 65536, %s3624_s2 }
 0x19a   : > { %2219 = vsyncadd %s2204_s23, %s2218_s4  ;;  %p2317_p10 = scmp.ne.s32.totalorder %s3624_s2, 0  ;;  %s2329_s17 = sshll.u32 %s2502_s10, 16 }
 0x19b   : > { %s3634_s13 = scalar_lea.hbm %s3683_s1, %s2329_s17  ;;  %s2225_s14 = sshll.u32 %s2607_s16, 4  ;;  %s3637_s14 = int_to_ptr.vmem [resolvable:$true] %s2225_s14 }
 0x19c   : > { %s2399_s19 = scalar_lea.vmem %s3637_s14, %s3624_s2  ;;  %s2468_s20 = smov [#allocation5]  }
 0x19d   : > { %p2400_p9 = scmp.ne.s32.totalorder %s3637_s14, %s2399_s19  ;;  %s2403_s21 = sshll.u32 %s2468_s20, 4  ;;  %s2404_s21 = int_to_ptr.vmem [resolvable:$false] %s2403_s21 }
 0x19e   : > { %s2405_s10 = scalar_lea.vmem %s2404_s21, 131072  ;;  %p2406_p7 = scmp.lt.s32.totalorder %s3637_s14, %s2404_s21 }
 0x19f   : > { %p2401_p11 = pnand %p2400_p9, %p2317_p10  ;;  %p2407_p8 = scmp.lt.s32.totalorder %s2405_s10, %s2399_s19 }
 0x1a1   : > { %p2402_p13 = pneg %p2401_p11  ;;  %p2408_p12 = por %p2407_p8, %p2406_p7 }
 0x1a3   : > { %p2409_p0 = pnand %p2408_p12, %p2402_p13 }
 0x1a5   : > { %2412 = shalt.err (!%p2409_p0)
}
 0x1a6   : > { %s2413_s22 = scalar_lea.hbm %s3634_s13, %s3624_s2  ;;  %s2417_s28 = scalar_lea.hbm %s3683_s1, 84992 }
 0x1a7   : > { %p2414_p1 = scmp.ne.s32.totalorder %s3634_s13, %s2413_s22  ;;  %p2418_p4 = scmp.lt.s32.totalorder %s3634_s13, %s3683_s1 }
 0x1a8   : > { %p2419_p5 = scmp.lt.s32.totalorder %s2417_s28, %s2413_s22 }
 0x1a9   : > { %p2415_p3 = pnand %p2414_p1, %p2317_p10 }
 0x1aa   : > { %p2420_p6 = por %p2419_p5, %p2418_p4 }
 0x1ab   : > { %p2416_p2 = pneg %p2415_p3 }
 0x1ad   : > { %p2421_p9 = pnand %p2420_p6, %p2416_p2 }
 0x1af   : > { %2424 = shalt.err (!%p2421_p9)
}
 0x1b0   : > { %s2469_s16 = smov 1024   ;;  %s2470_s25 = smov 64  }
 0x1b1   : > { %2231 = dma.vmem_to_hbm [thread:$0]  (%p2317_p10), %s3637_s14, %s3624_s2, %s3634_s13, %s2204_s23, %s2469_s16, %s2469_s16, %s2470_s25  }
 0x1b2 PF: > { %s2240_s30 = sand.u32 1, %s2451_s6   ;;  %p3688_p11 = scmp.ne.s32.totalorder %s3687_s18, 0 }
 0x1b3   : > { %p3689_p13 = scmp.ge.s32.totalorder %s2463_s9, 2  ;;  %s2241_s4 = scalar_lea.sflag [#allocation4], %s2240_s30 }
 0x1b5   : > { %p2333_p7 = pnand %p3689_p13, %p3688_p11 }
 0x1b7   : > { %p2334_p8 = pneg %p2333_p7 }
 0x1b9   : > { %2446 = dma.done.wait (%p2334_p8), %s2241_s4, 65536  }
 0x1ba   : > { %2448 = vsyncadd (%p2334_p8), %s2241_s4, 4294901760  ;;  %p14_p12 = scmp.ge.s32.totalorder %s2506_s12, 4   ;;  %s3690_s6 = smov %s2455_s7 }
 0x1bb   : > { %s3691_s7 = smov %s2459_s8  ;;  %s3692_s8 = smov %s2518_s15 }
 0x1bc   : > { %s3693_s9 = smov %s2506_s12  ;;  %16 = sbr.rel (!%p14_p12) target bundleno = 5 (0x5), region = 69 }
 0x1c1   :  { %2246 = vsyncpa [#allocation3], 1 }
 0x1c2   :  { %2248 = vsyncpa [#allocation3 + $0x1], 1 }
 0x1c3   :  { %2249 = vsyncpa [#allocation4], 1 }
 0x1c4   :  { %2251 = vsyncpa [#allocation4 + $0x1], 1 }

</bundles_post_ra>
